<compile_context>
chip_gen: v6e
topology: v6e:2x2x1
jax: 0.10.0
libtpu: 0.0.40
codegen_flags: <defaults>
</compile_context>

<pallas_src>
import functools

import jax
import jax.numpy as jnp
from jax.experimental import pallas as pl
from jax.experimental.pallas import tpu as pltpu

EPS = 1e-5          # torch.nn.LayerNorm default eps
LANE = 128
SUBLANE = 8


def _round_up(x, m):
    return (x + m - 1) // m * m


# ----------------------------- in-kernel helpers -----------------------------
def _mm(a, b):
    """MXU matmul: bf16 operands, f32 accumulation."""
    return jnp.dot(a.astype(jnp.bfloat16), b.astype(jnp.bfloat16),
                   preferred_element_type=jnp.float32)


def _silu(x):
    return x * jax.nn.sigmoid(x)


def _layernorm(h, gamma, beta, true_h):
    """LayerNorm over the first `true_h` lanes of a lane-padded array.

    Padded lanes of `h`, `gamma`, `beta` are exactly zero, so padded lanes of
    the output are also exactly zero."""
    inv_n = 1.0 / true_h
    mu = jnp.sum(h, axis=-1, keepdims=True) * inv_n
    var = jnp.sum(h * h, axis=-1, keepdims=True) * inv_n - mu * mu
    inv_sigma = jax.lax.rsqrt(var + EPS)          # EUP slot
    return (h - mu) * inv_sigma * gamma + beta


# --------------------------------- kernels -----------------------------------
def edge_node_kernel(src_col_ref, dst_col_ref, dst_row_ref, edge_ref,
                     grid_ref, mesh_ref,
                     ew1e_ref, ew1s_ref, ew1d_ref, eb1_ref, ew2_ref, eb2_ref,
                     eg_ref, ebt_ref,
                     nw1n_ref, nw1a_ref, nb1_ref, nw2_ref, nb2_ref,
                     ng_ref, nbt_ref,
                     mesh_out_ref,
                     agg_ref, gproj_ref, mproj_ref,
                     *, true_h):
    """Fused MeshEdgeBlock + scatter-sum + MeshNodeBlock.

    step 0      : gproj = grid @ W1s, mproj = mesh @ W1d (per-node, once)
    per edge    : e' = e + LN(W2 @ SiLU(e@W1e + gproj[src] + mproj[dst] + b1))
                  agg[dst] += e'
    last step   : mesh_out = mesh + LN(W2n @ SiLU(mesh@W1n + agg@W1a + b1n))
    """
    i = pl.program_id(0)

    @pl.when(i == 0)
    def _():
        agg_ref[...] = jnp.zeros_like(agg_ref)
        # Node tables are resident: project them once (O(nodes), not O(edges)).
        gproj_ref[...] = _mm(grid_ref[...], ew1s_ref[...]).astype(gproj_ref.dtype)
        mproj_ref[...] = _mm(mesh_ref[...], ew1d_ref[...]).astype(mproj_ref.dtype)

    tile_e = edge_ref.shape[0]
    n_grid = grid_ref.shape[0]
    n_mesh = mesh_ref.shape[0]

    # --- gather projected node features for this edge tile (one-hot on MXU)
    oh_src = (jax.lax.broadcasted_iota(jnp.int32, (tile_e, n_grid), 1)
              == src_col_ref[...]).astype(jnp.bfloat16)          # [tile_e, n_grid]
    oh_dst = (jax.lax.broadcasted_iota(jnp.int32, (tile_e, n_mesh), 1)
              == dst_col_ref[...]).astype(jnp.bfloat16)          # [tile_e, n_mesh]
    src_c = _mm(oh_src, gproj_ref[...])                          # [tile_e, Hp]
    dst_c = _mm(oh_dst, mproj_ref[...])                          # [tile_e, Hp]

    # --- edge MLP (concat realised as split W1)
    e = edge_ref[...]
    h = _mm(e, ew1e_ref[...]) + src_c + dst_c + eb1_ref[...]
    h = _silu(h)
    h = _mm(h, ew2_ref[...]) + eb2_ref[...]
    h = _layernorm(h, eg_ref[...], ebt_ref[...], true_h)
    e_new = e + h                                                # MeshEdgeBlock residual

    # --- scatter-sum of e' onto destination mesh nodes (one-hot matmul).
    # Padded edges carry dst == n_mesh -> all-zero mask row -> no contribution.
    scat = (jax.lax.broadcasted_iota(jnp.int32, (n_mesh, tile_e), 0)
            == dst_row_ref[...]).astype(jnp.bfloat16)            # [n_mesh, tile_e]
    agg_ref[...] += _mm(scat, e_new)

    # --- mesh-node MLP once all edge tiles have been accumulated
    @pl.when(i == pl.num_programs(0) - 1)
    def _():
        n = mesh_ref[...]
        hn = (_mm(n, nw1n_ref[...]) + _mm(agg_ref[...], nw1a_ref[...])
              + nb1_ref[...])
        hn = _silu(hn)
        hn = _mm(hn, nw2_ref[...]) + nb2_ref[...]
        hn = _layernorm(hn, ng_ref[...], nbt_ref[...], true_h)
        mesh_out_ref[...] = n + hn          # encoder-level `mesh + n_feats`


def grid_mlp_kernel(x_ref, w1_ref, b1_ref, w2_ref, b2_ref, g_ref, bt_ref,
                    out_ref, *, true_h):
    """grid' = grid + LN(W2 @ SiLU(W1 @ grid)), tiled over grid-node rows."""
    x = x_ref[...]
    h = _mm(x, w1_ref[...]) + b1_ref[...]
    h = _silu(h)
    h = _mm(h, w2_ref[...]) + b2_ref[...]
    h = _layernorm(h, g_ref[...], bt_ref[...], true_h)
    out_ref[...] = x + h


# ------------------------------- wrappers -------------------------------------
def _pad2(a, rows, cols):
    return jnp.pad(a, ((0, rows - a.shape[0]), (0, cols - a.shape[1])))


def _full_spec(arr):
    # Untiled, VMEM-resident block (weights / node tables).
    return pl.BlockSpec(arr.shape, lambda i: (0, 0))


def _prep_params(p, hp):
    """Zero-pad params to the padded hidden dim.  Weights -> bf16 (MXU
    operands); biases / LayerNorm affine stay f32.  Gamma is zero-padded so
    padded lanes stay exactly zero after LayerNorm."""
    out = {}
    for k, v in p.items():
        if v.shape[0] == 1:                              # bias / gamma / beta
            out[k] = _pad2(v, 1, hp).astype(jnp.float32)
        else:                                            # [H, H] weight
            out[k] = _pad2(v, hp, hp).astype(jnp.bfloat16)
    return out


def graphcast_encoder(params, grid_nodes, mesh_nodes, edge_feats,
                      src_idx, dst_idx, *, tile_e=128, tile_g=256):
    """GraphCastEncoder.forward -> (grid_node_features, mesh_node_features)."""
    n_grid, hidden = grid_nodes.shape
    n_mesh = mesh_nodes.shape[0]
    n_edge = edge_feats.shape[0]
    hp = _round_up(hidden, LANE)

    p = _prep_params(params, hp)

    # ---- tile-size legalization (last / second-to-last dim constraints) ------
    if n_edge <= tile_e:
        tile_e = _round_up(n_edge, SUBLANE)      # single full tile
    else:
        tile_e = _round_up(tile_e, LANE)         # dst_row block last dim = tile_e
    e_p = _round_up(n_edge, tile_e)

    tile_g = min(tile_g, _round_up(n_grid, SUBLANE))
    tile_g = _round_up(tile_g, SUBLANE)
    g_p = _round_up(n_grid, tile_g)

    m_p = _round_up(n_mesh, SUBLANE)

    # ---- pad inputs: rows to tile multiples, hidden to full lanes -------------
    grid_pad = _pad2(grid_nodes.astype(jnp.float32), g_p, hp)
    mesh_pad = _pad2(mesh_nodes.astype(jnp.float32), m_p, hp)
    edge_pad = _pad2(edge_feats.astype(jnp.float32), e_p, hp)
    # Padded edges: dst = m_p (never matches -> no scatter), src = 0 (harmless).
    src_flat = jnp.pad(src_idx.astype(jnp.int32), (0, e_p - n_edge))
    dst_flat = jnp.pad(dst_idx.astype(jnp.int32), (0, e_p - n_edge),
                       constant_values=m_p)
    src_col = src_flat.reshape(e_p, 1)
    dst_col = dst_flat.reshape(e_p, 1)
    dst_row = dst_flat.reshape(1, e_p)

    edge_tile = lambda i: (i, 0)

    # ---- fused edge MLP + scatter-sum + mesh-node MLP -------------------------
    mesh_out = pl.pallas_call(
        functools.partial(edge_node_kernel, true_h=float(hidden)),
        out_shape=jax.ShapeDtypeStruct((m_p, hp), jnp.float32),
        grid=(e_p // tile_e,),
        in_specs=[
            pl.BlockSpec((tile_e, 1), edge_tile),          # src indices (col)
            pl.BlockSpec((tile_e, 1), edge_tile),          # dst indices (col)
            pl.BlockSpec((1, tile_e), lambda i: (0, i)),   # dst indices (row)
            pl.BlockSpec((tile_e, hp), edge_tile),         # edge features
            _full_spec(grid_pad),                          # grid node table (resident)
            _full_spec(mesh_pad),                          # mesh node table (resident)
            _full_spec(p["e_w1e"]), _full_spec(p["e_w1s"]), _full_spec(p["e_w1d"]),
            _full_spec(p["e_b1"]), _full_spec(p["e_w2"]), _full_spec(p["e_b2"]),
            _full_spec(p["e_g"]), _full_spec(p["e_b"]),
            _full_spec(p["n_w1n"]), _full_spec(p["n_w1a"]), _full_spec(p["n_b1"]),
            _full_spec(p["n_w2"]), _full_spec(p["n_b2"]),
            _full_spec(p["n_g"]), _full_spec(p["n_b"]),
        ],
        out_specs=pl.BlockSpec((m_p, hp), lambda i: (0, 0)),   # resident output
        scratch_shapes=[pltpu.VMEM((m_p, hp), jnp.float32),    # agg accumulator
                        pltpu.VMEM((g_p, hp), jnp.bfloat16),   # grid @ W1s
                        pltpu.VMEM((m_p, hp), jnp.bfloat16)],  # mesh @ W1d
        compiler_params=pltpu.CompilerParams(
            dimension_semantics=("arbitrary",)),     # reduction into agg scratch
    )(src_col, dst_col, dst_row, edge_pad, grid_pad, mesh_pad,
      p["e_w1e"], p["e_w1s"], p["e_w1d"], p["e_b1"], p["e_w2"], p["e_b2"],
      p["e_g"], p["e_b"],
      p["n_w1n"], p["n_w1a"], p["n_b1"], p["n_w2"], p["n_b2"],
      p["n_g"], p["n_b"])

    # ---- grid-node MLP (independent, row-parallel) -----------------------------
    grid_out = pl.pallas_call(
        functools.partial(grid_mlp_kernel, true_h=float(hidden)),
        out_shape=jax.ShapeDtypeStruct((g_p, hp), jnp.float32),
        grid=(g_p // tile_g,),
        in_specs=[
            pl.BlockSpec((tile_g, hp), lambda i: (i, 0)),
            _full_spec(p["g_w1"]), _full_spec(p["g_b1"]),
            _full_spec(p["g_w2"]), _full_spec(p["g_b2"]),
            _full_spec(p["g_g"]), _full_spec(p["g_b"]),
        ],
        out_specs=pl.BlockSpec((tile_g, hp), lambda i: (i, 0)),
        compiler_params=pltpu.CompilerParams(
            dimension_semantics=("parallel",)),      # megacore-shardable on v7x
    )(grid_pad, p["g_w1"], p["g_b1"], p["g_w2"], p["g_b2"], p["g_g"], p["g_b"])

    return grid_out[:n_grid, :hidden], mesh_out[:n_mesh, :hidden]


# ------------------------- pure-JAX reference ---------------------------------
def _ref_mm(a, b):
    # Mirror the kernel's matmul policy: bf16 operands, f32 accumulation.
    return jnp.dot(a.astype(jnp.bfloat16), b.astype(jnp.bfloat16),
                   preferred_element_type=jnp.float32)


def _ref_ln(h, g, b):
    mu = jnp.mean(h, -1, keepdims=True)
    var = jnp.mean(h * h, -1, keepdims=True) - mu * mu
    return (h - mu) * jax.lax.rsqrt(var + EPS) * g + b


def reference(p, grid_nodes, mesh_nodes, edge_feats, src_idx, dst_idx):
    bf = lambda x: x.astype(jnp.bfloat16).astype(jnp.float32)

    # Edge MLP (gather and linear projection commute; mirrors kernel rounding).
    src_c = bf(_ref_mm(grid_nodes, p["e_w1s"]))[src_idx]
    dst_c = bf(_ref_mm(mesh_nodes, p["e_w1d"]))[dst_idx]
    h = _ref_mm(edge_feats, p["e_w1e"]) + src_c + dst_c + p["e_b1"]
    h = h * jax.nn.sigmoid(h)
    h = _ref_mm(h, p["e_w2"]) + p["e_b2"]
    h = _ref_ln(h, p["e_g"], p["e_b"])
    e_new = edge_feats + h

    agg = jax.ops.segment_sum(bf(e_new), dst_idx,
                              num_segments=mesh_nodes.shape[0])
    hn = _ref_mm(mesh_nodes, p["n_w1n"]) + _ref_mm(agg, p["n_w1a"]) + p["n_b1"]
    hn = hn * jax.nn.sigmoid(hn)
    hn = _ref_mm(hn, p["n_w2"]) + p["n_b2"]
    hn = _ref_ln(hn, p["n_g"], p["n_b"])
    mesh_out = mesh_nodes + hn

    hg = _ref_mm(grid_nodes, p["g_w1"]) + p["g_b1"]
    hg = hg * jax.nn.sigmoid(hg)
    hg = _ref_mm(hg, p["g_w2"]) + p["g_b2"]
    hg = _ref_ln(hg, p["g_g"], p["g_b"])
    grid_out = grid_nodes + hg
    return grid_out, mesh_out


# ------------------------------- param init -----------------------------------
def init_params(key, hidden):
    """Deterministic init mimicking torch.nn.Linear defaults (weights [in, out])."""
    keys = iter(jax.random.split(key, 32))

    def lin(fan_in, fan_out):
        bound = 1.0 / jnp.sqrt(fan_in)
        w = jax.random.uniform(next(keys), (fan_in, fan_out), jnp.float32, -bound, bound)
        b = jax.random.uniform(next(keys), (1, fan_out), jnp.float32, -bound, bound)
        return w, b

    p = {}
    # edge MLP: Linear(3H -> H) split into three HxH blocks, Linear(H -> H), LN(H)
    w1, b1 = lin(3 * hidden, hidden)
    p["e_w1e"], p["e_w1s"], p["e_w1d"] = w1[:hidden], w1[hidden:2 * hidden], w1[2 * hidden:]
    p["e_b1"] = b1
    p["e_w2"], p["e_b2"] = lin(hidden, hidden)
    p["e_g"] = jnp.ones((1, hidden), jnp.float32)
    p["e_b"] = jnp.zeros((1, hidden), jnp.float32)
    # mesh node MLP: Linear(2H -> H) split into two HxH blocks, Linear(H -> H), LN(H)
    w1, b1 = lin(2 * hidden, hidden)
    p["n_w1n"], p["n_w1a"] = w1[:hidden], w1[hidden:]
    p["n_b1"] = b1
    p["n_w2"], p["n_b2"] = lin(hidden, hidden)
    p["n_g"] = jnp.ones((1, hidden), jnp.float32)
    p["n_b"] = jnp.zeros((1, hidden), jnp.float32)
    # grid node MLP: Linear(H -> H), Linear(H -> H), LN(H)
    p["g_w1"], p["g_b1"] = lin(hidden, hidden)
    p["g_w2"], p["g_b2"] = lin(hidden, hidden)
    p["g_g"] = jnp.ones((1, hidden), jnp.float32)
    p["g_b"] = jnp.zeros((1, hidden), jnp.float32)
    return p


# --------------------------------- main ---------------------------------------
if __name__ == "__main__":
    HIDDEN = 32     # cfg.model.hidden_dim (lane-padded to 128 inside the wrapper)
    N_GRID = 64     # grid nodes
    N_MESH = 32     # mesh nodes
    N_EDGE = 512    # grid2mesh edges

    key = jax.random.PRNGKey(0)
    k_par, k_g, k_m, k_e, k_s, k_d = jax.random.split(key, 6)

    params = init_params(k_par, HIDDEN)
    grid_nodes = jax.random.normal(k_g, (N_GRID, HIDDEN), jnp.float32)
    mesh_nodes = jax.random.normal(k_m, (N_MESH, HIDDEN), jnp.float32)
    edge_feats = jax.random.normal(k_e, (N_EDGE, HIDDEN), jnp.float32)
    src_idx = jax.random.randint(k_s, (N_EDGE,), 0, N_GRID, jnp.int32)
    dst_idx = jax.random.randint(k_d, (N_EDGE,), 0, N_MESH, jnp.int32)

    run = jax.jit(functools.partial(graphcast_encoder, params,
                                    tile_e=128, tile_g=128))
    grid_out, mesh_out = run(grid_nodes, mesh_nodes, edge_feats, src_idx, dst_idx)
    jax.block_until_ready((grid_out, mesh_out))

    grid_ref, mesh_ref = reference(params, grid_nodes, mesh_nodes,
                                   edge_feats, src_idx, dst_idx)
    assert grid_out.shape == grid_nodes.shape and mesh_out.shape == mesh_nodes.shape
    assert jnp.allclose(grid_out, grid_ref, rtol=2e-3, atol=2e-3), "grid mismatch"
    assert jnp.allclose(mesh_out, mesh_ref, rtol=2e-3, atol=2e-3), "mesh mismatch"

    print("KERNEL_OK")
</pallas_src>

<mosaic_0001>
module attributes {stable_mosaic.version = 11 : i64} {
  func.func @edge_node_kernel(%arg0: i32, %arg1: memref<128x1xi32, #tpu.memory_space<vmem>>, %arg2: memref<128x1xi32, #tpu.memory_space<vmem>>, %arg3: memref<1x128xi32, #tpu.memory_space<vmem>>, %arg4: memref<128x128xf32, #tpu.memory_space<vmem>>, %arg5: memref<64x128xf32, #tpu.memory_space<vmem>>, %arg6: memref<32x128xf32, #tpu.memory_space<vmem>>, %arg7: memref<128x128xbf16, #tpu.memory_space<vmem>>, %arg8: memref<128x128xbf16, #tpu.memory_space<vmem>>, %arg9: memref<128x128xbf16, #tpu.memory_space<vmem>>, %arg10: memref<1x128xf32, #tpu.memory_space<vmem>>, %arg11: memref<128x128xbf16, #tpu.memory_space<vmem>>, %arg12: memref<1x128xf32, #tpu.memory_space<vmem>>, %arg13: memref<1x128xf32, #tpu.memory_space<vmem>>, %arg14: memref<1x128xf32, #tpu.memory_space<vmem>>, %arg15: memref<128x128xbf16, #tpu.memory_space<vmem>>, %arg16: memref<128x128xbf16, #tpu.memory_space<vmem>>, %arg17: memref<1x128xf32, #tpu.memory_space<vmem>>, %arg18: memref<128x128xbf16, #tpu.memory_space<vmem>>, %arg19: memref<1x128xf32, #tpu.memory_space<vmem>>, %arg20: memref<1x128xf32, #tpu.memory_space<vmem>>, %arg21: memref<1x128xf32, #tpu.memory_space<vmem>>, %arg22: memref<32x128xf32, #tpu.memory_space<vmem>>, %arg23: memref<32x128xf32, #tpu.memory_space<vmem>>, %arg24: memref<64x128xbf16, #tpu.memory_space<vmem>>, %arg25: memref<32x128xbf16, #tpu.memory_space<vmem>>) attributes {dimension_semantics = [#tpu.dimension_semantics<arbitrary>], iteration_bounds = array<i64: 4>, scalar_prefetch = 0 : i64, scratch_operands = 3 : i64, tpu.core_type = #tpu.core_type<tc>, window_params = [{transform_indices = @transform_0, window_bounds = array<i64: 128, 1>}, {transform_indices = @transform_1, window_bounds = array<i64: 128, 1>}, {transform_indices = @transform_2, window_bounds = array<i64: 1, 128>}, {transform_indices = @transform_3, window_bounds = array<i64: 128, 128>}, {pipeline_mode = #tpu.pipeline_mode<synchronous>, transform_indices = @transform_4, window_bounds = array<i64: 64, 128>}, {pipeline_mode = #tpu.pipeline_mode<synchronous>, transform_indices = @transform_5, window_bounds = array<i64: 32, 128>}, {pipeline_mode = #tpu.pipeline_mode<synchronous>, transform_indices = @transform_6, window_bounds = array<i64: 128, 128>}, {pipeline_mode = #tpu.pipeline_mode<synchronous>, transform_indices = @transform_7, window_bounds = array<i64: 128, 128>}, {pipeline_mode = #tpu.pipeline_mode<synchronous>, transform_indices = @transform_8, window_bounds = array<i64: 128, 128>}, {pipeline_mode = #tpu.pipeline_mode<synchronous>, transform_indices = @transform_9, window_bounds = array<i64: 1, 128>}, {pipeline_mode = #tpu.pipeline_mode<synchronous>, transform_indices = @transform_10, window_bounds = array<i64: 128, 128>}, {pipeline_mode = #tpu.pipeline_mode<synchronous>, transform_indices = @transform_11, window_bounds = array<i64: 1, 128>}, {pipeline_mode = #tpu.pipeline_mode<synchronous>, transform_indices = @transform_12, window_bounds = array<i64: 1, 128>}, {pipeline_mode = #tpu.pipeline_mode<synchronous>, transform_indices = @transform_13, window_bounds = array<i64: 1, 128>}, {pipeline_mode = #tpu.pipeline_mode<synchronous>, transform_indices = @transform_14, window_bounds = array<i64: 128, 128>}, {pipeline_mode = #tpu.pipeline_mode<synchronous>, transform_indices = @transform_15, window_bounds = array<i64: 128, 128>}, {pipeline_mode = #tpu.pipeline_mode<synchronous>, transform_indices = @transform_16, window_bounds = array<i64: 1, 128>}, {pipeline_mode = #tpu.pipeline_mode<synchronous>, transform_indices = @transform_17, window_bounds = array<i64: 128, 128>}, {pipeline_mode = #tpu.pipeline_mode<synchronous>, transform_indices = @transform_18, window_bounds = array<i64: 1, 128>}, {pipeline_mode = #tpu.pipeline_mode<synchronous>, transform_indices = @transform_19, window_bounds = array<i64: 1, 128>}, {pipeline_mode = #tpu.pipeline_mode<synchronous>, transform_indices = @transform_20, window_bounds = array<i64: 1, 128>}, {pipeline_mode = #tpu.pipeline_mode<synchronous>, transform_indices = @transform_21, window_bounds = array<i64: 32, 128>}]} {
    %c0_i32 = arith.constant 0 : i32
    %0 = arith.cmpi eq, %arg0, %c0_i32 : i32
    %1 = arith.extui %0 : i1 to i32
    %c0_i32_0 = arith.constant 0 : i32
    %2 = arith.cmpi ne, %1, %c0_i32_0 : i32
    scf.if %2 {
      %cst_39 = arith.constant 0.000000e+00 : f32
      %82 = vector.broadcast %cst_39 : f32 to vector<32x128xf32>
      %c0_40 = arith.constant 0 : index
      %c0_41 = arith.constant 0 : index
      %83 = vector.load %arg23[%c0_40, %c0_41] : memref<32x128xf32, #tpu.memory_space<vmem>>, vector<32x128xf32>
      tpu.vector_store %arg23[%c0_40, %c0_41], %82 {strides = array<i32>} : memref<32x128xf32, #tpu.memory_space<vmem>>, vector<32x128xf32>,
      %c0_42 = arith.constant 0 : index
      %c0_43 = arith.constant 0 : index
      %84 = vector.load %arg5[%c0_42, %c0_43] : memref<64x128xf32, #tpu.memory_space<vmem>>, vector<64x128xf32>
      %c0_44 = arith.constant 0 : index
      %c0_45 = arith.constant 0 : index
      %85 = vector.load %arg8[%c0_44, %c0_45] : memref<128x128xbf16, #tpu.memory_space<vmem>>, vector<128x128xbf16>
      %86 = arith.truncf %84 : vector<64x128xf32> to vector<64x128xbf16>
      %cst_46 = arith.constant dense<0.000000e+00> : vector<64x128xf32>
      %87 = tpu.matmul %86, %85, %cst_46 {dimension_numbers = #tpu.dot_dimension_numbers<[1], [0], [0], [1], [0, 0, 1, 1], [], []>} : vector<64x128xbf16>, vector<128x128xbf16>, vector<64x128xf32> -> vector<64x128xf32>
      %88 = arith.truncf %87 : vector<64x128xf32> to vector<64x128xbf16>
      %c0_47 = arith.constant 0 : index
      %c0_48 = arith.constant 0 : index
      %89 = vector.load %arg24[%c0_47, %c0_48] : memref<64x128xbf16, #tpu.memory_space<vmem>>, vector<64x128xbf16>
      tpu.vector_store %arg24[%c0_47, %c0_48], %88 {strides = array<i32>} : memref<64x128xbf16, #tpu.memory_space<vmem>>, vector<64x128xbf16>,
      %c0_49 = arith.constant 0 : index
      %c0_50 = arith.constant 0 : index
      %90 = vector.load %arg6[%c0_49, %c0_50] : memref<32x128xf32, #tpu.memory_space<vmem>>, vector<32x128xf32>
      %c0_51 = arith.constant 0 : index
      %c0_52 = arith.constant 0 : index
      %91 = vector.load %arg9[%c0_51, %c0_52] : memref<128x128xbf16, #tpu.memory_space<vmem>>, vector<128x128xbf16>
      %92 = arith.truncf %90 : vector<32x128xf32> to vector<32x128xbf16>
      %cst_53 = arith.constant dense<0.000000e+00> : vector<32x128xf32>
      %93 = tpu.matmul %92, %91, %cst_53 {dimension_numbers = #tpu.dot_dimension_numbers<[1], [0], [0], [1], [0, 0, 1, 1], [], []>} : vector<32x128xbf16>, vector<128x128xbf16>, vector<32x128xf32> -> vector<32x128xf32>
      %94 = arith.truncf %93 : vector<32x128xf32> to vector<32x128xbf16>
      %c0_54 = arith.constant 0 : index
      %c0_55 = arith.constant 0 : index
      %95 = vector.load %arg25[%c0_54, %c0_55] : memref<32x128xbf16, #tpu.memory_space<vmem>>, vector<32x128xbf16>
      tpu.vector_store %arg25[%c0_54, %c0_55], %94 {strides = array<i32>} : memref<32x128xbf16, #tpu.memory_space<vmem>>, vector<32x128xbf16>,
    } else {
    }
    %3 = tpu.iota {dimensions = array<i32: 1>} : vector<128x64xi32>
    %c0 = arith.constant 0 : index
    %c0_1 = arith.constant 0 : index
    %4 = vector.load %arg1[%c0, %c0_1] : memref<128x1xi32, #tpu.memory_space<vmem>>, vector<128x1xi32>
    %5 = vector.broadcast %4 : vector<128x1xi32> to vector<128x64xi32>
    %6 = arith.cmpi eq, %3, %5 : vector<128x64xi32>
    %7 = arith.extui %6 : vector<128x64xi1> to vector<128x64xi32>
    %8 = arith.sitofp %7 : vector<128x64xi32> to vector<128x64xf32>
    %9 = arith.truncf %8 : vector<128x64xf32> to vector<128x64xbf16>
    %10 = tpu.iota {dimensions = array<i32: 1>} : vector<128x32xi32>
    %c0_2 = arith.constant 0 : index
    %c0_3 = arith.constant 0 : index
    %11 = vector.load %arg2[%c0_2, %c0_3] : memref<128x1xi32, #tpu.memory_space<vmem>>, vector<128x1xi32>
    %12 = vector.broadcast %11 : vector<128x1xi32> to vector<128x32xi32>
    %13 = arith.cmpi eq, %10, %12 : vector<128x32xi32>
    %14 = arith.extui %13 : vector<128x32xi1> to vector<128x32xi32>
    %15 = arith.sitofp %14 : vector<128x32xi32> to vector<128x32xf32>
    %16 = arith.truncf %15 : vector<128x32xf32> to vector<128x32xbf16>
    %c0_4 = arith.constant 0 : index
    %c0_5 = arith.constant 0 : index
    %17 = vector.load %arg24[%c0_4, %c0_5] : memref<64x128xbf16, #tpu.memory_space<vmem>>, vector<64x128xbf16>
    %cst = arith.constant dense<0.000000e+00> : vector<128x128xf32>
    %18 = tpu.matmul %9, %17, %cst {dimension_numbers = #tpu.dot_dimension_numbers<[1], [0], [0], [1], [0, 0, 1, 1], [], []>} : vector<128x64xbf16>, vector<64x128xbf16>, vector<128x128xf32> -> vector<128x128xf32>
    %c0_6 = arith.constant 0 : index
    %c0_7 = arith.constant 0 : index
    %19 = vector.load %arg25[%c0_6, %c0_7] : memref<32x128xbf16, #tpu.memory_space<vmem>>, vector<32x128xbf16>
    %cst_8 = arith.constant dense<0.000000e+00> : vector<128x128xf32>
    %20 = tpu.matmul %16, %19, %cst_8 {dimension_numbers = #tpu.dot_dimension_numbers<[1], [0], [0], [1], [0, 0, 1, 1], [], []>} : vector<128x32xbf16>, vector<32x128xbf16>, vector<128x128xf32> -> vector<128x128xf32>
    %c0_9 = arith.constant 0 : index
    %c0_10 = arith.constant 0 : index
    %21 = vector.load %arg4[%c0_9, %c0_10] : memref<128x128xf32, #tpu.memory_space<vmem>>, vector<128x128xf32>
    %c0_11 = arith.constant 0 : index
    %c0_12 = arith.constant 0 : index
    %22 = vector.load %arg7[%c0_11, %c0_12] : memref<128x128xbf16, #tpu.memory_space<vmem>>, vector<128x128xbf16>
    %23 = arith.truncf %21 : vector<128x128xf32> to vector<128x128xbf16>
    %cst_13 = arith.constant dense<0.000000e+00> : vector<128x128xf32>
    %24 = tpu.matmul %23, %22, %cst_13 {dimension_numbers = #tpu.dot_dimension_numbers<[1], [0], [0], [1], [0, 0, 1, 1], [], []>} : vector<128x128xbf16>, vector<128x128xbf16>, vector<128x128xf32> -> vector<128x128xf32>
    %25 = arith.addf %24, %18 : vector<128x128xf32>
    %26 = arith.addf %25, %20 : vector<128x128xf32>
    %c0_14 = arith.constant 0 : index
    %c0_15 = arith.constant 0 : index
    %27 = vector.load %arg10[%c0_14, %c0_15] : memref<1x128xf32, #tpu.memory_space<vmem>>, vector<1x128xf32>
    %28 = vector.broadcast %27 : vector<1x128xf32> to vector<128x128xf32>
    %29 = arith.addf %26, %28 : vector<128x128xf32>
    %30 = arith.negf %29 : vector<128x128xf32>
    %31 = math.exp %30 : vector<128x128xf32>
    %cst_16 = arith.constant 1.000000e+00 : f32
    %32 = vector.broadcast %cst_16 : f32 to vector<128x128xf32>
    %33 = arith.addf %32, %31 : vector<128x128xf32>
    %34 = arith.divf %32, %33 : vector<128x128xf32>
    %35 = arith.mulf %29, %34 : vector<128x128xf32>
    %c0_17 = arith.constant 0 : index
    %c0_18 = arith.constant 0 : index
    %36 = vector.load %arg11[%c0_17, %c0_18] : memref<128x128xbf16, #tpu.memory_space<vmem>>, vector<128x128xbf16>
    %37 = arith.truncf %35 : vector<128x128xf32> to vector<128x128xbf16>
    %cst_19 = arith.constant dense<0.000000e+00> : vector<128x128xf32>
    %38 = tpu.matmul %37, %36, %cst_19 {dimension_numbers = #tpu.dot_dimension_numbers<[1], [0], [0], [1], [0, 0, 1, 1], [], []>} : vector<128x128xbf16>, vector<128x128xbf16>, vector<128x128xf32> -> vector<128x128xf32>
    %c0_20 = arith.constant 0 : index
    %c0_21 = arith.constant 0 : index
    %39 = vector.load %arg12[%c0_20, %c0_21] : memref<1x128xf32, #tpu.memory_space<vmem>>, vector<1x128xf32>
    %40 = vector.broadcast %39 : vector<1x128xf32> to vector<128x128xf32>
    %41 = arith.addf %38, %40 : vector<128x128xf32>
    %c0_22 = arith.constant 0 : index
    %c0_23 = arith.constant 0 : index
    %42 = vector.load %arg13[%c0_22, %c0_23] : memref<1x128xf32, #tpu.memory_space<vmem>>, vector<1x128xf32>
    %c0_24 = arith.constant 0 : index
    %c0_25 = arith.constant 0 : index
    %43 = vector.load %arg14[%c0_24, %c0_25] : memref<1x128xf32, #tpu.memory_space<vmem>>, vector<1x128xf32>
    %cst_26 = arith.constant dense<0.000000e+00> : vector<128xf32>
    %44 = vector.multi_reduction <add>, %41, %cst_26 [1] : vector<128x128xf32> to vector<128xf32>
    %45 = vector.shape_cast %44 : vector<128xf32> to vector<128x1xf32>
    %cst_27 = arith.constant 3.125000e-02 : f32
    %46 = vector.broadcast %cst_27 : f32 to vector<128x1xf32>
    %47 = arith.mulf %45, %46 : vector<128x1xf32>
    %48 = arith.mulf %41, %41 : vector<128x128xf32>
    %cst_28 = arith.constant dense<0.000000e+00> : vector<128xf32>
    %49 = vector.multi_reduction <add>, %48, %cst_28 [1] : vector<128x128xf32> to vector<128xf32>
    %50 = vector.shape_cast %49 : vector<128xf32> to vector<128x1xf32>
    %cst_29 = arith.constant 3.125000e-02 : f32
    %51 = vector.broadcast %cst_29 : f32 to vector<128x1xf32>
    %52 = arith.mulf %50, %51 : vector<128x1xf32>
    %53 = arith.mulf %47, %47 : vector<128x1xf32>
    %54 = arith.subf %52, %53 : vector<128x1xf32>
    %cst_30 = arith.constant 9.99999974E-6 : f32
    %55 = vector.broadcast %cst_30 : f32 to vector<128x1xf32>
    %56 = arith.addf %54, %55 : vector<128x1xf32>
    %57 = math.rsqrt %56 : vector<128x1xf32>
    %58 = vector.broadcast %47 : vector<128x1xf32> to vector<128x128xf32>
    %59 = arith.subf %41, %58 : vector<128x128xf32>
    %60 = vector.broadcast %57 : vector<128x1xf32> to vector<128x128xf32>
    %61 = arith.mulf %59, %60 : vector<128x128xf32>
    %62 = vector.broadcast %42 : vector<1x128xf32> to vector<128x128xf32>
    %63 = arith.mulf %61, %62 : vector<128x128xf32>
    %64 = vector.broadcast %43 : vector<1x128xf32> to vector<128x128xf32>
    %65 = arith.addf %63, %64 : vector<128x128xf32>
    %66 = arith.addf %21, %65 : vector<128x128xf32>
    %67 = tpu.iota {dimensions = array<i32: 0>} : vector<32x128xi32>
    %c0_31 = arith.constant 0 : index
    %c0_32 = arith.constant 0 : index
    %68 = vector.load %arg3[%c0_31, %c0_32] : memref<1x128xi32, #tpu.memory_space<vmem>>, vector<1x128xi32>
    %69 = vector.broadcast %68 : vector<1x128xi32> to vector<32x128xi32>
    %70 = arith.cmpi eq, %67, %69 : vector<32x128xi32>
    %71 = arith.extui %70 : vector<32x128xi1> to vector<32x128xi32>
    %72 = arith.sitofp %71 : vector<32x128xi32> to vector<32x128xf32>
    %73 = arith.truncf %72 : vector<32x128xf32> to vector<32x128xbf16>
    %c0_33 = arith.constant 0 : index
    %c0_34 = arith.constant 0 : index
    %74 = vector.load %arg23[%c0_33, %c0_34] : memref<32x128xf32, #tpu.memory_space<vmem>>, vector<32x128xf32>
    %75 = arith.truncf %66 : vector<128x128xf32> to vector<128x128xbf16>
    %cst_35 = arith.constant dense<0.000000e+00> : vector<32x128xf32>
    %76 = tpu.matmul %73, %75, %cst_35 {dimension_numbers = #tpu.dot_dimension_numbers<[1], [0], [0], [1], [0, 0, 1, 1], [], []>} : vector<32x128xbf16>, vector<128x128xbf16>, vector<32x128xf32> -> vector<32x128xf32>
    %77 = arith.addf %74, %76 : vector<32x128xf32>
    %c0_36 = arith.constant 0 : index
    %c0_37 = arith.constant 0 : index
    %78 = vector.load %arg23[%c0_36, %c0_37] : memref<32x128xf32, #tpu.memory_space<vmem>>, vector<32x128xf32>
    tpu.vector_store %arg23[%c0_36, %c0_37], %77 {strides = array<i32>} : memref<32x128xf32, #tpu.memory_space<vmem>>, vector<32x128xf32>,
    %c3_i32 = arith.constant 3 : i32
    %79 = arith.cmpi eq, %arg0, %c3_i32 : i32
    %80 = arith.extui %79 : i1 to i32
    %c0_i32_38 = arith.constant 0 : i32
    %81 = arith.cmpi ne, %80, %c0_i32_38 : i32
    scf.if %81 {
      %c0_39 = arith.constant 0 : index
      %c0_40 = arith.constant 0 : index
      %82 = vector.load %arg6[%c0_39, %c0_40] : memref<32x128xf32, #tpu.memory_space<vmem>>, vector<32x128xf32>
      %c0_41 = arith.constant 0 : index
      %c0_42 = arith.constant 0 : index
      %83 = vector.load %arg15[%c0_41, %c0_42] : memref<128x128xbf16, #tpu.memory_space<vmem>>, vector<128x128xbf16>
      %84 = arith.truncf %82 : vector<32x128xf32> to vector<32x128xbf16>
      %cst_43 = arith.constant dense<0.000000e+00> : vector<32x128xf32>
      %85 = tpu.matmul %84, %83, %cst_43 {dimension_numbers = #tpu.dot_dimension_numbers<[1], [0], [0], [1], [0, 0, 1, 1], [], []>} : vector<32x128xbf16>, vector<128x128xbf16>, vector<32x128xf32> -> vector<32x128xf32>
      %c0_44 = arith.constant 0 : index
      %c0_45 = arith.constant 0 : index
      %86 = vector.load %arg23[%c0_44, %c0_45] : memref<32x128xf32, #tpu.memory_space<vmem>>, vector<32x128xf32>
      %c0_46 = arith.constant 0 : index
      %c0_47 = arith.constant 0 : index
      %87 = vector.load %arg16[%c0_46, %c0_47] : memref<128x128xbf16, #tpu.memory_space<vmem>>, vector<128x128xbf16>
      %88 = arith.truncf %86 : vector<32x128xf32> to vector<32x128xbf16>
      %cst_48 = arith.constant dense<0.000000e+00> : vector<32x128xf32>
      %89 = tpu.matmul %88, %87, %cst_48 {dimension_numbers = #tpu.dot_dimension_numbers<[1], [0], [0], [1], [0, 0, 1, 1], [], []>} : vector<32x128xbf16>, vector<128x128xbf16>, vector<32x128xf32> -> vector<32x128xf32>
      %90 = arith.addf %85, %89 : vector<32x128xf32>
      %c0_49 = arith.constant 0 : index
      %c0_50 = arith.constant 0 : index
      %91 = vector.load %arg17[%c0_49, %c0_50] : memref<1x128xf32, #tpu.memory_space<vmem>>, vector<1x128xf32>
      %92 = vector.broadcast %91 : vector<1x128xf32> to vector<32x128xf32>
      %93 = arith.addf %90, %92 : vector<32x128xf32>
      %94 = arith.negf %93 : vector<32x128xf32>
      %95 = math.exp %94 : vector<32x128xf32>
      %cst_51 = arith.constant 1.000000e+00 : f32
      %96 = vector.broadcast %cst_51 : f32 to vector<32x128xf32>
      %97 = arith.addf %96, %95 : vector<32x128xf32>
      %98 = arith.divf %96, %97 : vector<32x128xf32>
      %99 = arith.mulf %93, %98 : vector<32x128xf32>
      %c0_52 = arith.constant 0 : index
      %c0_53 = arith.constant 0 : index
      %100 = vector.load %arg18[%c0_52, %c0_53] : memref<128x128xbf16, #tpu.memory_space<vmem>>, vector<128x128xbf16>
      %101 = arith.truncf %99 : vector<32x128xf32> to vector<32x128xbf16>
      %cst_54 = arith.constant dense<0.000000e+00> : vector<32x128xf32>
      %102 = tpu.matmul %101, %100, %cst_54 {dimension_numbers = #tpu.dot_dimension_numbers<[1], [0], [0], [1], [0, 0, 1, 1], [], []>} : vector<32x128xbf16>, vector<128x128xbf16>, vector<32x128xf32> -> vector<32x128xf32>
      %c0_55 = arith.constant 0 : index
      %c0_56 = arith.constant 0 : index
      %103 = vector.load %arg19[%c0_55, %c0_56] : memref<1x128xf32, #tpu.memory_space<vmem>>, vector<1x128xf32>
      %104 = vector.broadcast %103 : vector<1x128xf32> to vector<32x128xf32>
      %105 = arith.addf %102, %104 : vector<32x128xf32>
      %c0_57 = arith.constant 0 : index
      %c0_58 = arith.constant 0 : index
      %106 = vector.load %arg20[%c0_57, %c0_58] : memref<1x128xf32, #tpu.memory_space<vmem>>, vector<1x128xf32>
      %c0_59 = arith.constant 0 : index
      %c0_60 = arith.constant 0 : index
      %107 = vector.load %arg21[%c0_59, %c0_60] : memref<1x128xf32, #tpu.memory_space<vmem>>, vector<1x128xf32>
      %cst_61 = arith.constant dense<0.000000e+00> : vector<32xf32>
      %108 = vector.multi_reduction <add>, %105, %cst_61 [1] : vector<32x128xf32> to vector<32xf32>
      %109 = vector.shape_cast %108 : vector<32xf32> to vector<32x1xf32>
      %cst_62 = arith.constant 3.125000e-02 : f32
      %110 = vector.broadcast %cst_62 : f32 to vector<32x1xf32>
      %111 = arith.mulf %109, %110 : vector<32x1xf32>
      %112 = arith.mulf %105, %105 : vector<32x128xf32>
      %cst_63 = arith.constant dense<0.000000e+00> : vector<32xf32>
      %113 = vector.multi_reduction <add>, %112, %cst_63 [1] : vector<32x128xf32> to vector<32xf32>
      %114 = vector.shape_cast %113 : vector<32xf32> to vector<32x1xf32>
      %cst_64 = arith.constant 3.125000e-02 : f32
      %115 = vector.broadcast %cst_64 : f32 to vector<32x1xf32>
      %116 = arith.mulf %114, %115 : vector<32x1xf32>
      %117 = arith.mulf %111, %111 : vector<32x1xf32>
      %118 = arith.subf %116, %117 : vector<32x1xf32>
      %cst_65 = arith.constant 9.99999974E-6 : f32
      %119 = vector.broadcast %cst_65 : f32 to vector<32x1xf32>
      %120 = arith.addf %118, %119 : vector<32x1xf32>
      %121 = math.rsqrt %120 : vector<32x1xf32>
      %122 = vector.broadcast %111 : vector<32x1xf32> to vector<32x128xf32>
      %123 = arith.subf %105, %122 : vector<32x128xf32>
      %124 = vector.broadcast %121 : vector<32x1xf32> to vector<32x128xf32>
      %125 = arith.mulf %123, %124 : vector<32x128xf32>
      %126 = vector.broadcast %106 : vector<1x128xf32> to vector<32x128xf32>
      %127 = arith.mulf %125, %126 : vector<32x128xf32>
      %128 = vector.broadcast %107 : vector<1x128xf32> to vector<32x128xf32>
      %129 = arith.addf %127, %128 : vector<32x128xf32>
      %130 = arith.addf %82, %129 : vector<32x128xf32>
      %c0_66 = arith.constant 0 : index
      %c0_67 = arith.constant 0 : index
      %131 = vector.load %arg22[%c0_66, %c0_67] : memref<32x128xf32, #tpu.memory_space<vmem>>, vector<32x128xf32>
      tpu.vector_store %arg22[%c0_66, %c0_67], %130 {strides = array<i32>} : memref<32x128xf32, #tpu.memory_space<vmem>>, vector<32x128xf32>,
    } else {
    }
    return
  }
  func.func @transform_0(%arg0: i32) -> (i32, i32) {
    %c0_i32 = arith.constant 0 : i32
    %c0_i32_0 = arith.constant 0 : i32
    return %arg0, %c0_i32 : i32, i32
  }
  func.func @transform_1(%arg0: i32) -> (i32, i32) {
    %c0_i32 = arith.constant 0 : i32
    %c0_i32_0 = arith.constant 0 : i32
    return %arg0, %c0_i32 : i32, i32
  }
  func.func @transform_2(%arg0: i32) -> (i32, i32) {
    %c0_i32 = arith.constant 0 : i32
    %c0_i32_0 = arith.constant 0 : i32
    return %c0_i32, %arg0 : i32, i32
  }
  func.func @transform_3(%arg0: i32) -> (i32, i32) {
    %c0_i32 = arith.constant 0 : i32
    %c0_i32_0 = arith.constant 0 : i32
    return %arg0, %c0_i32 : i32, i32
  }
  func.func @transform_4(%arg0: i32) -> (i32, i32) {
    %c0_i32 = arith.constant 0 : i32
    %c0_i32_0 = arith.constant 0 : i32
    %c0_i32_1 = arith.constant 0 : i32
    return %c0_i32, %c0_i32_0 : i32, i32
  }
  func.func @transform_5(%arg0: i32) -> (i32, i32) {
    %c0_i32 = arith.constant 0 : i32
    %c0_i32_0 = arith.constant 0 : i32
    %c0_i32_1 = arith.constant 0 : i32
    return %c0_i32, %c0_i32_0 : i32, i32
  }
  func.func @transform_6(%arg0: i32) -> (i32, i32) {
    %c0_i32 = arith.constant 0 : i32
    %c0_i32_0 = arith.constant 0 : i32
    %c0_i32_1 = arith.constant 0 : i32
    return %c0_i32, %c0_i32_0 : i32, i32
  }
  func.func @transform_7(%arg0: i32) -> (i32, i32) {
    %c0_i32 = arith.constant 0 : i32
    %c0_i32_0 = arith.constant 0 : i32
    %c0_i32_1 = arith.constant 0 : i32
    return %c0_i32, %c0_i32_0 : i32, i32
  }
  func.func @transform_8(%arg0: i32) -> (i32, i32) {
    %c0_i32 = arith.constant 0 : i32
    %c0_i32_0 = arith.constant 0 : i32
    %c0_i32_1 = arith.constant 0 : i32
    return %c0_i32, %c0_i32_0 : i32, i32
  }
  func.func @transform_9(%arg0: i32) -> (i32, i32) {
    %c0_i32 = arith.constant 0 : i32
    %c0_i32_0 = arith.constant 0 : i32
    %c0_i32_1 = arith.constant 0 : i32
    return %c0_i32, %c0_i32_0 : i32, i32
  }
  func.func @transform_10(%arg0: i32) -> (i32, i32) {
    %c0_i32 = arith.constant 0 : i32
    %c0_i32_0 = arith.constant 0 : i32
    %c0_i32_1 = arith.constant 0 : i32
    return %c0_i32, %c0_i32_0 : i32, i32
  }
  func.func @transform_11(%arg0: i32) -> (i32, i32) {
    %c0_i32 = arith.constant 0 : i32
    %c0_i32_0 = arith.constant 0 : i32
    %c0_i32_1 = arith.constant 0 : i32
    return %c0_i32, %c0_i32_0 : i32, i32
  }
  func.func @transform_12(%arg0: i32) -> (i32, i32) {
    %c0_i32 = arith.constant 0 : i32
    %c0_i32_0 = arith.constant 0 : i32
    %c0_i32_1 = arith.constant 0 : i32
    return %c0_i32, %c0_i32_0 : i32, i32
  }
  func.func @transform_13(%arg0: i32) -> (i32, i32) {
    %c0_i32 = arith.constant 0 : i32
    %c0_i32_0 = arith.constant 0 : i32
    %c0_i32_1 = arith.constant 0 : i32
    return %c0_i32, %c0_i32_0 : i32, i32
  }
  func.func @transform_14(%arg0: i32) -> (i32, i32) {
    %c0_i32 = arith.constant 0 : i32
    %c0_i32_0 = arith.constant 0 : i32
    %c0_i32_1 = arith.constant 0 : i32
    return %c0_i32, %c0_i32_0 : i32, i32
  }
  func.func @transform_15(%arg0: i32) -> (i32, i32) {
    %c0_i32 = arith.constant 0 : i32
    %c0_i32_0 = arith.constant 0 : i32
    %c0_i32_1 = arith.constant 0 : i32
    return %c0_i32, %c0_i32_0 : i32, i32
  }
  func.func @transform_16(%arg0: i32) -> (i32, i32) {
    %c0_i32 = arith.constant 0 : i32
    %c0_i32_0 = arith.constant 0 : i32
    %c0_i32_1 = arith.constant 0 : i32
    return %c0_i32, %c0_i32_0 : i32, i32
  }
  func.func @transform_17(%arg0: i32) -> (i32, i32) {
    %c0_i32 = arith.constant 0 : i32
    %c0_i32_0 = arith.constant 0 : i32
    %c0_i32_1 = arith.constant 0 : i32
    return %c0_i32, %c0_i32_0 : i32, i32
  }
  func.func @transform_18(%arg0: i32) -> (i32, i32) {
    %c0_i32 = arith.constant 0 : i32
    %c0_i32_0 = arith.constant 0 : i32
    %c0_i32_1 = arith.constant 0 : i32
    return %c0_i32, %c0_i32_0 : i32, i32
  }
  func.func @transform_19(%arg0: i32) -> (i32, i32) {
    %c0_i32 = arith.constant 0 : i32
    %c0_i32_0 = arith.constant 0 : i32
    %c0_i32_1 = arith.constant 0 : i32
    return %c0_i32, %c0_i32_0 : i32, i32
  }
  func.func @transform_20(%arg0: i32) -> (i32, i32) {
    %c0_i32 = arith.constant 0 : i32
    %c0_i32_0 = arith.constant 0 : i32
    %c0_i32_1 = arith.constant 0 : i32
    return %c0_i32, %c0_i32_0 : i32, i32
  }
  func.func @transform_21(%arg0: i32) -> (i32, i32) {
    %c0_i32 = arith.constant 0 : i32
    %c0_i32_0 = arith.constant 0 : i32
    %c0_i32_1 = arith.constant 0 : i32
    return %c0_i32, %c0_i32_0 : i32, i32
  }
}

module attributes {stable_mosaic.version = 11 : i64} {
  func.func @grid_mlp_kernel(%arg0: i32, %arg1: memref<64x128xf32, #tpu.memory_space<vmem>>, %arg2: memref<128x128xbf16, #tpu.memory_space<vmem>>, %arg3: memref<1x128xf32, #tpu.memory_space<vmem>>, %arg4: memref<128x128xbf16, #tpu.memory_space<vmem>>, %arg5: memref<1x128xf32, #tpu.memory_space<vmem>>, %arg6: memref<1x128xf32, #tpu.memory_space<vmem>>, %arg7: memref<1x128xf32, #tpu.memory_space<vmem>>, %arg8: memref<64x128xf32, #tpu.memory_space<vmem>>) attributes {dimension_semantics = [#tpu.dimension_semantics<parallel>], iteration_bounds = array<i64: 1>, scalar_prefetch = 0 : i64, scratch_operands = 0 : i64, tpu.core_type = #tpu.core_type<tc>, window_params = [{transform_indices = @transform_0, window_bounds = array<i64: 64, 128>}, {pipeline_mode = #tpu.pipeline_mode<synchronous>, transform_indices = @transform_1, window_bounds = array<i64: 128, 128>}, {pipeline_mode = #tpu.pipeline_mode<synchronous>, transform_indices = @transform_2, window_bounds = array<i64: 1, 128>}, {pipeline_mode = #tpu.pipeline_mode<synchronous>, transform_indices = @transform_3, window_bounds = array<i64: 128, 128>}, {pipeline_mode = #tpu.pipeline_mode<synchronous>, transform_indices = @transform_4, window_bounds = array<i64: 1, 128>}, {pipeline_mode = #tpu.pipeline_mode<synchronous>, transform_indices = @transform_5, window_bounds = array<i64: 1, 128>}, {pipeline_mode = #tpu.pipeline_mode<synchronous>, transform_indices = @transform_6, window_bounds = array<i64: 1, 128>}, {transform_indices = @transform_7, window_bounds = array<i64: 64, 128>}]} {
    %c0 = arith.constant 0 : index
    %c0_0 = arith.constant 0 : index
    %0 = vector.load %arg1[%c0, %c0_0] : memref<64x128xf32, #tpu.memory_space<vmem>>, vector<64x128xf32>
    %c0_1 = arith.constant 0 : index
    %c0_2 = arith.constant 0 : index
    %1 = vector.load %arg2[%c0_1, %c0_2] : memref<128x128xbf16, #tpu.memory_space<vmem>>, vector<128x128xbf16>
    %2 = arith.truncf %0 : vector<64x128xf32> to vector<64x128xbf16>
    %cst = arith.constant dense<0.000000e+00> : vector<64x128xf32>
    %3 = tpu.matmul %2, %1, %cst {dimension_numbers = #tpu.dot_dimension_numbers<[1], [0], [0], [1], [0, 0, 1, 1], [], []>} : vector<64x128xbf16>, vector<128x128xbf16>, vector<64x128xf32> -> vector<64x128xf32>
    %c0_3 = arith.constant 0 : index
    %c0_4 = arith.constant 0 : index
    %4 = vector.load %arg3[%c0_3, %c0_4] : memref<1x128xf32, #tpu.memory_space<vmem>>, vector<1x128xf32>
    %5 = vector.broadcast %4 : vector<1x128xf32> to vector<64x128xf32>
    %6 = arith.addf %3, %5 : vector<64x128xf32>
    %7 = arith.negf %6 : vector<64x128xf32>
    %8 = math.exp %7 : vector<64x128xf32>
    %cst_5 = arith.constant 1.000000e+00 : f32
    %9 = vector.broadcast %cst_5 : f32 to vector<64x128xf32>
    %10 = arith.addf %9, %8 : vector<64x128xf32>
    %11 = arith.divf %9, %10 : vector<64x128xf32>
    %12 = arith.mulf %6, %11 : vector<64x128xf32>
    %c0_6 = arith.constant 0 : index
    %c0_7 = arith.constant 0 : index
    %13 = vector.load %arg4[%c0_6, %c0_7] : memref<128x128xbf16, #tpu.memory_space<vmem>>, vector<128x128xbf16>
    %14 = arith.truncf %12 : vector<64x128xf32> to vector<64x128xbf16>
    %cst_8 = arith.constant dense<0.000000e+00> : vector<64x128xf32>
    %15 = tpu.matmul %14, %13, %cst_8 {dimension_numbers = #tpu.dot_dimension_numbers<[1], [0], [0], [1], [0, 0, 1, 1], [], []>} : vector<64x128xbf16>, vector<128x128xbf16>, vector<64x128xf32> -> vector<64x128xf32>
    %c0_9 = arith.constant 0 : index
    %c0_10 = arith.constant 0 : index
    %16 = vector.load %arg5[%c0_9, %c0_10] : memref<1x128xf32, #tpu.memory_space<vmem>>, vector<1x128xf32>
    %17 = vector.broadcast %16 : vector<1x128xf32> to vector<64x128xf32>
    %18 = arith.addf %15, %17 : vector<64x128xf32>
    %c0_11 = arith.constant 0 : index
    %c0_12 = arith.constant 0 : index
    %19 = vector.load %arg6[%c0_11, %c0_12] : memref<1x128xf32, #tpu.memory_space<vmem>>, vector<1x128xf32>
    %c0_13 = arith.constant 0 : index
    %c0_14 = arith.constant 0 : index
    %20 = vector.load %arg7[%c0_13, %c0_14] : memref<1x128xf32, #tpu.memory_space<vmem>>, vector<1x128xf32>
    %cst_15 = arith.constant dense<0.000000e+00> : vector<64xf32>
    %21 = vector.multi_reduction <add>, %18, %cst_15 [1] : vector<64x128xf32> to vector<64xf32>
    %22 = vector.shape_cast %21 : vector<64xf32> to vector<64x1xf32>
    %cst_16 = arith.constant 3.125000e-02 : f32
    %23 = vector.broadcast %cst_16 : f32 to vector<64x1xf32>
    %24 = arith.mulf %22, %23 : vector<64x1xf32>
    %25 = arith.mulf %18, %18 : vector<64x128xf32>
    %cst_17 = arith.constant dense<0.000000e+00> : vector<64xf32>
    %26 = vector.multi_reduction <add>, %25, %cst_17 [1] : vector<64x128xf32> to vector<64xf32>
    %27 = vector.shape_cast %26 : vector<64xf32> to vector<64x1xf32>
    %cst_18 = arith.constant 3.125000e-02 : f32
    %28 = vector.broadcast %cst_18 : f32 to vector<64x1xf32>
    %29 = arith.mulf %27, %28 : vector<64x1xf32>
    %30 = arith.mulf %24, %24 : vector<64x1xf32>
    %31 = arith.subf %29, %30 : vector<64x1xf32>
    %cst_19 = arith.constant 9.99999974E-6 : f32
    %32 = vector.broadcast %cst_19 : f32 to vector<64x1xf32>
    %33 = arith.addf %31, %32 : vector<64x1xf32>
    %34 = math.rsqrt %33 : vector<64x1xf32>
    %35 = vector.broadcast %24 : vector<64x1xf32> to vector<64x128xf32>
    %36 = arith.subf %18, %35 : vector<64x128xf32>
    %37 = vector.broadcast %34 : vector<64x1xf32> to vector<64x128xf32>
    %38 = arith.mulf %36, %37 : vector<64x128xf32>
    %39 = vector.broadcast %19 : vector<1x128xf32> to vector<64x128xf32>
    %40 = arith.mulf %38, %39 : vector<64x128xf32>
    %41 = vector.broadcast %20 : vector<1x128xf32> to vector<64x128xf32>
    %42 = arith.addf %40, %41 : vector<64x128xf32>
    %43 = arith.addf %0, %42 : vector<64x128xf32>
    %c0_20 = arith.constant 0 : index
    %c0_21 = arith.constant 0 : index
    %44 = vector.load %arg8[%c0_20, %c0_21] : memref<64x128xf32, #tpu.memory_space<vmem>>, vector<64x128xf32>
    tpu.vector_store %arg8[%c0_20, %c0_21], %43 {strides = array<i32>} : memref<64x128xf32, #tpu.memory_space<vmem>>, vector<64x128xf32>,
    return
  }
  func.func @transform_0(%arg0: i32) -> (i32, i32) {
    %c0_i32 = arith.constant 0 : i32
    %c0_i32_0 = arith.constant 0 : i32
    return %arg0, %c0_i32 : i32, i32
  }
  func.func @transform_1(%arg0: i32) -> (i32, i32) {
    %c0_i32 = arith.constant 0 : i32
    %c0_i32_0 = arith.constant 0 : i32
    %c0_i32_1 = arith.constant 0 : i32
    return %c0_i32, %c0_i32_0 : i32, i32
  }
  func.func @transform_2(%arg0: i32) -> (i32, i32) {
    %c0_i32 = arith.constant 0 : i32
    %c0_i32_0 = arith.constant 0 : i32
    %c0_i32_1 = arith.constant 0 : i32
    return %c0_i32, %c0_i32_0 : i32, i32
  }
  func.func @transform_3(%arg0: i32) -> (i32, i32) {
    %c0_i32 = arith.constant 0 : i32
    %c0_i32_0 = arith.constant 0 : i32
    %c0_i32_1 = arith.constant 0 : i32
    return %c0_i32, %c0_i32_0 : i32, i32
  }
  func.func @transform_4(%arg0: i32) -> (i32, i32) {
    %c0_i32 = arith.constant 0 : i32
    %c0_i32_0 = arith.constant 0 : i32
    %c0_i32_1 = arith.constant 0 : i32
    return %c0_i32, %c0_i32_0 : i32, i32
  }
  func.func @transform_5(%arg0: i32) -> (i32, i32) {
    %c0_i32 = arith.constant 0 : i32
    %c0_i32_0 = arith.constant 0 : i32
    %c0_i32_1 = arith.constant 0 : i32
    return %c0_i32, %c0_i32_0 : i32, i32
  }
  func.func @transform_6(%arg0: i32) -> (i32, i32) {
    %c0_i32 = arith.constant 0 : i32
    %c0_i32_0 = arith.constant 0 : i32
    %c0_i32_1 = arith.constant 0 : i32
    return %c0_i32, %c0_i32_0 : i32, i32
  }
  func.func @transform_7(%arg0: i32) -> (i32, i32) {
    %c0_i32 = arith.constant 0 : i32
    %c0_i32_0 = arith.constant 0 : i32
    return %arg0, %c0_i32 : i32, i32
  }
}

</mosaic_0001>

<bundles_post_ra>
// kernel: graphcast_encoder.3
= control target key start
LH: loop header
LB: loop body
LE: loop exit
PB: predicated region body
PF: predicated region fallthrough
CT: control target
= control target key end

     0   :  { %s957_s1 = inlined_call_operand.vmem [shape: bf16[128,128], index: 1, kind: input, shape index: {}]   ;;  %s958_s0 = inlined_call_operand.vmem [shape: f32[64,128], index: 0, kind: input, shape index: {}]   ;;  %s959_s3 = inlined_call_operand.vmem [shape: bf16[128,128], index: 3, kind: input, shape index: {}]   ;;  %s960_s2 = inlined_call_operand.vmem [shape: f32[1,128], index: 2, kind: input, shape index: {}]   ;;  %s961_s4 = inlined_call_operand.vmem [shape: f32[1,128], index: 4, kind: input, shape index: {}]   ;;  %s962_s5 = inlined_call_operand.vmem [shape: f32[1,128], index: 5, kind: input, shape index: {}]   ;;  %s963_s6 = inlined_call_operand.vmem [shape: f32[1,128], index: 6, kind: input, shape index: {}]   ;;  %s964_s7 = inlined_call_operand.vmem [shape: f32[64,128], index: 7, kind: output, shape index: {}]  }
   0x1   :  { %v625_v0 = vld [vmem:[%s957_s1 + $0x38] sm:$0xff]   ;;  %v626_v1 = vld [vmem:[%s957_s1 + $0x30] sm:$0xff]   ;;  %v627_v2 = vld [vmem:[%s957_s1 + $0x28] sm:$0xff]  }
   0x2   :  { %577 = vmatprep.subr.bf16.mxu0 %v625_v0  ;;  %v628_v3 = vld [vmem:[%s957_s1 + $0x20] sm:$0xff]   ;;  %v749_v5 = vld [vmem:[%s958_s0 + $0x8] sm:$0xff]  ;;  %v629_v7 = vld [vmem:[%s957_s1 + $0x18] sm:$0xff]  }
   0x3   :  { %578 = vmatpush3.bf16.msra.mxu0 %v625_v0  ;;  %v744_v4 = vld [vmem:[%s958_s0] sm:$0xff]  ;;  %v630_v8 = vld [vmem:[%s957_s1 + $0x10] sm:$0xff]   ;;  %v631_v9 = vld [vmem:[%s957_s1 + $0x8] sm:$0xff]  }
   0x4   :  { %579 = vmatprep.subr.bf16.mxu0 %v626_v1  ;;  %v51_v6 = vpack.c.bf16 %v749_v5, %v744_v4  ;;  %v632_v10 = vld [vmem:[%s957_s1] sm:$0xff]   ;;  %v768_v11 = vld [vmem:[%s958_s0 + $0x10] sm:$0xff]  ;;  %v773_v12 = vld [vmem:[%s958_s0 + $0x18] sm:$0xff] }
   0x5   :  { %v778_v13 = vld [vmem:[%s958_s0 + $0x20] sm:$0xff]  ;;  %v783_v14 = vld [vmem:[%s958_s0 + $0x28] sm:$0xff]  ;;  %v52_v15 = vpack.c.bf16 %v773_v12, %v768_v11  ;;  %v792_v17 = vld [vmem:[%s958_s0 + $0x30] sm:$0xff] }
   0x6   :  { %593 = vmatprep.mubr.bf16.mxu0 %v51_v6  ;;  %v53_v16 = vpack.c.bf16 %v783_v14, %v778_v13  ;;  %v797_v18 = vld [vmem:[%s958_s0 + $0x38] sm:$0xff]  ;;  %v634_v21 = vld [vmem:[%s959_s3 + $0x30] sm:$0xff]   ;;  %v635_v22 = vld [vmem:[%s959_s3 + $0x28] sm:$0xff]  }
   0x7   :  { %580 = vmatpush3.bf16.msra.mxu0 %v626_v1  ;;  %v54_v19 = vpack.c.bf16 %v797_v18, %v792_v17  ;;  %v633_v20 = vld [vmem:[%s959_s3 + $0x38] sm:$0xff]   ;;  %v636_v23 = vld [vmem:[%s959_s3 + $0x20] sm:$0xff]   ;;  %v638_v25 = vld [vmem:[%s959_s3 + $0x10] sm:$0xff]  }
   0x8   :  { %581 = vmatprep.subr.bf16.mxu0 %v627_v2  ;;  %601 = vmatprep.subr.bf16.mxu1 %v633_v20  ;;  %v637_v24 = vld [vmem:[%s959_s3 + $0x18] sm:$0xff]   ;;  %v639_v26 = vld [vmem:[%s959_s3 + $0x8] sm:$0xff]   ;;  %v640_v27 = vld [vmem:[%s959_s3] sm:$0xff]  }
   0x9   :  { %602 = vmatpush3.bf16.msra.mxu1 %v633_v20  ;;  %v525_v28 = vld [vmem:[%s960_s2] ss:$0 sm:$0xff] }
   0xa   :  { %603 = vmatprep.subr.bf16.mxu1 %v634_v21 }
   0xb   :  { %582 = vmatpush3.bf16.msra.mxu0 %v627_v2 }
   0xc   :  { %583 = vmatprep.subr.bf16.mxu0 %v628_v3 }
   0xd   :  { %604 = vmatpush3.bf16.msra.mxu1 %v634_v21 }
   0xe   :  { %605 = vmatprep.subr.bf16.mxu1 %v635_v22 }
   0xf   :  { %584 = vmatpush3.bf16.msra.mxu0 %v628_v3 }
  0x10   :  { %585 = vmatprep.subr.bf16.mxu0 %v629_v7 }
  0x11   :  { %606 = vmatpush3.bf16.msra.mxu1 %v635_v22 }
  0x12   :  { %607 = vmatprep.subr.bf16.mxu1 %v636_v23 }
  0x13   :  { %586 = vmatpush3.bf16.msra.mxu0 %v629_v7 }
  0x14   :  { %587 = vmatprep.subr.bf16.mxu0 %v630_v8 }
  0x15   :  { %608 = vmatpush3.bf16.msra.mxu1 %v636_v23 }
  0x16   :  { %609 = vmatprep.subr.bf16.mxu1 %v637_v24 }
  0x17   :  { %588 = vmatpush3.bf16.msra.mxu0 %v630_v8 }
  0x18   :  { %589 = vmatprep.subr.bf16.mxu0 %v631_v9 }
  0x19   :  { %610 = vmatpush3.bf16.msra.mxu1 %v637_v24 }
  0x1a   :  { %611 = vmatprep.subr.bf16.mxu1 %v638_v25 }
  0x1b   :  { %590 = vmatpush3.bf16.msra.mxu0 %v631_v9 }
  0x1c   :  { %591 = vmatprep.subr.bf16.mxu0 %v632_v10 }
  0x1d   :  { %612 = vmatpush3.bf16.msra.mxu1 %v638_v25 }
  0x1e   :  { %613 = vmatprep.subr.bf16.mxu1 %v639_v26 }
  0x1f   :  { %592 = vmatpush3.bf16.msra.mxu0 %v632_v10 }
  0x21   :  { %614 = vmatpush3.bf16.msra.mxu1 %v639_v26 }
  0x22   :  { %594 = vmatmul.mubr.bf16.vlgmr.msra.gmra.mxu0 %v52_v15  ;;  %615 = vmatprep.subr.bf16.mxu1 %v640_v27 }
  0x23   :  { %597 = vmatprep.mubr.bf16.mxu0 %v53_v16 }
  0x25   :  { %616 = vmatpush3.bf16.msra.mxu1 %v640_v27 }
  0x2a   :  { %598 = vmatmul.mubr.bf16.gmra.mxu0 %v54_v19 }
  0xe2   :  { %v595_v29 = vpop.f32.mrf.mxu0 }
  0xe3   :  { %v153_v30 = vadd.f32 %v595_v29, %v525_v28 }
  0xe4   :  { %v144_v31 = vpop.f32.mrf.mxu0 }
  0xe5   :  { %v536_v32 = vmul.f32 -1.442695, %v153_v30  ;;  %v145_v33 = vadd.f32 %v525_v28, %v144_v31 }
  0xe6   :  { %v596_v34 = vpop.f32.mrf.mxu0 }
  0xe7   :  { %v534_v35 = vmul.f32 -1.442695, %v145_v33  ;;  %v156_v36 = vadd.f32 %v596_v34, %v525_v28  ;;  %641 = vpow2.f32 %v536_v32 }
  0xe8   :  { %v147_v37 = vpop.f32.mrf.mxu0 }
  0xe9   :  { %643 = vpow2.f32 %v534_v35  ;;  %v537_v38 = vmul.f32 -1.442695, %v156_v36  ;;  %v148_v39 = vadd.f32 %v525_v28, %v147_v37 }
  0xea   :  { %v599_v40 = vpop.f32.mrf.mxu0 }
  0xeb   :  { %645 = vpow2.f32 %v537_v38  ;;  %v535_v41 = vmul.f32 -1.442695, %v148_v39  ;;  %v169_v42 = vadd.f32 %v599_v40, %v525_v28 }
  0xec   :  { %v160_v43 = vpop.f32.mrf.mxu0 }
  0xed   :  { %647 = vpow2.f32 %v535_v41  ;;  %v540_v44 = vmul.f32 -1.442695, %v169_v42  ;;  %v161_v45 = vadd.f32 %v525_v28, %v160_v43 }
  0xee   :  { %v600_v46 = vpop.f32.mrf.mxu0 }
  0xef   :  { %v538_v47 = vmul.f32 -1.442695, %v161_v45  ;;  %v172_v48 = vadd.f32 %v600_v46, %v525_v28  ;;  %649 = vpow2.f32 %v540_v44 }
  0xf0   :  { %v163_v49 = vpop.f32.mrf.mxu0 }
  0xf1   :  { %651 = vpow2.f32 %v538_v47  ;;  %v541_v50 = vmul.f32 -1.442695, %v172_v48  ;;  %v164_v51 = vadd.f32 %v525_v28, %v163_v49 }
  0xf3   :  { %653 = vpow2.f32 %v541_v50  ;;  %v539_v52 = vmul.f32 -1.442695, %v164_v51 }
  0xf4   :  { %v642_v53 = vpop.eup %641 }
  0xf5   :  { %655 = vpow2.f32 %v539_v52  ;;  %v201_v57 = vadd.f32 1.0, %v642_v53 }
  0xf6   :  { %v644_v54 = vpop.eup %643 }
  0xf7   :  { %v199_v55 = vadd.f32 1.0, %v644_v54 }
  0xf8   :  { %v646_v56 = vpop.eup %645 }
  0xf9   :  { %v202_v58 = vadd.f32 1.0, %v646_v56  ;;  %657 = vrcp.f32 %v199_v55 }
  0xfa   :  { %v648_v59 = vpop.eup %647 }
  0xfb   :  { %659 = vrcp.f32 %v202_v58  ;;  %v200_v60 = vadd.f32 1.0, %v648_v59 }
  0xfc   :  { %661 = vrcp.f32 %v201_v57  ;;  %v650_v61 = vpop.eup %649 }
  0xfd   :  { %663 = vrcp.f32 %v200_v60  ;;  %v205_v1 = vadd.f32 1.0, %v650_v61 }
  0xfe   :  { %v652_v62 = vpop.eup %651 }
  0xff   :  { %v203_v63 = vadd.f32 1.0, %v652_v62 }
 0x100   :  { %v654_v0 = vpop.eup %653 }
 0x101   :  { %v206_v2 = vadd.f32 1.0, %v654_v0  ;;  %665 = vrcp.f32 %v203_v63 }
 0x102   :  { %v656_v3 = vpop.eup %655 }
 0x103   :  { %667 = vrcp.f32 %v206_v2  ;;  %v204_v6 = vadd.f32 1.0, %v656_v3 }
 0x104   :  { %669 = vrcp.f32 %v205_v1 }
 0x105   :  { %671 = vrcp.f32 %v204_v6 }
 0x106   :  { %v658_v7 = vpop.eup %657 }
 0x107   :  { %v223_v16 = vmul.f32 %v658_v7, %v145_v33 }
 0x108   :  { %v660_v8 = vpop.eup %659 }
 0x109   :  { %v662_v9 = vpop.eup %661  ;;  %v226_v15 = vmul.f32 %v660_v8, %v156_v36 }
 0x10a   :  { %v664_v10 = vpop.eup %663  ;;  %v225_v20 = vmul.f32 %v662_v9, %v153_v30  ;;  %v542_v30 = vld [vmem:[%s961_s4] ss:$0 sm:$0xff] }
 0x10b   :  { %v224_v19 = vmul.f32 %v664_v10, %v148_v39 }
 0x10c   :  { %v248_v22 = vpack.c.bf16 %v226_v15, %v225_v20 }
 0x10d   :  { %v247_v21 = vpack.c.bf16 %v224_v19, %v223_v16 }
 0x10e   :  { %v666_v23 = vpop.eup %665 }
 0x10f   :  { %617 = vmatprep.mubr.bf16.mxu1 %v247_v21  ;;  %v227_v28 = vmul.f32 %v666_v23, %v161_v45 }
 0x110   :  { %v668_v24 = vpop.eup %667  ;;  %618 = vmatmul.mubr.bf16.vlgmr.msra.gmra.mxu1 %v248_v22 }
 0x111   :  { %v670_v25 = vpop.eup %669  ;;  %v230_v27 = vmul.f32 %v668_v24, %v172_v48 }
 0x112   :  { %v672_v26 = vpop.eup %671  ;;  %v229_v31 = vmul.f32 %v670_v25, %v169_v42 }
 0x113   :  { %v228_v29 = vmul.f32 %v672_v26, %v164_v51 }
 0x114   :  { %v250_v34 = vpack.c.bf16 %v230_v27, %v229_v31 }
 0x115   :  { %v249_v32 = vpack.c.bf16 %v228_v29, %v227_v28 }
 0x117   :  { %621 = vmatprep.mubr.bf16.mxu1 %v249_v32 }
 0x118   :  { %622 = vmatmul.mubr.bf16.gmra.mxu1 %v250_v34 }
 0x1d0   :  { %v619_v33 = vpop.f32.mrf.mxu1 }
 0x1d1   :  { %v831_v35 = vadd.f32 %v619_v33, %v542_v30 }
 0x1d2   :  { %v340_v36 = vpop.f32.mrf.mxu1 }
 0x1d3   :  { %v833_v37 = vadd.f32 %v542_v30, %v340_v36  ;;  %377 = vadd.xlane.f32.xlu1 %v831_v35  ;;  %v399_v41 = vmul.f32 %v831_v35, %v831_v35 }
 0x1d4   :  { %v620_v38 = vpop.f32.mrf.mxu1 }
 0x1d5   :  { %v836_v39 = vadd.f32 %v620_v38, %v542_v30  ;;  %373 = vadd.xlane.f32.xlu0 %v833_v37  ;;  %v397_v46 = vmul.f32 %v833_v37, %v833_v37 }
 0x1d6   :  { %v343_v40 = vpop.f32.mrf.mxu1 }
 0x1d7   :  { %379 = vadd.xlane.f32.xlu1 %v836_v39  ;;  %v842_v43 = vadd.f32 %v542_v30, %v343_v40  ;;  %v400_v44 = vmul.f32 %v836_v39, %v836_v39 }
 0x1d8   :  { %v623_v42 = vpop.f32.mrf.mxu1 }
 0x1d9   :  { %409 = vadd.xlane.f32.xlu0 %v399_v41  ;;  %v398_v47 = vmul.f32 %v842_v43, %v842_v43  ;;  %v853_v51 = vadd.f32 %v623_v42, %v542_v30 }
 0x1da   :  { %v356_v45 = vpop.f32.mrf.mxu1 }
 0x1db   :  { %411 = vadd.xlane.f32.xlu1 %v400_v44  ;;  %v859_v53 = vadd.f32 %v542_v30, %v356_v45  ;;  %v403_v57 = vmul.f32 %v853_v51, %v853_v51 }
 0x1dc   :  { %v624_v48 = vpop.f32.mrf.mxu1 }
 0x1dd   :  { %405 = vadd.xlane.f32.xlu0 %v397_v46  ;;  %v850_v49 = vadd.f32 %v624_v48, %v542_v30  ;;  %v401_v55 = vmul.f32 %v859_v53, %v859_v53  ;;  %v886_v46 = vld [vmem:[%s962_s5] ss:$0 sm:$0xff] }
 0x1de   :  { %v359_v50 = vpop.f32.mrf.mxu1 }
 0x1df   :  { %407 = vadd.xlane.f32.xlu1 %v398_v47  ;;  %v856_v52 = vadd.f32 %v542_v30, %v359_v50  ;;  %v404_v56 = vmul.f32 %v850_v49, %v850_v49 }
 0x1e1   :  { %375 = vadd.xlane.f32.xlu0 %v842_v43  ;;  %v402_v54 = vmul.f32 %v856_v52, %v856_v52 }
 0x1e3   :  { %387 = vadd.xlane.f32.xlu1 %v850_v49 }
 0x1e5   :  { %385 = vadd.xlane.f32.xlu0 %v853_v51 }
 0x1e7   :  { %383 = vadd.xlane.f32.xlu1 %v856_v52 }
 0x1e9   :  { %381 = vadd.xlane.f32.xlu0 %v859_v53 }
 0x1eb   :  { %415 = vadd.xlane.f32.xlu1 %v402_v54 }
 0x1ed   :  { %413 = vadd.xlane.f32.xlu0 %v401_v55 }
 0x1ef   :  { %419 = vadd.xlane.f32.xlu1 %v404_v56 }
 0x1f1   :  { %417 = vadd.xlane.f32.xlu0 %v403_v57 }
 0x25c   :  { %v378_v58 = vpop.xlane.xlu1 %377 }
 0x25d   :  { %v391_v60 = vmul.f32 0.03125, %v378_v58 }
 0x25e   :  { %v374_v59 = vpop.xlane.xlu0 %373 }
 0x25f   :  { %v431_v0 = vmul.f32 %v391_v60, %v391_v60  ;;  %v389_v1 = vmul.f32 0.03125, %v374_v59  ;;  %v463_v40 = vsub.f32 %v831_v35, %v391_v60 }
 0x260   :  { %v380_v61 = vpop.xlane.xlu1 %379 }
 0x261   :  { %v392_v62 = vmul.f32 0.03125, %v380_v61  ;;  %v429_v10 = vmul.f32 %v389_v1, %v389_v1  ;;  %v461_v57 = vsub.f32 %v833_v37, %v389_v1 }
 0x262   :  { %v410_v63 = vpop.xlane.xlu0 %409 }
 0x263   :  { %v423_v2 = vmul.f32 0.03125, %v410_v63  ;;  %v432_v6 = vmul.f32 %v392_v62, %v392_v62  ;;  %v464_v45 = vsub.f32 %v836_v39, %v392_v62  ;;  %v896_v39 = vld [vmem:[%s963_s6] ss:$0 sm:$0xff] }
 0x264   :  { %v412_v3 = vpop.xlane.xlu1 %411 }
 0x265   :  { %v439_v7 = vsub.f32 %v423_v2, %v431_v0  ;;  %v424_v8 = vmul.f32 0.03125, %v412_v3 }
 0x266   :  { %v406_v9 = vpop.xlane.xlu0 %405 }
 0x267   :  { %v447_v15 = vadd.f32 1e-05, %v439_v7  ;;  %v440_v16 = vsub.f32 %v424_v8, %v432_v6  ;;  %v421_v19 = vmul.f32 0.03125, %v406_v9 }
 0x268   :  { %v408_v20 = vpop.xlane.xlu1 %407 }
 0x269   :  { %673 = vrsqrt.f32 %v447_v15  ;;  %v448_v21 = vadd.f32 1e-05, %v440_v16  ;;  %v437_v22 = vsub.f32 %v421_v19, %v429_v10  ;;  %v422_v27 = vmul.f32 0.03125, %v408_v20 }
 0x26a   :  { %v376_v23 = vpop.xlane.xlu0 %375 }
 0x26b   :  { %675 = vrsqrt.f32 %v448_v21  ;;  %v445_v24 = vadd.f32 1e-05, %v437_v22  ;;  %v871_v25 = vmul.f32 0.03125, %v376_v23 }
 0x26c   :  { %v388_v26 = vpop.xlane.xlu1 %387 }
 0x26d   :  { %677 = vrsqrt.f32 %v445_v24  ;;  %v430_v28 = vmul.f32 %v871_v25, %v871_v25  ;;  %v888_v47 = vmul.f32 0.03125, %v388_v26  ;;  %v462_v26 = vsub.f32 %v842_v43, %v871_v25 }
 0x26e   :  { %v386_v29 = vpop.xlane.xlu0 %385 }
 0x26f   :  { %v438_v31 = vsub.f32 %v422_v27, %v430_v28  ;;  %v395_v58 = vmul.f32 0.03125, %v386_v29  ;;  %v436_v2 = vmul.f32 %v888_v47, %v888_v47 }
 0x270   :  { %v384_v32 = vpop.xlane.xlu1 %383 }
 0x271   :  { %v446_v34 = vadd.f32 1e-05, %v438_v31  ;;  %v875_v30 = vmul.f32 0.03125, %v384_v32  ;;  %v435_v8 = vmul.f32 %v395_v58, %v395_v58 }
 0x272   :  { %v382_v33 = vpop.xlane.xlu0 %381 }
 0x273   :  { %679 = vrsqrt.f32 %v446_v34  ;;  %v877_v36 = vmul.f32 0.03125, %v382_v33  ;;  %v434_v41 = vmul.f32 %v875_v30, %v875_v30  ;;  %v466_v25 = vsub.f32 %v856_v52, %v875_v30 }
 0x274   :  { %v416_v38 = vpop.xlane.xlu1 %415  ;;  %v467_v52 = vsub.f32 %v853_v51, %v395_v58 }
 0x275   :  { %v426_v42 = vmul.f32 0.03125, %v416_v38  ;;  %v433_v54 = vmul.f32 %v877_v36, %v877_v36  ;;  %v465_v34 = vsub.f32 %v859_v53, %v877_v36 }
 0x276   :  { %v674_v44 = vpop.eup %673  ;;  %v414_v48 = vpop.xlane.xlu0 %413 }
 0x277   :  { %v471_v50 = vmul.f32 %v674_v44, %v463_v40  ;;  %v442_v35 = vsub.f32 %v426_v42, %v434_v41  ;;  %v425_v55 = vmul.f32 0.03125, %v414_v48  ;;  %v468_v40 = vsub.f32 %v850_v49, %v888_v47 }
 0x278   :  { %v676_v56 = vpop.eup %675  ;;  %v420_v59 = vpop.xlane.xlu1 %419 }
 0x279   :  { %v485_v60 = vmul.f32 %v886_v46, %v471_v50  ;;  %v472_v61 = vmul.f32 %v676_v56, %v464_v45  ;;  %v450_v62 = vadd.f32 1e-05, %v442_v35  ;;  %v441_v63 = vsub.f32 %v425_v55, %v433_v54 }
 0x27a   :  { %v678_v0 = vpop.eup %677  ;;  %v428_v3 = vmul.f32 0.03125, %v420_v59  ;;  %v418_v6 = vpop.xlane.xlu0 %417 }
 0x27b   :  { %v499_v37 = vadd.f32 %v896_v39, %v485_v60  ;;  %v486_v1 = vmul.f32 %v886_v46, %v472_v61  ;;  %v469_v7 = vmul.f32 %v678_v0, %v461_v57  ;;  %681 = vrsqrt.f32 %v450_v62 }
 0x27c   :  { %v449_v9 = vadd.f32 1e-05, %v441_v63  ;;  %v444_v10 = vsub.f32 %v428_v3, %v436_v2  ;;  %v427_v15 = vmul.f32 0.03125, %v418_v6 }
 0x27d   :  { %v507_v16 = vadd.f32 %v499_v37, %v768_v11  ;;  %v500_v19 = vadd.f32 %v896_v39, %v486_v1  ;;  %v483_v20 = vmul.f32 %v886_v46, %v469_v7 }
 0x27e   :  { %683 = vrsqrt.f32 %v449_v9  ;;  %v452_v21 = vadd.f32 1e-05, %v444_v10  ;;  %v443_v22 = vsub.f32 %v427_v15, %v435_v8 }
 0x27f   :  { %515 = vst [vmem:[%s964_s7 + $0x10] sm:$0xff] %v507_v16  ;;  %v508_v23 = vadd.f32 %v500_v19, %v773_v12  ;;  %v497_v24 = vadd.f32 %v896_v39, %v483_v20 }
 0x280   :  { %v680_v27 = vpop.eup %679  ;;  %685 = vrsqrt.f32 %v452_v21  ;;  %v451_v11 = vadd.f32 1e-05, %v443_v22 }
 0x281   :  { %516 = vst [vmem:[%s964_s7 + $0x18] sm:$0xff] %v508_v23  ;;  %v505_v28 = vadd.f32 %v497_v24, %v744_v4  ;;  %v470_v29 = vmul.f32 %v680_v27, %v462_v26 }
 0x282   :  { %687 = vrsqrt.f32 %v451_v11 }
 0x283   :  { %513 = vst [vmem:[%s964_s7] sm:$0xff] %v505_v28  ;;  %v484_v12 = vmul.f32 %v886_v46, %v470_v29 }
 0x285   :  { %v498_v31 = vadd.f32 %v896_v39, %v484_v12 }
 0x287   :  { %v506_v43 = vadd.f32 %v498_v31, %v749_v5 }
 0x288   :  { %v682_v32 = vpop.eup %681 }
 0x289   :  { %514 = vst [vmem:[%s964_s7 + $0x8] sm:$0xff] %v506_v43  ;;  %v474_v4 = vmul.f32 %v682_v32, %v466_v25 }
 0x28b   :  { %v684_v33 = vpop.eup %683  ;;  %v488_v38 = vmul.f32 %v886_v46, %v474_v4 }
 0x28c   :  { %v473_v41 = vmul.f32 %v684_v33, %v465_v34 }
 0x28d   :  { %v686_v5 = vpop.eup %685  ;;  %v502_v42 = vadd.f32 %v896_v39, %v488_v38 }
 0x28e   :  { %v487_v30 = vmul.f32 %v886_v46, %v473_v41  ;;  %v476_v44 = vmul.f32 %v686_v5, %v468_v40 }
 0x28f   :  { %v688_v45 = vpop.eup %687  ;;  %v510_v48 = vadd.f32 %v502_v42, %v783_v14 }
 0x290   :  { %v501_v53 = vadd.f32 %v896_v39, %v487_v30  ;;  %v490_v36 = vmul.f32 %v886_v46, %v476_v44  ;;  %v475_v50 = vmul.f32 %v688_v45, %v467_v52 }
 0x291   :  { %518 = vst [vmem:[%s964_s7 + $0x28] sm:$0xff] %v510_v48 }
 0x292   :  { %v509_v49 = vadd.f32 %v501_v53, %v778_v13  ;;  %v504_v47 = vadd.f32 %v896_v39, %v490_v36  ;;  %v489_v51 = vmul.f32 %v886_v46, %v475_v50 }
 0x294   :  { %517 = vst [vmem:[%s964_s7 + $0x20] sm:$0xff] %v509_v49  ;;  %v512_v14 = vadd.f32 %v504_v47, %v797_v18  ;;  %v503_v54 = vadd.f32 %v896_v39, %v489_v51 }
 0x296   :  { %520 = vst [vmem:[%s964_s7 + $0x38] sm:$0xff] %v512_v14  ;;  %v511_v35 = vadd.f32 %v503_v54, %v792_v17 }
 0x298   :  { %519 = vst [vmem:[%s964_s7 + $0x30] sm:$0xff] %v511_v35 }

// kernel: graphcast_encoder.2
= control target key start
LH: loop header
LB: loop body
LE: loop exit
PB: predicated region body
PF: predicated region fallthrough
CT: control target
= control target key end

     0   :  { %s4774_s0 = inlined_call_operand.vmem [shape: s32[512,1], index: 0, kind: input, shape index: {}]   ;;  %s4775_s1 = inlined_call_operand.vmem [shape: s32[512,1], index: 1, kind: input, shape index: {}]   ;;  %s4776_s2 = inlined_call_operand.vmem [shape: s32[1,512], index: 2, kind: input, shape index: {}]   ;;  %s4777_s3 = inlined_call_operand.vmem [shape: f32[512,128], index: 3, kind: input, shape index: {}]   ;;  %s4778_s4 = inlined_call_operand.vmem [shape: f32[64,128], index: 4, kind: input, shape index: {}]   ;;  %s4779_s5 = inlined_call_operand.vmem [shape: f32[32,128], index: 5, kind: input, shape index: {}]   ;;  %s4780_s6 = inlined_call_operand.vmem [shape: bf16[128,128], index: 6, kind: input, shape index: {}]   ;;  %s4781_s7 = inlined_call_operand.vmem [shape: bf16[128,128], index: 7, kind: input, shape index: {}]   ;;  %s4782_s8 = inlined_call_operand.vmem [shape: bf16[128,128], index: 8, kind: input, shape index: {}]   ;;  %s4783_s9 = inlined_call_operand.vmem [shape: f32[1,128], index: 9, kind: input, shape index: {}]   ;;  %s4784_s10 = inlined_call_operand.vmem [shape: bf16[128,128], index: 10, kind: input, shape index: {}]   ;;  %s4785_s11 = inlined_call_operand.vmem [shape: f32[1,128], index: 11, kind: input, shape index: {}]   ;;  %s4786_s12 = inlined_call_operand.vmem [shape: f32[1,128], index: 12, kind: input, shape index: {}, may-alias: {12,19}]   ;;  %s4787_s13 = inlined_call_operand.vmem [shape: f32[1,128], index: 13, kind: input, shape index: {}, may-alias: {13,20}]   ;;  %s4788_s14 = inlined_call_operand.vmem [shape: bf16[128,128], index: 14, kind: input, shape index: {}]   ;;  %s4789_s15 = inlined_call_operand.vmem [shape: bf16[128,128], index: 15, kind: input, shape index: {}]   ;;  %s4790_s16 = inlined_call_operand.vmem [shape: f32[1,128], index: 16, kind: input, shape index: {}]   ;;  %s4791_s17 = inlined_call_operand.vmem [shape: bf16[128,128], index: 17, kind: input, shape index: {}]   ;;  %s4792_s18 = inlined_call_operand.vmem [shape: f32[1,128], index: 18, kind: input, shape index: {}]   ;;  %s4793_s19 = inlined_call_operand.vmem [shape: f32[1,128], index: 19, kind: input, shape index: {}, may-alias: {12,19}]   ;;  %s4794_s20 = inlined_call_operand.vmem [shape: f32[1,128], index: 20, kind: input, shape index: {}, may-alias: {13,20}]   ;;  %s4795_s21 = inlined_call_operand.hbm [shape: f32[32,128], index: 21, kind: output, shape index: {}]  }
   0x1   :  { %4800 = sst [smem:[#allocation9_spill]] %s4774_s0 }
   0x2   :  { %4801 = sst [smem:[#allocation10_spill]] %s4775_s1 }
   0x3   :  { %4802 = sst [smem:[#allocation11_spill]] %s4776_s2 }
   0x4   :  { %4803 = sst [smem:[#allocation12_spill]] %s4777_s3 }
   0x5   :  { %4804 = sst [smem:[#allocation13_spill]] %s4778_s4 }
   0x6   :  { %4805 = sst [smem:[#allocation14_spill]] %s4779_s5 }
   0x7   :  { %4806 = sst [smem:[#allocation15_spill]] %s4790_s16 }
   0x8   :  { %4807 = sst [smem:[#allocation16_spill]] %s4792_s18 }
   0x9   :  { %4808 = sst [smem:[#allocation17_spill]] %s4793_s19 }
   0xa   :  { %4809 = sst [smem:[#allocation18_spill]] %s4794_s20 }
   0xb   :  { %4810 = sst [smem:[#allocation19_spill]] %s4795_s21 }
   0xc   :  { %26 = vsyncpa [#allocation6], 0  ;;  %s3948_s2 = smov 0  }
   0xd LB: > { %4811 = sst [smem:[#allocation8_spill]] %s3829_s2  ;;  %s3954_s25 = sadd.s32 4294967295, %s3829_s2   ;;  %s3829_s2 = sphi %s3948_s2, %s32_s2  }
   0xe   : > { %p3010_p0 = scmp.ge.s32.totalorder %s3829_s2, 1  ;;  %p614_p1 = scmp.lt.s32.totalorder %s3829_s2, 5 }
  0x10   : > { %p615_p2 = pnand %p3010_p0, %p614_p1 }
  0x11   : > { %s3011_s26 = sshll.u32 (!%p615_p2), %s3954_s25, 4  ;;  %p694_p3 = scmp.lt.s32.totalorder (!%p615_p2), %s3954_s25, 3 }
  0x12   : > { %618 = sbr.rel (%p615_p2) target bundleno = 2003 (0x7d3), region = 104  ;;  %p683_p4 = scmp.lt.s32.totalorder (!%p615_p2), %s3011_s26, 63 }
  0x13   : > { %s4812_s29 = sld [smem:[#allocation11_spill]] (!%p615_p2)  ;;  %p3017_p5 = scmp.ne.s32.totalorder (!%p615_p2), %s3954_s25, 0 }
  0x14   : > { %s4813_s22 = sld [smem:[#allocation9_spill]] (!%p615_p2) }
  0x15   : > { %s4814_s2 = sld [smem:[#allocation10_spill]] (!%p615_p2) }
  0x16   : > { %s4815_s18 = sld [smem:[#allocation12_spill]] (!%p615_p2) }
  0x17   : > { %s3961_s27 = scalar_select %p694_p3, %s3954_s25, 3 }
  0x18   : > { %s4829_s26 = smov (!%p683_p4, %s3011_s26), 63  ;;  %707 = sbr.rel (%p3017_p5) target bundleno = 272 (0x110), region = 108 }
  0x19   : > { %s696_s0 = scalar_lea.vmem %s4812_s29, %s3961_s27  ;;  %s3012_s4 = sshll.u32 %s4829_s26, 3 }
  0x1a   : > { %s3970_s23 = scalar_lea.vmem %s4813_s22, %s3012_s4  ;;  %s4816_s5 = sld [smem:[#allocation13_spill]] (!%p3017_p5) }
  0x1b   : > { %s3975_s21 = scalar_lea.vmem %s4814_s2, %s3012_s4  ;;  %s4817_s2 = sld [smem:[#allocation14_spill]] (!%p3017_p5) }
  0x1c   : > { %s3980_s16 = scalar_lea.vmem %s4815_s18, %s3012_s4 }
  0x1d   : > { %v3597_v0 = vld [vmem:[%s4781_s7 + $0x38] sm:$0xff]   ;;  %v3831_v1 = vmov 0.0   ;;  %v3599_v3 = vld [vmem:[%s4781_s7 + $0x30] sm:$0xff]   ;;  %v3601_v5 = vld [vmem:[%s4781_s7 + $0x28] sm:$0xff]  }
  0x1e   : > { %708 = vst [vmem:[#allocation2 + $0x10] sm:$0xff] %v3831_v1  ;;  %709 = vst [vmem:[#allocation2] sm:$0xff] %v3831_v1  ;;  %v3598_v2 = vld [vmem:[%s4782_s8 + $0x38] sm:$0xff]   ;;  %3344 = vmatprep.subr.bf16.mxu0 %v3597_v0  ;;  %v3600_v4 = vld [vmem:[%s4782_s8 + $0x30] sm:$0xff]  }
  0x1f   : > { %710 = vst [vmem:[#allocation2 + $0x18] sm:$0xff] %v3831_v1  ;;  %711 = vst [vmem:[#allocation2 + $0x8] sm:$0xff] %v3831_v1  ;;  %3345 = vmatpush3.bf16.msra.mxu0 %v3597_v0  ;;  %3368 = vmatprep.subr.bf16.mxu1 %v3598_v2  ;;  %v3602_v6 = vld [vmem:[%s4782_s8 + $0x28] sm:$0xff]   ;;  %v3603_v7 = vld [vmem:[%s4781_s7 + $0x20] sm:$0xff]  }
  0x20   : > { %3369 = vmatpush3.bf16.msra.mxu1 %v3598_v2  ;;  %3346 = vmatprep.subr.bf16.mxu0 %v3599_v3  ;;  %v3604_v8 = vld [vmem:[%s4782_s8 + $0x20] sm:$0xff]   ;;  %v3605_v9 = vld [vmem:[%s4781_s7 + $0x18] sm:$0xff]   ;;  %v3607_v11 = vld [vmem:[%s4781_s7 + $0x10] sm:$0xff]  }
  0x21   : > { %3370 = vmatprep.subr.bf16.mxu1 %v3600_v4  ;;  %v3606_v10 = vld [vmem:[%s4782_s8 + $0x18] sm:$0xff]   ;;  %v712_v12 = vld [vmem:[%s4816_s5] sm:$0xff]  ;;  %v713_v13 = vld [vmem:[%s4816_s5 + $0x8] sm:$0xff] }
  0x22   : > { %v3608_v14 = vld [vmem:[%s4782_s8 + $0x10] sm:$0xff]   ;;  %v736_v15 = vpack.c.bf16 %v713_v13, %v712_v12  ;;  %v893_v16 = vld [vmem:[%s4817_s2] sm:$0xff]  ;;  %v894_v17 = vld [vmem:[%s4817_s2 + $0x8] sm:$0xff] }
  0x23   : > { %3347 = vmatpush3.bf16.msra.mxu0 %v3599_v3  ;;  %v913_v18 = vpack.c.bf16 %v894_v17, %v893_v16  ;;  %v3609_v19 = vld [vmem:[%s4781_s7 + $0x8] sm:$0xff]   ;;  %v3611_v21 = vld [vmem:[%s4781_s7] sm:$0xff]   ;;  %v714_v23 = vld [vmem:[%s4816_s5 + $0x10] sm:$0xff] }
  0x24   : > { %3371 = vmatpush3.bf16.msra.mxu1 %v3600_v4  ;;  %3348 = vmatprep.subr.bf16.mxu0 %v3601_v5  ;;  %v3610_v20 = vld [vmem:[%s4782_s8 + $0x8] sm:$0xff]   ;;  %v3612_v22 = vld [vmem:[%s4782_s8] sm:$0xff]   ;;  %v715_v24 = vld [vmem:[%s4816_s5 + $0x18] sm:$0xff] }
  0x25   : > { %3372 = vmatprep.subr.bf16.mxu1 %v3602_v6  ;;  %3360 = vmatprep.mubr.bf16.mxu0 %v736_v15  ;;  %v895_v25 = vld [vmem:[%s4817_s2 + $0x10] sm:$0xff]  ;;  %v896_v26 = vld [vmem:[%s4817_s2 + $0x18] sm:$0xff]  ;;  %v716_v27 = vld [vmem:[%s4816_s5 + $0x20] sm:$0xff]  ;;  %v737_v29 = vpack.c.bf16 %v715_v24, %v714_v23 }
  0x26   : > { %3384 = vmatprep.mubr.bf16.mxu1 %v913_v18  ;;  %v717_v28 = vld [vmem:[%s4816_s5 + $0x28] sm:$0xff]  ;;  %v914_v30 = vpack.c.bf16 %v896_v26, %v895_v25  ;;  %v718_v32 = vld [vmem:[%s4816_s5 + $0x30] sm:$0xff]  ;;  %v719_v33 = vld [vmem:[%s4816_s5 + $0x38] sm:$0xff] }
  0x27   : > { %3349 = vmatpush3.bf16.msra.mxu0 %v3601_v5  ;;  %v738_v31 = vpack.c.bf16 %v717_v28, %v716_v27  ;;  %v739_v34 = vpack.c.bf16 %v719_v33, %v718_v32 }
  0x28   : > { %3373 = vmatpush3.bf16.msra.mxu1 %v3602_v6  ;;  %3350 = vmatprep.subr.bf16.mxu0 %v3603_v7 }
  0x29   : > { %3374 = vmatprep.subr.bf16.mxu1 %v3604_v8 }
  0x2b   : > { %3351 = vmatpush3.bf16.msra.mxu0 %v3603_v7 }
  0x2c   : > { %3375 = vmatpush3.bf16.msra.mxu1 %v3604_v8  ;;  %3352 = vmatprep.subr.bf16.mxu0 %v3605_v9 }
  0x2d   : > { %3376 = vmatprep.subr.bf16.mxu1 %v3606_v10 }
  0x2f   : > { %3353 = vmatpush3.bf16.msra.mxu0 %v3605_v9 }
  0x30   : > { %3377 = vmatpush3.bf16.msra.mxu1 %v3606_v10  ;;  %3354 = vmatprep.subr.bf16.mxu0 %v3607_v11 }
  0x31   : > { %3378 = vmatprep.subr.bf16.mxu1 %v3608_v14 }
  0x33   : > { %3355 = vmatpush3.bf16.msra.mxu0 %v3607_v11 }
  0x34   : > { %3379 = vmatpush3.bf16.msra.mxu1 %v3608_v14  ;;  %3356 = vmatprep.subr.bf16.mxu0 %v3609_v19 }
  0x35   : > { %3380 = vmatprep.subr.bf16.mxu1 %v3610_v20 }
  0x37   : > { %3357 = vmatpush3.bf16.msra.mxu0 %v3609_v19 }
  0x38   : > { %3381 = vmatpush3.bf16.msra.mxu1 %v3610_v20  ;;  %3358 = vmatprep.subr.bf16.mxu0 %v3611_v21 }
  0x39   : > { %3382 = vmatprep.subr.bf16.mxu1 %v3612_v22 }
  0x3b   : > { %3359 = vmatpush3.bf16.msra.mxu0 %v3611_v21 }
  0x3c   : > { %3383 = vmatpush3.bf16.msra.mxu1 %v3612_v22 }
  0x3e   : > { %3361 = vmatmul.mubr.bf16.vlgmr.msra.gmra.mxu0 %v737_v29 }
  0x3f   : > { %3385 = vmatmul.mubr.bf16.vlgmr.msra.gmra.mxu1 %v914_v30  ;;  %3364 = vmatprep.mubr.bf16.mxu0 %v738_v31 }
  0x46   : > { %3365 = vmatmul.mubr.bf16.gmra.mxu0 %v739_v34 }
  0xfe   : > { %v3362_v35 = vpop.f32.mrf.mxu0 }
  0xff   : > { %v3386_v36 = vpop.f32.mrf.mxu1 }
 0x100   : > { %v822_v37 = vpop.f32.mrf.mxu0 }
 0x101   : > { %v997_v38 = vpop.f32.mrf.mxu1 }
 0x102   : > { %v3363_v39 = vpop.f32.mrf.mxu0 }
 0x103   : > { %v3202_v40 = vpack.c.bf16 %v3363_v39, %v3362_v35  ;;  %v3387_v41 = vpop.f32.mrf.mxu1 }
 0x104   : > { %v825_v42 = vpop.f32.mrf.mxu0  ;;  %v3222_v43 = vpack.c.bf16 %v3387_v41, %v3386_v36 }
 0x105   : > { %3224 = vst [vmem:[#allocation3 + $0x8] sm:$0xff] %v3202_v40   ;;  %v3197_v44 = vpack.c.bf16 %v825_v42, %v822_v37  ;;  %v1000_v45 = vpop.f32.mrf.mxu1 }
 0x106   : > { %3227 = vst [vmem:[#allocation4 + $0x8] sm:$0xff] %v3222_v43   ;;  %v3366_v46 = vpop.f32.mrf.mxu0  ;;  %v3217_v47 = vpack.c.bf16 %v1000_v45, %v997_v38 }
 0x107   : > { %3198 = vst [vmem:[#allocation3] sm:$0xff] %v3197_v44  }
 0x108   : > { %3218 = vst [vmem:[#allocation4] sm:$0xff] %v3217_v47   ;;  %v838_v48 = vpop.f32.mrf.mxu0 }
 0x10a   : > { %v3367_v49 = vpop.f32.mrf.mxu0 }
 0x10b   : > { %v3212_v50 = vpack.c.bf16 %v3367_v49, %v3366_v46 }
 0x10c   : > { %v841_v51 = vpop.f32.mrf.mxu0 }
 0x10d   : > { %3226 = vst [vmem:[#allocation3 + $0x18] sm:$0xff] %v3212_v50   ;;  %v3207_v52 = vpack.c.bf16 %v841_v51, %v838_v48 }
 0x10f   : > { %3225 = vst [vmem:[#allocation3 + $0x10] sm:$0xff] %v3207_v52  }
 0x110 PF: > { %v1156_v53 = vld [vmem:[%s3975_s21 + $0x10] sm:$0xff]  ;;  %v1154_v54 = vld [vmem:[%s3975_s21] sm:$0xff]  ;;  %v3832_v55 = vmov 0   ;;  %v1157_v56 = vld [vmem:[%s3975_s21 + $0x18] sm:$0xff]  ;;  %v1032_v29 = vlaneseq  ;;  %vm1444_vm4 = vcmask 261120   ;;  %v3833_v35 = vmov 0.0  }
 0x111   : > { %3614 = vset.pattern.permute.xlu1 %v3832_v55  ;;  %3613 = vset.pattern.permute.xlu0 %v3832_v55  ;;  %v1155_v57 = vld [vmem:[%s3975_s21 + $0x8] sm:$0xff]  ;;  %v1158_v59 = vld [vmem:[%s3975_s21 + $0x20] sm:$0xff]  ;;  %v1161_v60 = vld [vmem:[%s3975_s21 + $0x38] sm:$0xff]  ;;  %p3145_p6 = scmp.ne.s32.totalorder %s3954_s25, 3 }
 0x112   : > { %1177 = vperm.xlu1 %3614, %v1156_v53   ;;  %1171 = vperm.xlu0 %3613, %v1154_v54   ;;  %v1159_v58 = vld [vmem:[%s3975_s21 + $0x28] sm:$0xff]  ;;  %v1160_v61 = vld [vmem:[%s3975_s21 + $0x30] sm:$0xff]  ;;  %v3616_v63 = vld [vmem:[#allocation4] sm:$0xff]   ;;  %v4106_v30 = vand.u32 127, %v1032_v29  ;;  %s4821_s20 = sld [smem:[#allocation14_spill]] (!%p3145_p6) }
 0x113   : > { %v3615_v62 = vld [vmem:[#allocation4 + $0x8] sm:$0xff]   ;;  %v1162_v1 = vld [vmem:[%s3975_s21 + $0x40] sm:$0xff]  ;;  %v4080_v2 = vld [vmem:[%s4780_s6 + $0x38] sm:$0xff]   ;;  %s4822_s18 = sld [smem:[#allocation15_spill]] (!%p3145_p6) }
 0x114   : > { %v1163_v0 = vld [vmem:[%s3975_s21 + $0x48] sm:$0xff]  ;;  %3412 = vmatprep.subr.bf16.mxu1 %v3615_v62  ;;  %v1165_v3 = vld [vmem:[%s3975_s21 + $0x58] sm:$0xff]  ;;  %v1164_v4 = vld [vmem:[%s3975_s21 + $0x50] sm:$0xff]  ;;  %s4823_s29 = sld [smem:[#allocation16_spill]] (!%p3145_p6) }
 0x115   : > { %3413 = vmatpush3.bf16.msra.mxu1 %v3615_v62  ;;  %v3621_v5 = vld [vmem:[#allocation3 + $0x18] sm:$0xff]   ;;  %v1167_v6 = vld [vmem:[%s3975_s21 + $0x68] sm:$0xff]  ;;  %v1166_v7 = vld [vmem:[%s3975_s21 + $0x60] sm:$0xff]  ;;  %s4824_s30 = sld [smem:[#allocation17_spill]] (!%p3145_p6) }
 0x116   : > { %1180 = vperm.xlu1 %3614, %v1157_v56   ;;  %1174 = vperm.xlu0 %3613, %v1155_v57   ;;  %v3623_v8 = vld [vmem:[#allocation3 + $0x10] sm:$0xff]   ;;  %v1169_v9 = vld [vmem:[%s3975_s21 + $0x78] sm:$0xff]  ;;  %v3625_v11 = vld [vmem:[#allocation3 + $0x8] sm:$0xff]   ;;  %s4825_s27 = sld [smem:[#allocation18_spill]] (!%p3145_p6) }
 0x117   : > { %3414 = vmatprep.subr.bf16.mxu1 %v3616_v63  ;;  %3388 = vmatprep.subr.bf16.mxu0 %v3621_v5  ;;  %v1168_v10 = vld [vmem:[%s3975_s21 + $0x70] sm:$0xff]  ;;  %v1035_v12 = vld [vmem:[%s3970_s23 + $0x8] sm:$0xff]  ;;  %v1034_v13 = vld [vmem:[%s3970_s23] sm:$0xff] }
 0x118   : > { %3389 = vmatpush3.bf16.msra.mxu0 %v3621_v5  ;;  %v3627_v14 = vld [vmem:[#allocation3] sm:$0xff]   ;;  %v1037_v15 = vld [vmem:[%s3970_s23 + $0x18] sm:$0xff]  ;;  %v1036_v16 = vld [vmem:[%s3970_s23 + $0x10] sm:$0xff] }
 0x119   : > { %3415 = vmatpush3.bf16.msra.mxu1 %v3616_v63  ;;  %3390 = vmatprep.subr.bf16.mxu0 %v3623_v8  ;;  %v1039_v17 = vld [vmem:[%s3970_s23 + $0x28] sm:$0xff]  ;;  %v1038_v18 = vld [vmem:[%s3970_s23 + $0x20] sm:$0xff]  ;;  %v1041_v19 = vld [vmem:[%s3970_s23 + $0x38] sm:$0xff] }
 0x11a   : > { %1186 = vperm.xlu1 %3614, %v1159_v58   ;;  %1183 = vperm.xlu0 %3613, %v1158_v59   ;;  %v1040_v20 = vld [vmem:[%s3970_s23 + $0x30] sm:$0xff]  ;;  %v1043_v21 = vld [vmem:[%s3970_s23 + $0x48] sm:$0xff]  ;;  %v1042_v22 = vld [vmem:[%s3970_s23 + $0x40] sm:$0xff] }
 0x11b   : > { %3432 = vmatprep.subr.bf16.mxu1 %v4080_v2  ;;  %v1045_v23 = vld [vmem:[%s3970_s23 + $0x58] sm:$0xff]  ;;  %v1044_v24 = vld [vmem:[%s3970_s23 + $0x50] sm:$0xff]  ;;  %v1047_v25 = vld [vmem:[%s3970_s23 + $0x68] sm:$0xff] }
 0x11c   : > { %3391 = vmatpush3.bf16.msra.mxu0 %v3623_v8  ;;  %v1046_v26 = vld [vmem:[%s3970_s23 + $0x60] sm:$0xff]  ;;  %v1049_v27 = vld [vmem:[%s3970_s23 + $0x78] sm:$0xff]  ;;  %v1048_v28 = vld [vmem:[%s3970_s23 + $0x70] sm:$0xff] }
 0x11d   : > { %3392 = vmatprep.subr.bf16.mxu0 %v3625_v11  ;;  %v3618_v44 = vld [vmem:[%s4780_s6 + $0x30] sm:$0xff]   ;;  %v3619_v50 = vld [vmem:[%s4780_s6 + $0x28] sm:$0xff]   ;;  %v3620_v56 = vld [vmem:[%s4780_s6 + $0x20] sm:$0xff]  }
 0x11e   : > { %1192 = vperm.xlu1 %3614, %v1161_v60   ;;  %1189 = vperm.xlu0 %3613, %v1160_v61   ;;  %v3622_v62 = vld [vmem:[%s4780_s6 + $0x18] sm:$0xff]  }
 0x120   : > { %3393 = vmatpush3.bf16.msra.mxu0 %v3625_v11  ;;  %v1566_v11 = vld [vmem:[%s3980_s16] sm:$0xff] }
 0x121   : > { %3394 = vmatprep.subr.bf16.mxu0 %v3627_v14 }
 0x122   : > { %1198 = vperm.xlu1 %3614, %v1163_v0   ;;  %1195 = vperm.xlu0 %3613, %v1162_v1  }
 0x124   : > { %3395 = vmatpush3.bf16.msra.mxu0 %v3627_v14 }
 0x126   : > { %1204 = vperm.xlu1 %3614, %v1165_v3   ;;  %1201 = vperm.xlu0 %3613, %v1164_v4   ;;  %v3624_v4 = vld [vmem:[%s4780_s6 + $0x10] sm:$0xff]  }
 0x12a   : > { %1210 = vperm.xlu1 %3614, %v1167_v6   ;;  %1207 = vperm.xlu0 %3613, %v1166_v7  }
 0x12e   : > { %1216 = vperm.xlu1 %3614, %v1169_v9   ;;  %1213 = vperm.xlu0 %3613, %v1168_v10   ;;  %v3626_v10 = vld [vmem:[%s4780_s6 + $0x8] sm:$0xff]  }
 0x132   : > { %1054 = vperm.xlu1 %3614, %v1035_v12   ;;  %1051 = vperm.xlu0 %3613, %v1034_v13   ;;  %v1567_v12 = vld [vmem:[%s3980_s16 + $0x8] sm:$0xff] }
 0x136   : > { %1060 = vperm.xlu1 %3614, %v1037_v15   ;;  %1057 = vperm.xlu0 %3613, %v1036_v16   ;;  %v1598_v16 = vpack.c.bf16 %v1567_v12, %v1566_v11  ;;  %v4222_v11 = vld [vmem:[%s3980_s16 + $0x78] sm:$0xff] }
 0x13a   : > { %1066 = vperm.xlu1 %3614, %v1039_v17   ;;  %1063 = vperm.xlu0 %3613, %v1038_v18  }
 0x13e   : > { %1072 = vperm.xlu1 %3614, %v1041_v19   ;;  %1069 = vperm.xlu0 %3613, %v1040_v20   ;;  %v3628_v19 = vld [vmem:[%s4780_s6] sm:$0xff]  }
 0x142   : > { %1078 = vperm.xlu1 %3614, %v1043_v21   ;;  %1075 = vperm.xlu0 %3613, %v1042_v22  }
 0x146   : > { %1084 = vperm.xlu1 %3614, %v1045_v23   ;;  %1081 = vperm.xlu0 %3613, %v1044_v24   ;;  %v1568_v23 = vld [vmem:[%s3980_s16 + $0x10] sm:$0xff]  ;;  %v1569_v24 = vld [vmem:[%s3980_s16 + $0x18] sm:$0xff] }
 0x14a   : > { %1090 = vperm.xlu1 %3614, %v1047_v25   ;;  %1087 = vperm.xlu0 %3613, %v1046_v26  }
 0x14e   : > { %1096 = vperm.xlu1 %3614, %v1049_v27   ;;  %1093 = vperm.xlu0 %3613, %v1048_v28   ;;  %v1570_v27 = vld [vmem:[%s3980_s16 + $0x20] sm:$0xff]  ;;  %v1571_v28 = vld [vmem:[%s3980_s16 + $0x28] sm:$0xff] }
 0x18d   : > { %v1178_v31 = vpop.permute.xlu1 %1177  ;;  %v1172_v32 = vpop.permute.xlu0 %1171 }
 0x18e   : > { %vm1220_vm0 = vcmp.eq.s32.totalorder %v4106_v30, %v1178_v31  ;;  %vm1218_vm1 = vcmp.eq.s32.totalorder %v4106_v30, %v1172_v32 }
 0x18f   : > { %v3064_v36 = vsel %vm1220_vm0, 1.0, %v3833_v35  ;;  %v3062_v37 = vsel %vm1218_vm1, 1.0, %v3833_v35 }
 0x191   : > { %v1181_v33 = vpop.permute.xlu1 %1180  ;;  %v1175_v34 = vpop.permute.xlu0 %1174 }
 0x192   : > { %vm1221_vm2 = vcmp.eq.s32.totalorder %v4106_v30, %v1181_v33  ;;  %vm1219_vm3 = vcmp.eq.s32.totalorder %v4106_v30, %v1175_v34  ;;  %v1599_v33 = vpack.c.bf16 %v1569_v24, %v1568_v23  ;;  %v3636_v23 = vld [vmem:[%s4784_s10] sm:$0xff]  }
 0x193   : > { %v3065_v38 = vsel %vm1221_vm2, 1.0, %v3833_v35  ;;  %v3063_v39 = vsel %vm1219_vm3, 1.0, %v3833_v35  ;;  %vm1306_vm3 = vcmask 523264  }
 0x194   : > { %v1267_v40 = vpack.c.bf16 %v3065_v38, %v3064_v36  ;;  %v1266_v41 = vpack.c.bf16 %v3063_v39, %v3062_v37  ;;  %v1600_v36 = vpack.c.bf16 %v1571_v28, %v1570_v27 }
 0x195   : > { %v1187_v42 = vpop.permute.xlu1 %1186  ;;  %v1184_v43 = vpop.permute.xlu0 %1183 }
 0x196   : > { %vm1223_vm5 = vcmp.eq.s32.totalorder %v4106_v30, %v1187_v42  ;;  %vm1222_vm6 = vcmp.eq.s32.totalorder %v4106_v30, %v1184_v43  ;;  %3416 = vmatprep.mubr.msk.bf16.mxu1 %vm1444_vm4, %v1266_v41  ;;  %v1572_v42 = vld [vmem:[%s3980_s16 + $0x30] sm:$0xff]  ;;  %v1573_v43 = vld [vmem:[%s3980_s16 + $0x38] sm:$0xff] }
 0x197   : > { %v3067_v45 = vsel %vm1223_vm5, 1.0, %v3833_v35  ;;  %v3066_v46 = vsel %vm1222_vm6, 1.0, %v3833_v35  ;;  %3417 = vmatmul.mubr.msk.bf16.vlgmr.msra.gmra.mxu1 %vm1444_vm4, %v1267_v40 }
 0x198   : > { %v1268_v47 = vpack.c.bf16 %v3067_v45, %v3066_v46  ;;  %3433 = vmatpush3.bf16.msra.mxu1 %v4080_v2  ;;  %v1574_v46 = vld [vmem:[%s3980_s16 + $0x40] sm:$0xff] }
 0x199   : > { %v1193_v48 = vpop.permute.xlu1 %1192  ;;  %v1190_v49 = vpop.permute.xlu0 %1189  ;;  %3434 = vmatprep.subr.bf16.mxu1 %v3618_v44 }
 0x19a   : > { %vm1225_vm7 = vcmp.eq.s32.totalorder %v4106_v30, %v1193_v48  ;;  %vm1224_vm8 = vcmp.eq.s32.totalorder %v4106_v30, %v1190_v49  ;;  %3420 = vmatprep.mubr.msk.bf16.mxu1 %vm1444_vm4, %v1268_v47  ;;  %v1575_v47 = vld [vmem:[%s3980_s16 + $0x48] sm:$0xff] }
 0x19b   : > { %v3069_v51 = vsel %vm1225_vm7, 1.0, %v3833_v35  ;;  %v3068_v52 = vsel %vm1224_vm8, 1.0, %v3833_v35 }
 0x19c   : > { %v1269_v53 = vpack.c.bf16 %v3069_v51, %v3068_v52  ;;  %3435 = vmatpush3.bf16.msra.mxu1 %v3618_v44  ;;  %v1602_v52 = vpack.c.bf16 %v1575_v47, %v1574_v46  ;;  %v4275_v47 = vld [vmem:[%s4783_s9] ss:$0 sm:$0xff] }
 0x19d   : > { %v1199_v54 = vpop.permute.xlu1 %1198  ;;  %v1196_v55 = vpop.permute.xlu0 %1195  ;;  %3436 = vmatprep.subr.bf16.mxu1 %v3619_v50 }
 0x19e   : > { %vm1227_vm9 = vcmp.eq.s32.totalorder %v4106_v30, %v1199_v54  ;;  %vm1226_vm10 = vcmp.eq.s32.totalorder %v4106_v30, %v1196_v55 }
 0x19f   : > { %v3071_v57 = vsel %vm1227_vm9, 1.0, %v3833_v35  ;;  %v3070_v58 = vsel %vm1226_vm10, 1.0, %v3833_v35  ;;  %3421 = vmatmul.mubr.msk.bf16.gmra.mxu1 %vm1444_vm4, %v1269_v53 }
 0x1a0   : > { %v1270_v59 = vpack.c.bf16 %v3071_v57, %v3070_v58  ;;  %3437 = vmatpush3.bf16.msra.mxu1 %v3619_v50  ;;  %v1601_v50 = vpack.c.bf16 %v1573_v43, %v1572_v42  ;;  %v1576_v58 = vld [vmem:[%s3980_s16 + $0x50] sm:$0xff] }
 0x1a1   : > { %v1205_v60 = vpop.permute.xlu1 %1204  ;;  %v1202_v61 = vpop.permute.xlu0 %1201  ;;  %3438 = vmatprep.subr.bf16.mxu1 %v3620_v56 }
 0x1a2   : > { %vm1229_vm11 = vcmp.eq.s32.totalorder %v4106_v30, %v1205_v60  ;;  %vm1228_vm12 = vcmp.eq.s32.totalorder %v4106_v30, %v1202_v61  ;;  %3424 = vmatprep.mubr.msk.bf16.mxu1 %vm1444_vm4, %v1270_v59  ;;  %v1577_v59 = vld [vmem:[%s3980_s16 + $0x58] sm:$0xff] }
 0x1a3   : > { %v3073_v63 = vsel %vm1229_vm11, 1.0, %v3833_v35  ;;  %v3072_v0 = vsel %vm1228_vm12, 1.0, %v3833_v35 }
 0x1a4   : > { %v1271_v1 = vpack.c.bf16 %v3073_v63, %v3072_v0  ;;  %3439 = vmatpush3.bf16.msra.mxu1 %v3620_v56  ;;  %v1579_v63 = vld [vmem:[%s3980_s16 + $0x68] sm:$0xff] }
 0x1a5   : > { %v1211_v2 = vpop.permute.xlu1 %1210  ;;  %v1208_v3 = vpop.permute.xlu0 %1207  ;;  %3440 = vmatprep.subr.bf16.mxu1 %v3622_v62 }
 0x1a6   : > { %vm1231_vm13 = vcmp.eq.s32.totalorder %v4106_v30, %v1211_v2  ;;  %vm1230_vm14 = vcmp.eq.s32.totalorder %v4106_v30, %v1208_v3  ;;  %v1603_v2 = vpack.c.bf16 %v1577_v59, %v1576_v58 }
 0x1a7   : > { %v3075_v5 = vsel %vm1231_vm13, 1.0, %v3833_v35  ;;  %v3074_v6 = vsel %vm1230_vm14, 1.0, %v3833_v35  ;;  %3425 = vmatmul.mubr.msk.bf16.gmra.mxu1 %vm1444_vm4, %v1271_v1 }
 0x1a8   : > { %v1272_v7 = vpack.c.bf16 %v3075_v5, %v3074_v6  ;;  %3441 = vmatpush3.bf16.msra.mxu1 %v3622_v62  ;;  %v1578_v62 = vld [vmem:[%s3980_s16 + $0x60] sm:$0xff] }
 0x1a9   : > { %v1217_v8 = vpop.permute.xlu1 %1216  ;;  %v1214_v9 = vpop.permute.xlu0 %1213  ;;  %3442 = vmatprep.subr.bf16.mxu1 %v3624_v4 }
 0x1aa   : > { %vm1233_vm15 = vcmp.eq.s32.totalorder %v4106_v30, %v1217_v8  ;;  %vm1232_vm0 = vcmp.eq.s32.totalorder %v4106_v30, %v1214_v9  ;;  %3428 = vmatprep.mubr.msk.bf16.mxu1 %vm1444_vm4, %v1272_v7 }
 0x1ab   : > { %v3077_v13 = vsel %vm1233_vm15, 1.0, %v3833_v35  ;;  %v3076_v14 = vsel %vm1232_vm0, 1.0, %v3833_v35 }
 0x1ac   : > { %v1273_v15 = vpack.c.bf16 %v3077_v13, %v3076_v14  ;;  %3443 = vmatpush3.bf16.msra.mxu1 %v3624_v4  ;;  %v1604_v4 = vpack.c.bf16 %v1579_v63, %v1578_v62 }
 0x1ad   : > { %v1055_v17 = vpop.permute.xlu1 %1054  ;;  %v1052_v18 = vpop.permute.xlu0 %1051  ;;  %3444 = vmatprep.subr.bf16.mxu1 %v3626_v10 }
 0x1ae   : > { %vm1099_vm1 = vcmp.eq.s32.totalorder %v4106_v30, %v1055_v17  ;;  %vm1098_vm2 = vcmp.eq.s32.totalorder %v4106_v30, %v1052_v18  ;;  %v3629_v18 = vld [vmem:[%s4784_s10 + $0x38] sm:$0xff]  }
 0x1af   : > { %v3047_v20 = vsel %vm1099_vm1, 1.0, %v3833_v35  ;;  %v3046_v21 = vsel %vm1098_vm2, 1.0, %v3833_v35  ;;  %3429 = vmatmul.mubr.msk.bf16.gmra.mxu1 %vm1444_vm4, %v1273_v15  ;;  %3464 = vmatprep.subr.bf16.mxu0 %v3629_v18 }
 0x1b0   : > { %3445 = vmatpush3.bf16.msra.mxu1 %v3626_v10  ;;  %v1146_v22 = vpack.c.bf16 %v3047_v20, %v3046_v21  ;;  %3448 = vmatprep.mubr.bf16.mxu1 %v1598_v16  ;;  %v4219_v10 = vld [vmem:[%s3980_s16 + $0x70] sm:$0xff]  ;;  %v3633_v20 = vld [vmem:[%s4784_s10 + $0x18] sm:$0xff]  }
 0x1b1   : > { %v1061_v25 = vpop.permute.xlu1 %1060  ;;  %v1058_v26 = vpop.permute.xlu0 %1057  ;;  %3446 = vmatprep.subr.bf16.mxu1 %v3628_v19  ;;  %v1605_v16 = vpack.c.bf16 %v4222_v11, %v4219_v10  ;;  %v3634_v21 = vld [vmem:[%s4784_s10 + $0x10] sm:$0xff]  }
 0x1b2   : > { %vm1101_vm5 = vcmp.eq.s32.totalorder %v4106_v30, %v1061_v25  ;;  %vm1100_vm6 = vcmp.eq.s32.totalorder %v4106_v30, %v1058_v26  ;;  %3396 = vmatprep.mubr.msk.bf16.mxu0 %vm1306_vm3, %v1146_v22  ;;  %v3635_v22 = vld [vmem:[%s4784_s10 + $0x8] sm:$0xff]  }
 0x1b3   : > { %v3049_v31 = vsel %vm1101_vm5, 1.0, %v3833_v35  ;;  %v3048_v32 = vsel %vm1100_vm6, 1.0, %v3833_v35 }
 0x1b4   : > { %v1147_v34 = vpack.c.bf16 %v3049_v31, %v3048_v32  ;;  %3447 = vmatpush3.bf16.msra.mxu1 %v3628_v19  ;;  %v3632_v19 = vld [vmem:[%s4784_s10 + $0x20] sm:$0xff]  }
 0x1b5   : > { %v1067_v37 = vpop.permute.xlu1 %1066  ;;  %v1064_v38 = vpop.permute.xlu0 %1063 }
 0x1b6   : > { %vm1103_vm4 = vcmp.eq.s32.totalorder %v4106_v30, %v1067_v37  ;;  %vm1102_vm7 = vcmp.eq.s32.totalorder %v4106_v30, %v1064_v38  ;;  %3397 = vmatmul.mubr.msk.bf16.vlgmr.msra.gmra.mxu0 %vm1306_vm3, %v1147_v34 }
 0x1b7   : > { %v3051_v39 = vsel %vm1103_vm4, 1.0, %v3833_v35  ;;  %v3050_v40 = vsel %vm1102_vm7, 1.0, %v3833_v35  ;;  %3449 = vmatmul.mubr.bf16.vlgmr.msra.gmra.mxu1 %v1599_v33  ;;  %3465 = vmatpush3.bf16.msra.mxu0 %v3629_v18 }
 0x1b8   : > { %v1148_v41 = vpack.c.bf16 %v3051_v39, %v3050_v40  ;;  %3452 = vmatprep.mubr.bf16.mxu1 %v1600_v36 }
 0x1b9   : > { %v1073_v44 = vpop.permute.xlu1 %1072  ;;  %v1070_v45 = vpop.permute.xlu0 %1069 }
 0x1ba   : > { %vm1105_vm8 = vcmp.eq.s32.totalorder %v4106_v30, %v1073_v44  ;;  %vm1104_vm9 = vcmp.eq.s32.totalorder %v4106_v30, %v1070_v45  ;;  %3400 = vmatprep.mubr.msk.bf16.mxu0 %vm1306_vm3, %v1148_v41 }
 0x1bb   : > { %v3053_v48 = vsel %vm1105_vm8, 1.0, %v3833_v35  ;;  %v3052_v49 = vsel %vm1104_vm9, 1.0, %v3833_v35 }
 0x1bc   : > { %v1149_v51 = vpack.c.bf16 %v3053_v48, %v3052_v49 }
 0x1bd   : > { %v1079_v53 = vpop.permute.xlu1 %1078  ;;  %v1076_v54 = vpop.permute.xlu0 %1075 }
 0x1be   : > { %vm1107_vm10 = vcmp.eq.s32.totalorder %v4106_v30, %v1079_v53  ;;  %vm1106_vm11 = vcmp.eq.s32.totalorder %v4106_v30, %v1076_v54  ;;  %3401 = vmatmul.mubr.msk.bf16.gmra.mxu0 %vm1306_vm3, %v1149_v51 }
 0x1bf   : > { %v3055_v55 = vsel %vm1107_vm10, 1.0, %v3833_v35  ;;  %v3054_v56 = vsel %vm1106_vm11, 1.0, %v3833_v35  ;;  %3453 = vmatmul.mubr.bf16.gmra.mxu1 %v1601_v50 }
 0x1c0   : > { %v1150_v57 = vpack.c.bf16 %v3055_v55, %v3054_v56  ;;  %3456 = vmatprep.mubr.bf16.mxu1 %v1602_v52 }
 0x1c1   : > { %v1085_v60 = vpop.permute.xlu1 %1084  ;;  %v1082_v61 = vpop.permute.xlu0 %1081 }
 0x1c2   : > { %vm1109_vm12 = vcmp.eq.s32.totalorder %v4106_v30, %v1085_v60  ;;  %vm1108_vm13 = vcmp.eq.s32.totalorder %v4106_v30, %v1082_v61  ;;  %3404 = vmatprep.mubr.msk.bf16.mxu0 %vm1306_vm3, %v1150_v57 }
 0x1c3   : > { %v3057_v0 = vsel %vm1109_vm12, 1.0, %v3833_v35  ;;  %v3056_v1 = vsel %vm1108_vm13, 1.0, %v3833_v35 }
 0x1c4   : > { %v1151_v3 = vpack.c.bf16 %v3057_v0, %v3056_v1 }
 0x1c5   : > { %v1091_v5 = vpop.permute.xlu1 %1090  ;;  %v1088_v6 = vpop.permute.xlu0 %1087 }
 0x1c6   : > { %vm1111_vm14 = vcmp.eq.s32.totalorder %v4106_v30, %v1091_v5  ;;  %vm1110_vm15 = vcmp.eq.s32.totalorder %v4106_v30, %v1088_v6  ;;  %3405 = vmatmul.mubr.msk.bf16.gmra.mxu0 %vm1306_vm3, %v1151_v3 }
 0x1c7   : > { %v3059_v7 = vsel %vm1111_vm14, 1.0, %v3833_v35  ;;  %v3058_v8 = vsel %vm1110_vm15, 1.0, %v3833_v35  ;;  %3457 = vmatmul.mubr.bf16.gmra.mxu1 %v1603_v2 }
 0x1c8   : > { %v1152_v9 = vpack.c.bf16 %v3059_v7, %v3058_v8  ;;  %3460 = vmatprep.mubr.bf16.mxu1 %v1604_v4 }
 0x1c9   : > { %v1097_v12 = vpop.permute.xlu1 %1096  ;;  %v1094_v13 = vpop.permute.xlu0 %1093 }
 0x1ca   : > { %vm1113_vm0 = vcmp.eq.s32.totalorder %v4106_v30, %v1097_v12  ;;  %vm1112_vm1 = vcmp.eq.s32.totalorder %v4106_v30, %v1094_v13  ;;  %3408 = vmatprep.mubr.msk.bf16.mxu0 %vm1306_vm3, %v1152_v9  ;;  %v3630_v30 = vld [vmem:[%s4784_s10 + $0x30] sm:$0xff]  }
 0x1cb   : > { %v3061_v14 = vsel %vm1113_vm0, 1.0, %v3833_v35  ;;  %v3060_v15 = vsel %vm1112_vm1, 1.0, %v3833_v35  ;;  %3466 = vmatprep.subr.bf16.mxu0 %v3630_v30  ;;  %v3631_v35 = vld [vmem:[%s4784_s10 + $0x28] sm:$0xff]  }
 0x1cc   : > { %v1153_v17 = vpack.c.bf16 %v3061_v14, %v3060_v15  ;;  %3467 = vmatpush3.bf16.msra.mxu0 %v3630_v30 }
 0x1cd   : > { %3468 = vmatprep.subr.bf16.mxu0 %v3631_v35 }
 0x1ce   : > { %3409 = vmatmul.mubr.msk.bf16.gmra.mxu0 %vm1306_vm3, %v1153_v17 }
 0x1cf   : > { %3461 = vmatmul.mubr.bf16.gmra.mxu1 %v1605_v16 }
 0x1d0   : > { %3469 = vmatpush3.bf16.msra.mxu0 %v3631_v35 }
 0x1d1   : > { %3470 = vmatprep.subr.bf16.mxu0 %v3632_v19 }
 0x1d4   : > { %3471 = vmatpush3.bf16.msra.mxu0 %v3632_v19 }
 0x1d5   : > { %3472 = vmatprep.subr.bf16.mxu0 %v3633_v20 }
 0x1d8   : > { %3473 = vmatpush3.bf16.msra.mxu0 %v3633_v20 }
 0x1d9   : > { %3474 = vmatprep.subr.bf16.mxu0 %v3634_v21 }
 0x1dc   : > { %3475 = vmatpush3.bf16.msra.mxu0 %v3634_v21 }
 0x1dd   : > { %3476 = vmatprep.subr.bf16.mxu0 %v3635_v22 }
 0x1e0   : > { %3477 = vmatpush3.bf16.msra.mxu0 %v3635_v22 }
 0x1e1   : > { %3478 = vmatprep.subr.bf16.mxu0 %v3636_v23 }
 0x1e4   : > { %3479 = vmatpush3.bf16.msra.mxu0 %v3636_v23 }
 0x257   : > { %v3418_v24 = vpop.f32.mrf.mxu1 }
 0x259   : > { %v1503_v25 = vpop.f32.mrf.mxu1 }
 0x25b   : > { %v3419_v26 = vpop.f32.mrf.mxu1 }
 0x25d   : > { %v1506_v27 = vpop.f32.mrf.mxu1 }
 0x25f   : > { %v3422_v28 = vpop.f32.mrf.mxu1 }
 0x261   : > { %v1519_v31 = vpop.f32.mrf.mxu1 }
 0x263   : > { %v3423_v32 = vpop.f32.mrf.mxu1 }
 0x265   : > { %v1522_v33 = vpop.f32.mrf.mxu1 }
 0x267   : > { %v4256_v34 = vpop.f32.mrf.mxu1 }
 0x269   : > { %v4258_v36 = vpop.f32.mrf.mxu1 }
 0x26b   : > { %v4260_v37 = vpop.f32.mrf.mxu1 }
 0x26d   : > { %v4262_v38 = vpop.f32.mrf.mxu1 }
 0x26f   : > { %v4264_v39 = vpop.f32.mrf.mxu1 }
 0x271   : > { %v4266_v40 = vpop.f32.mrf.mxu1 }
 0x273   : > { %v4268_v41 = vpop.f32.mrf.mxu1 }
 0x275   : > { %v4270_v42 = vpop.f32.mrf.mxu1 }
 0x276   : > { %v3398_v43 = vpop.f32.mrf.mxu0 }
 0x277   : > { %v3450_v44 = vpop.f32.mrf.mxu1 }
 0x278   : > { %v1697_v45 = vadd.f32 %v3450_v44, %v3398_v43  ;;  %v1365_v46 = vpop.f32.mrf.mxu0 }
 0x279   : > { %v1688_v48 = vpop.f32.mrf.mxu1 }
 0x27a   : > { %v1753_v49 = vadd.f32 %v3418_v24, %v1697_v45  ;;  %v1689_v50 = vadd.f32 %v1688_v48, %v1365_v46  ;;  %v3399_v51 = vpop.f32.mrf.mxu0 }
 0x27b   : > { %v3451_v52 = vpop.f32.mrf.mxu1 }
 0x27c   : > { %v4278_v53 = vadd.f32 %v4275_v47, %v1753_v49  ;;  %v1751_v54 = vadd.f32 %v1689_v50, %v1503_v25  ;;  %v1700_v55 = vadd.f32 %v3451_v52, %v3399_v51  ;;  %v1368_v56 = vpop.f32.mrf.mxu0 }
 0x27d   : > { %v1691_v57 = vpop.f32.mrf.mxu1 }
 0x27e   : > { %v3111_v58 = vmul.f32 -1.442695, %v4278_v53  ;;  %v4282_v59 = vadd.f32 %v4275_v47, %v1751_v54  ;;  %v1754_v60 = vadd.f32 %v3419_v26, %v1700_v55  ;;  %v1692_v61 = vadd.f32 %v1691_v57, %v1368_v56  ;;  %v3402_v62 = vpop.f32.mrf.mxu0 }
 0x27f   : > { %v3454_v63 = vpop.f32.mrf.mxu1 }
 0x280   : > { %3637 = vpow2.f32 %v3111_v58  ;;  %v3109_v0 = vmul.f32 -1.442695, %v4282_v59  ;;  %v4286_v1 = vadd.f32 %v4275_v47, %v1754_v60  ;;  %v1752_v2 = vadd.f32 %v1692_v61, %v1506_v27  ;;  %v1381_v3 = vpop.f32.mrf.mxu0 }
 0x281   : > { %v1713_v4 = vadd.f32 %v3454_v63, %v3402_v62  ;;  %v1704_v5 = vpop.f32.mrf.mxu1 }
 0x282   : > { %3639 = vpow2.f32 %v3109_v0  ;;  %v3112_v6 = vmul.f32 -1.442695, %v4286_v1  ;;  %v4290_v7 = vadd.f32 %v4275_v47, %v1752_v2  ;;  %v1705_v8 = vadd.f32 %v1704_v5, %v1381_v3  ;;  %v3403_v9 = vpop.f32.mrf.mxu0 }
 0x283   : > { %v1757_v12 = vadd.f32 %v3422_v28, %v1713_v4  ;;  %v3455_v13 = vpop.f32.mrf.mxu1 }
 0x284   : > { %3641 = vpow2.f32 %v3112_v6  ;;  %v3110_v14 = vmul.f32 -1.442695, %v4290_v7  ;;  %v1755_v15 = vadd.f32 %v1705_v8, %v1519_v31  ;;  %v1716_v16 = vadd.f32 %v3455_v13, %v3403_v9  ;;  %v1384_v17 = vpop.f32.mrf.mxu0 }
 0x285   : > { %v4294_v18 = vadd.f32 %v4275_v47, %v1757_v12  ;;  %v1707_v30 = vpop.f32.mrf.mxu1 }
 0x286   : > { %3643 = vpow2.f32 %v3110_v14  ;;  %v4297_v35 = vadd.f32 %v4275_v47, %v1755_v15  ;;  %v1758_v19 = vadd.f32 %v3423_v32, %v1716_v16  ;;  %v1708_v20 = vadd.f32 %v1707_v30, %v1384_v17  ;;  %v3406_v21 = vpop.f32.mrf.mxu0 }
 0x287   : > { %v3115_v22 = vmul.f32 -1.442695, %v4294_v18  ;;  %v3458_v23 = vpop.f32.mrf.mxu1 }
 0x288   : > { %v3113_v24 = vmul.f32 -1.442695, %v4297_v35  ;;  %v4302_v25 = vadd.f32 %v4275_v47, %v1758_v19  ;;  %v1756_v26 = vadd.f32 %v1708_v20, %v1522_v33  ;;  %v1729_v27 = vadd.f32 %v3458_v23, %v3406_v21  ;;  %v1397_v28 = vpop.f32.mrf.mxu0 }
 0x289   : > { %3645 = vpow2.f32 %v3115_v22  ;;  %v1720_v31 = vpop.f32.mrf.mxu1 }
 0x28a   : > { %3647 = vpow2.f32 %v3113_v24  ;;  %v3116_v43 = vmul.f32 -1.442695, %v4302_v25  ;;  %v4306_v32 = vadd.f32 %v4275_v47, %v1756_v26  ;;  %v1761_v44 = vadd.f32 %v4256_v34, %v1729_v27  ;;  %v3407_v45 = vpop.f32.mrf.mxu0 }
 0x28b   : > { %v1721_v46 = vadd.f32 %v1720_v31, %v1397_v28  ;;  %v3459_v48 = vpop.f32.mrf.mxu1 }
 0x28c   : > { %3649 = vpow2.f32 %v3116_v43  ;;  %v3114_v49 = vmul.f32 -1.442695, %v4306_v32  ;;  %v4311_v33 = vadd.f32 %v4275_v47, %v1761_v44  ;;  %v1732_v50 = vadd.f32 %v3459_v48, %v3407_v45  ;;  %v1400_v51 = vpop.f32.mrf.mxu0 }
 0x28d   : > { %v3638_v52 = vpop.eup %3637  ;;  %v1759_v54 = vadd.f32 %v1721_v46, %v4258_v36  ;;  %v1723_v55 = vpop.f32.mrf.mxu1 }
 0x28e   : > { %v1840_v56 = vadd.f32 1.0, %v3638_v52  ;;  %3651 = vpow2.f32 %v3114_v49  ;;  %v3119_v57 = vmul.f32 -1.442695, %v4311_v33  ;;  %v1762_v34 = vadd.f32 %v4260_v37, %v1732_v50  ;;  %v3410_v58 = vpop.f32.mrf.mxu0 }
 0x28f   : > { %v3640_v60 = vpop.eup %3639  ;;  %v4317_v61 = vadd.f32 %v4275_v47, %v1759_v54  ;;  %v1724_v62 = vadd.f32 %v1723_v55, %v1400_v51  ;;  %v3462_v63 = vpop.f32.mrf.mxu1 }
 0x290   : > { %3653 = vrcp.f32 %v1840_v56  ;;  %v1838_v0 = vadd.f32 1.0, %v3640_v60  ;;  %v4320_v2 = vadd.f32 %v4275_v47, %v1762_v34  ;;  %v1745_v36 = vadd.f32 %v3462_v63, %v3410_v58  ;;  %v1413_v3 = vpop.f32.mrf.mxu0 }
 0x291   : > { %v3642_v4 = vpop.eup %3641  ;;  %3655 = vpow2.f32 %v3119_v57  ;;  %v3117_v5 = vmul.f32 -1.442695, %v4317_v61  ;;  %v1760_v37 = vadd.f32 %v1724_v62, %v4262_v38  ;;  %v1736_v6 = vpop.f32.mrf.mxu1 }
 0x292   : > { %3657 = vrcp.f32 %v1838_v0  ;;  %v1841_v8 = vadd.f32 1.0, %v3642_v4  ;;  %v3120_v9 = vmul.f32 -1.442695, %v4320_v2  ;;  %v1765_v12 = vadd.f32 %v4264_v39, %v1745_v36  ;;  %v3411_v13 = vpop.f32.mrf.mxu0 }
 0x293   : > { %v3644_v14 = vpop.eup %3643  ;;  %3659 = vpow2.f32 %v3117_v5  ;;  %v4327_v15 = vadd.f32 %v4275_v47, %v1760_v37  ;;  %v1737_v16 = vadd.f32 %v1736_v6, %v1413_v3  ;;  %v3463_v17 = vpop.f32.mrf.mxu1 }
 0x294   : > { %3661 = vrcp.f32 %v1841_v8  ;;  %v1839_v30 = vadd.f32 1.0, %v3644_v14  ;;  %v4330_v19 = vadd.f32 %v4275_v47, %v1765_v12  ;;  %v1748_v38 = vadd.f32 %v3463_v17, %v3411_v13  ;;  %v1416_v20 = vpop.f32.mrf.mxu0 }
 0x295   : > { %3663 = vpow2.f32 %v3120_v9  ;;  %v3118_v21 = vmul.f32 -1.442695, %v4327_v15  ;;  %v1763_v39 = vadd.f32 %v1737_v16, %v4266_v40  ;;  %v1739_v22 = vpop.f32.mrf.mxu1 }
 0x296   : > { %v3646_v23 = vpop.eup %3645  ;;  %3665 = vrcp.f32 %v1839_v30  ;;  %v3123_v24 = vmul.f32 -1.442695, %v4330_v19  ;;  %v1766_v26 = vadd.f32 %v4268_v41, %v1748_v38  ;;  %v1740_v27 = vadd.f32 %v1739_v22, %v1416_v20 }
 0x297   : > { %v3648_v28 = vpop.eup %3647  ;;  %v1844_v31 = vadd.f32 1.0, %v3646_v23  ;;  %3667 = vpow2.f32 %v3118_v21  ;;  %v4337_v43 = vadd.f32 %v4275_v47, %v1763_v39 }
 0x298   : > { %v1842_v44 = vadd.f32 1.0, %v3648_v28  ;;  %3669 = vpow2.f32 %v3123_v24  ;;  %v4340_v45 = vadd.f32 %v4275_v47, %v1766_v26  ;;  %v1764_v40 = vadd.f32 %v1740_v27, %v4270_v42 }
 0x299   : > { %v3650_v46 = vpop.eup %3649  ;;  %3671 = vrcp.f32 %v1844_v31  ;;  %v3121_v48 = vmul.f32 -1.442695, %v4337_v43 }
 0x29a   : > { %3673 = vrcp.f32 %v1842_v44  ;;  %v1845_v41 = vadd.f32 1.0, %v3650_v46  ;;  %v3124_v49 = vmul.f32 -1.442695, %v4340_v45  ;;  %v4346_v50 = vadd.f32 %v4275_v47, %v1764_v40 }
 0x29b   : > { %v3652_v51 = vpop.eup %3651  ;;  %3675 = vpow2.f32 %v3121_v48 }
 0x29c   : > { %3677 = vrcp.f32 %v1845_v41  ;;  %v1843_v52 = vadd.f32 1.0, %v3652_v51  ;;  %v3122_v54 = vmul.f32 -1.442695, %v4346_v50 }
 0x29d   : > { %v3654_v55 = vpop.eup %3653  ;;  %3679 = vpow2.f32 %v3124_v49 }
 0x29e   : > { %v3656_v42 = vpop.eup %3655  ;;  %3681 = vrcp.f32 %v1843_v52  ;;  %v1888_v37 = vmul.f32 %v3654_v55, %v4278_v53 }
 0x29f   : > { %v3658_v56 = vpop.eup %3657  ;;  %3683 = vpow2.f32 %v3122_v54  ;;  %v1848_v62 = vadd.f32 1.0, %v3656_v42 }
 0x2a0   : > { %v3660_v57 = vpop.eup %3659  ;;  %v1886_v3 = vmul.f32 %v3658_v56, %v4282_v59  ;;  %v4372_v56 = vld [vmem:[%s4785_s11] ss:$0 sm:$0xff] }
 0x2a1   : > { %v3662_v34 = vpop.eup %3661  ;;  %v1846_v58 = vadd.f32 1.0, %v3660_v57 }
 0x2a2   : > { %v3664_v60 = vpop.eup %3663  ;;  %v1889_v47 = vmul.f32 %v3662_v34, %v4286_v1 }
 0x2a3   : > { %v3666_v63 = vpop.eup %3665  ;;  %v1849_v0 = vadd.f32 1.0, %v3664_v60  ;;  %3685 = vrcp.f32 %v1846_v58 }
 0x2a4   : > { %v3668_v36 = vpop.eup %3667  ;;  %v1887_v4 = vmul.f32 %v3666_v63, %v4290_v7  ;;  %v1919_v13 = vpack.c.bf16 %v1889_v47, %v1888_v37 }
 0x2a5   : > { %v3670_v5 = vpop.eup %3669  ;;  %3687 = vrcp.f32 %v1849_v0  ;;  %v1847_v6 = vadd.f32 1.0, %v3668_v36 }
 0x2a6   : > { %v3672_v8 = vpop.eup %3671  ;;  %3689 = vrcp.f32 %v1848_v62  ;;  %v1918_v9 = vpack.c.bf16 %v1887_v4, %v1886_v3  ;;  %v1852_v59 = vadd.f32 1.0, %v3670_v5 }
 0x2a7   : > { %v3674_v12 = vpop.eup %3673  ;;  %3691 = vrcp.f32 %v1847_v6  ;;  %v1892_v22 = vmul.f32 %v3672_v8, %v4294_v18 }
 0x2a8   : > { %v3676_v14 = vpop.eup %3675  ;;  %3480 = vmatprep.mubr.bf16.mxu0 %v1918_v9  ;;  %v1890_v20 = vmul.f32 %v3674_v12, %v4297_v35 }
 0x2a9   : > { %v3678_v1 = vpop.eup %3677  ;;  %v1850_v16 = vadd.f32 1.0, %v3676_v14  ;;  %3481 = vmatmul.mubr.bf16.vlgmr.msra.gmra.mxu0 %v1919_v13 }
 0x2aa   : > { %v3680_v17 = vpop.eup %3679  ;;  %v1893_v38 = vmul.f32 %v3678_v1, %v4302_v25 }
 0x2ab   : > { %v3682_v30 = vpop.eup %3681  ;;  %v1853_v7 = vadd.f32 1.0, %v3680_v17  ;;  %3693 = vrcp.f32 %v1850_v16 }
 0x2ac   : > { %v3684_v53 = vpop.eup %3683  ;;  %v1891_v21 = vmul.f32 %v3682_v30, %v4306_v32  ;;  %v1921_v24 = vpack.c.bf16 %v1893_v38, %v1892_v22 }
 0x2ad   : > { %3695 = vrcp.f32 %v1853_v7  ;;  %v1851_v39 = vadd.f32 1.0, %v3684_v53 }
 0x2ae   : > { %3697 = vrcp.f32 %v1852_v59  ;;  %v1920_v23 = vpack.c.bf16 %v1891_v21, %v1890_v20 }
 0x2af   : > { %3699 = vrcp.f32 %v1851_v39 }
 0x2b0   : > { %3484 = vmatprep.mubr.bf16.mxu0 %v1920_v23  ;;  %v3686_v26 = vpop.eup %3685 }
 0x2b1   : > { %3485 = vmatmul.mubr.bf16.gmra.mxu0 %v1921_v24  ;;  %v1894_v35 = vmul.f32 %v3686_v26, %v4317_v61 }
 0x2b2   : > { %v3688_v27 = vpop.eup %3687 }
 0x2b3   : > { %v3690_v28 = vpop.eup %3689  ;;  %v1897_v31 = vmul.f32 %v3688_v27, %v4320_v2 }
 0x2b4   : > { %v3692_v25 = vpop.eup %3691  ;;  %v1896_v44 = vmul.f32 %v3690_v28, %v4311_v33 }
 0x2b5   : > { %v1895_v32 = vmul.f32 %v3692_v25, %v4327_v15 }
 0x2b6   : > { %v1923_v18 = vpack.c.bf16 %v1897_v31, %v1896_v44 }
 0x2b7   : > { %v1922_v40 = vpack.c.bf16 %v1895_v32, %v1894_v35 }
 0x2b8   : > { %v3694_v46 = vpop.eup %3693 }
 0x2b9   : > { %3488 = vmatprep.mubr.bf16.mxu0 %v1922_v40  ;;  %v1898_v52 = vmul.f32 %v3694_v46, %v4337_v43  ;;  %v2349_v40 = vshrl.u32 %v1032_v29, 7  ;;  %v3136_v46 = vld [vmem:[%s696_s0] ss:$0 sm:$0xff] }
 0x2ba   : > { %v3696_v48 = vpop.eup %3695  ;;  %3489 = vmatmul.mubr.bf16.gmra.mxu0 %v1923_v18 }
 0x2bb   : > { %v3698_v41 = vpop.eup %3697  ;;  %v1901_v51 = vmul.f32 %v3696_v48, %v4340_v45  ;;  %v2350_v18 = vadd.s32 8, %v2349_v40  ;;  %v2351_v48 = vadd.s32 16, %v2349_v40  ;;  %vm2358_vm2 = vcmp.eq.s32.totalorder %v2349_v40, %v3136_v46 }
 0x2bc   : > { %v3700_v49 = vpop.eup %3699  ;;  %v1900_v61 = vmul.f32 %v3698_v41, %v4330_v19  ;;  %v2352_v41 = vadd.s32 24, %v2349_v40 }
 0x2bd   : > { %v1899_v2 = vmul.f32 %v3700_v49, %v4346_v50  ;;  %vm2359_vm3 = vcmp.eq.s32.totalorder %v2350_v18, %v3136_v46  ;;  %vm2360_vm6 = vcmp.eq.s32.totalorder %v2351_v48, %v3136_v46  ;;  %v3834_v49 = vmov 1.0|1.0  }
 0x2be   : > { %v1925_v15 = vpack.c.bf16 %v1901_v51, %v1900_v61  ;;  %vm3141_vm5 = vmpackc.low %vm2359_vm3, %vm2358_vm2  ;;  %vm2361_vm4 = vcmp.eq.s32.totalorder %v2352_v41, %v3136_v46 }
 0x2bf   : > { %v1924_v54 = vpack.c.bf16 %v1899_v2, %v1898_v52  ;;  %3512 = vmatprep.mubr.msk.bf16.mxu1 %vm3141_vm5, %v3834_v49  ;;  %vm4479_vm7 = vmpackc.low %vm2361_vm4, %vm2360_vm6 }
 0x2c1   : > { %3492 = vmatprep.mubr.bf16.mxu0 %v1924_v54 }
 0x2c2   : > { %3493 = vmatmul.mubr.bf16.gmra.mxu0 %v1925_v15 }
 0x369   : > { %v3482_v33 = vpop.f32.mrf.mxu0 }
 0x36a   : > { %v4442_v23 = vadd.f32 %v3482_v33, %v4372_v56 }
 0x36b   : > { %v4365_v55 = vpop.f32.mrf.mxu0 }
 0x36c   : > { %v2130_v27 = vmul.f32 %v4442_v23, %v4442_v23  ;;  %v4455_v28 = vadd.f32 %v4372_v56, %v4365_v55 }
 0x36d   : > { %v4367_v42 = vpop.f32.mrf.mxu0 }
 0x36e   : > { %v4462_v31 = vadd.f32 %v4367_v42, %v4372_v56  ;;  %v2128_v35 = vmul.f32 %v4455_v28, %v4455_v28 }
 0x36f   : > { %v2018_v45 = vpop.f32.mrf.mxu0 }
 0x370   : > { %v4375_v43 = vadd.f32 %v4372_v56, %v2018_v45  ;;  %v2131_v32 = vmul.f32 %v4462_v31, %v4462_v31 }
 0x371   : > { %v3486_v50 = vpop.f32.mrf.mxu0 }
 0x372   : > { %v4378_v19 = vadd.f32 %v3486_v50, %v4372_v56  ;;  %v2129_v44 = vmul.f32 %v4375_v43, %v4375_v43 }
 0x373   : > { %v2031_v57 = vpop.f32.mrf.mxu0 }
 0x374   : > { %2092 = vadd.xlane.f32.xlu1 %v4378_v19  ;;  %v2134_v30 = vmul.f32 %v4378_v19, %v4378_v19  ;;  %v4430_v53 = vadd.f32 %v4372_v56, %v2031_v57 }
 0x375   : > { %v3487_v34 = vpop.f32.mrf.mxu0 }
 0x376   : > { %v4382_v58 = vadd.f32 %v3487_v34, %v4372_v56  ;;  %v2132_v22 = vmul.f32 %v4430_v53, %v4430_v53 }
 0x377   : > { %v2034_v60 = vpop.f32.mrf.mxu0 }
 0x378   : > { %2094 = vadd.xlane.f32.xlu0 %v4382_v58  ;;  %v2135_v7 = vmul.f32 %v4382_v58, %v4382_v58  ;;  %v4448_v26 = vadd.f32 %v4372_v56, %v2034_v60 }
 0x37a   : > { %v3490_v62 = vpop.f32.mrf.mxu0  ;;  %v2133_v25 = vmul.f32 %v4448_v26, %v4448_v26 }
 0x37b   : > { %v4386_v63 = vadd.f32 %v3490_v62, %v4372_v56 }
 0x37c   : > { %v2047_v47 = vpop.f32.mrf.mxu0 }
 0x37d   : > { %2100 = vadd.xlane.f32.xlu1 %v4386_v63  ;;  %v2138_v3 = vmul.f32 %v4386_v63, %v4386_v63  ;;  %v4396_v5 = vadd.f32 %v4372_v56, %v2047_v47 }
 0x37e   : > { %v3491_v0 = vpop.f32.mrf.mxu0 }
 0x37f   : > { %v4390_v36 = vadd.f32 %v3491_v0, %v4372_v56  ;;  %v2136_v9 = vmul.f32 %v4396_v5, %v4396_v5 }
 0x380   : > { %v2050_v4 = vpop.f32.mrf.mxu0 }
 0x381   : > { %2164 = vadd.xlane.f32.xlu1 %v2138_v3  ;;  %2102 = vadd.xlane.f32.xlu0 %v4390_v36  ;;  %v2139_v37 = vmul.f32 %v4390_v36, %v4390_v36  ;;  %v4402_v8 = vadd.f32 %v4372_v56, %v2050_v4 }
 0x382   : > { %v3494_v6 = vpop.f32.mrf.mxu0 }
 0x383   : > { %v4408_v13 = vadd.f32 %v3494_v6, %v4372_v56  ;;  %v2137_v17 = vmul.f32 %v4402_v8, %v4402_v8 }
 0x384   : > { %v2063_v12 = vpop.f32.mrf.mxu0 }
 0x385   : > { %2166 = vadd.xlane.f32.xlu0 %v2139_v37  ;;  %2096 = vadd.xlane.f32.xlu1 %v4396_v5  ;;  %v4411_v14 = vadd.f32 %v4372_v56, %v2063_v12  ;;  %v2142_v59 = vmul.f32 %v4408_v13, %v4408_v13 }
 0x386   : > { %v3495_v1 = vpop.f32.mrf.mxu0 }
 0x387   : > { %v4416_v16 = vadd.f32 %v3495_v1, %v4372_v56  ;;  %v2140_v38 = vmul.f32 %v4411_v14, %v4411_v14 }
 0x388   : > { %v2066_v21 = vpop.f32.mrf.mxu0 }
 0x389   : > { %2098 = vadd.xlane.f32.xlu0 %v4402_v8  ;;  %2160 = vadd.xlane.f32.xlu1 %v2136_v9  ;;  %v2143_v20 = vmul.f32 %v4416_v16, %v4416_v16  ;;  %v4436_v39 = vadd.f32 %v4372_v56, %v2066_v21 }
 0x38b   : > { %v2141_v24 = vmul.f32 %v4436_v39, %v4436_v39 }
 0x38d   : > { %2108 = vadd.xlane.f32.xlu0 %v4408_v13  ;;  %2104 = vadd.xlane.f32.xlu1 %v4411_v14 }
 0x391   : > { %2162 = vadd.xlane.f32.xlu0 %v2137_v17  ;;  %2110 = vadd.xlane.f32.xlu1 %v4416_v16 }
 0x395   : > { %2172 = vadd.xlane.f32.xlu0 %v2142_v59  ;;  %2156 = vadd.xlane.f32.xlu1 %v2134_v30 }
 0x399   : > { %2158 = vadd.xlane.f32.xlu0 %v2135_v7  ;;  %2168 = vadd.xlane.f32.xlu1 %v2140_v38 }
 0x39d   : > { %2174 = vadd.xlane.f32.xlu0 %v2143_v20  ;;  %2088 = vadd.xlane.f32.xlu1 %v4430_v53 }
 0x3a1   : > { %2106 = vadd.xlane.f32.xlu0 %v4436_v39  ;;  %2152 = vadd.xlane.f32.xlu1 %v2132_v22 }
 0x3a5   : > { %2170 = vadd.xlane.f32.xlu0 %v2141_v24  ;;  %2084 = vadd.xlane.f32.xlu1 %v4442_v23 }
 0x3a9   : > { %2090 = vadd.xlane.f32.xlu0 %v4448_v26  ;;  %2148 = vadd.xlane.f32.xlu1 %v2130_v27 }
 0x3ad   : > { %2154 = vadd.xlane.f32.xlu0 %v2133_v25  ;;  %2080 = vadd.xlane.f32.xlu1 %v4455_v28 }
 0x3b1   : > { %2086 = vadd.xlane.f32.xlu0 %v4462_v31  ;;  %2144 = vadd.xlane.f32.xlu1 %v2128_v35 }
 0x3b5   : > { %2150 = vadd.xlane.f32.xlu0 %v2131_v32 }
 0x3b9   : > { %2082 = vadd.xlane.f32.xlu0 %v4375_v43 }
 0x3bd   : > { %2146 = vadd.xlane.f32.xlu0 %v2129_v44 }
 0x3fd   : > { %v2093_v29 = vpop.xlane.xlu1 %2092 }
 0x3fe   : > { %v4509_v41 = vmul.f32 0.03125, %v2093_v29 }
 0x401   : > { %v2095_v52 = vpop.xlane.xlu0 %2094 }
 0x402   : > { %v4505_v35 = vmul.f32 0.03125, %v2095_v52 }
 0x406   : > { %v2101_v2 = vpop.xlane.xlu1 %2100 }
 0x407   : > { %v4491_v6 = vmul.f32 0.03125, %v2101_v2 }
 0x409   : > { %v2202_v24 = vmul.f32 %v4491_v6, %v4491_v6 }
 0x40a   : > { %v2165_v61 = vpop.xlane.xlu1 %2164  ;;  %v2103_v54 = vpop.xlane.xlu0 %2102 }
 0x40b   : > { %v4485_v60 = vmul.f32 0.03125, %v2103_v54  ;;  %v2186_v1 = vmul.f32 0.03125, %v2165_v61 }
 0x40d   : > { %v2203_v9 = vmul.f32 %v4485_v60, %v4485_v60  ;;  %v2218_v44 = vsub.f32 %v2186_v1, %v2202_v24 }
 0x40e   : > { %v2167_v15 = vpop.xlane.xlu0 %2166  ;;  %v2097_v33 = vpop.xlane.xlu1 %2096 }
 0x40f   : > { %v2187_v62 = vmul.f32 0.03125, %v2167_v15  ;;  %v4503_v27 = vmul.f32 0.03125, %v2097_v33 }
 0x411   : > { %v2219_v17 = vsub.f32 %v2187_v62, %v2203_v9  ;;  %v2200_v52 = vmul.f32 %v4503_v27, %v4503_v27 }
 0x412   : > { %v2099_v55 = vpop.xlane.xlu0 %2098  ;;  %v2161_v42 = vpop.xlane.xlu1 %2160 }
 0x413   : > { %v4495_v59 = vmul.f32 0.03125, %v2099_v55  ;;  %v2184_v18 = vmul.f32 0.03125, %v2161_v42  ;;  %v2235_v2 = vadd.f32 1e-05, %v2219_v17  ;;  %v2199_v42 = vmul.f32 %v4505_v35, %v4505_v35 }
 0x415   : > { %v2201_v40 = vmul.f32 %v4495_v59, %v4495_v59 }
 0x416   : > { %v2109_v56 = vpop.xlane.xlu0 %2108  ;;  %v2105_v45 = vpop.xlane.xlu1 %2104 }
 0x417   : > { %v4483_v34 = vmul.f32 0.03125, %v2109_v56  ;;  %v4489_v4 = vmul.f32 0.03125, %v2105_v45  ;;  %v2234_v45 = vadd.f32 1e-05, %v2218_v44 }
 0x419   : > { %v2206_v3 = vmul.f32 %v4483_v34, %v4483_v34  ;;  %v2204_v38 = vmul.f32 %v4489_v4, %v4489_v4 }
 0x41a   : > { %v2163_v50 = vpop.xlane.xlu0 %2162  ;;  %v2111_v57 = vpop.xlane.xlu1 %2110 }
 0x41b   : > { %v4499_v20 = vmul.f32 0.03125, %v2111_v57  ;;  %v2185_v25 = vmul.f32 0.03125, %v2163_v50  ;;  %v2216_v50 = vsub.f32 %v2184_v18, %v2200_v52 }
 0x41d   : > { %v2207_v61 = vmul.f32 %v4499_v20, %v4499_v20  ;;  %v2217_v15 = vsub.f32 %v2185_v25, %v2201_v40  ;;  %v2232_v17 = vadd.f32 1e-05, %v2216_v50 }
 0x41e   : > { %v2173_v47 = vpop.xlane.xlu0 %2172  ;;  %v2157_v0 = vpop.xlane.xlu1 %2156 }
 0x41f   : > { %v2190_v37 = vmul.f32 0.03125, %v2173_v47  ;;  %v2182_v57 = vmul.f32 0.03125, %v2157_v0  ;;  %v2198_v47 = vmul.f32 %v4509_v41, %v4509_v41  ;;  %v2233_v9 = vadd.f32 1e-05, %v2217_v15 }
 0x420   : > { %v2270_v15 = vsub.f32 %v4408_v13, %v4483_v34  ;;  %v2267_v13 = vsub.f32 %v4390_v36, %v4485_v60  ;;  %v2268_v34 = vsub.f32 %v4411_v14, %v4489_v4 }
 0x421   : > { %v2222_v12 = vsub.f32 %v2190_v37, %v2206_v3 }
 0x422   : > { %v2159_v30 = vpop.xlane.xlu0 %2158  ;;  %v2169_v7 = vpop.xlane.xlu1 %2168 }
 0x423   : > { %v2238_v21 = vadd.f32 1e-05, %v2222_v12  ;;  %v2188_v22 = vmul.f32 0.03125, %v2169_v7  ;;  %v2183_v33 = vmul.f32 0.03125, %v2159_v30  ;;  %v2214_v30 = vsub.f32 %v2182_v57, %v2198_v47 }
 0x425   : > { %v2220_v32 = vsub.f32 %v2188_v22, %v2204_v38  ;;  %3701 = vrsqrt.f32 %v2238_v21  ;;  %v2215_v12 = vsub.f32 %v2183_v33, %v2199_v42  ;;  %v2230_v40 = vadd.f32 1e-05, %v2214_v30 }
 0x426   : > { %v2175_v46 = vpop.xlane.xlu0 %2174  ;;  %v2089_v48 = vpop.xlane.xlu1 %2088  ;;  %3703 = vrsqrt.f32 %v2235_v2 }
 0x427   : > { %v2191_v54 = vmul.f32 0.03125, %v2175_v46  ;;  %v2236_v55 = vadd.f32 1e-05, %v2220_v32  ;;  %v4521_v1 = vmul.f32 0.03125, %v2089_v48  ;;  %v2231_v24 = vadd.f32 1e-05, %v2215_v12 }
 0x429   : > { %v2223_v56 = vsub.f32 %v2191_v54, %v2207_v61  ;;  %3705 = vrsqrt.f32 %v2236_v55  ;;  %v2196_v25 = vmul.f32 %v4521_v1, %v4521_v1 }
 0x42a   : > { %v2107_v29 = vpop.xlane.xlu0 %2106  ;;  %v2153_v62 = vpop.xlane.xlu1 %2152 }
 0x42b   : > { %v2239_v3 = vadd.f32 1e-05, %v2223_v56  ;;  %v4519_v37 = vmul.f32 0.03125, %v2107_v29  ;;  %v2180_v7 = vmul.f32 0.03125, %v2153_v62 }
 0x42d   : > { %3707 = vrsqrt.f32 %v2239_v3  ;;  %v2205_v21 = vmul.f32 %v4519_v37, %v4519_v37  ;;  %v2212_v18 = vsub.f32 %v2180_v7, %v2196_v25 }
 0x42e   : > { %3709 = vrsqrt.f32 %v2234_v45  ;;  %v2171_v0 = vpop.xlane.xlu0 %2170  ;;  %v2085_v38 = vpop.xlane.xlu1 %2084 }
 0x42f   : > { %v2189_v22 = vmul.f32 0.03125, %v2171_v0  ;;  %3711 = vrsqrt.f32 %v2233_v9  ;;  %v4527_v32 = vmul.f32 0.03125, %v2085_v38  ;;  %v2228_v55 = vadd.f32 1e-05, %v2212_v18 }
 0x430   : > { %3713 = vrsqrt.f32 %v2232_v17  ;;  %v2271_v9 = vsub.f32 %v4416_v16, %v4499_v20  ;;  %v4548_v17 = vld [vmem:[%s4786_s12] ss:$0 sm:$0xff] }
 0x431   : > { %v2221_v44 = vsub.f32 %v2189_v22, %v2205_v21  ;;  %3715 = vrsqrt.f32 %v2231_v24  ;;  %v2194_v33 = vmul.f32 %v4527_v32, %v4527_v32  ;;  %v2266_v22 = vsub.f32 %v4386_v63, %v4491_v6 }
 0x432   : > { %v2091_v46 = vpop.xlane.xlu0 %2090  ;;  %v2149_v48 = vpop.xlane.xlu1 %2148  ;;  %v2264_v6 = vsub.f32 %v4396_v5, %v4503_v27 }
 0x433   : > { %v3702_v2 = vpop.eup %3701  ;;  %v2237_v61 = vadd.f32 1e-05, %v2221_v44  ;;  %v4529_v54 = vmul.f32 0.03125, %v2091_v46  ;;  %v2178_v52 = vmul.f32 0.03125, %v2149_v48  ;;  %v2265_v46 = vsub.f32 %v4402_v8, %v4495_v59 }
 0x434   : > { %v2286_v50 = vmul.f32 %v3702_v2, %v2270_v15  ;;  %v3704_v47 = vpop.eup %3703 }
 0x435   : > { %3717 = vrsqrt.f32 %v2237_v61  ;;  %v2210_v56 = vsub.f32 %v2178_v52, %v2194_v33  ;;  %v2197_v57 = vmul.f32 %v4529_v54, %v4529_v54  ;;  %v2283_v24 = vmul.f32 %v3704_v47, %v2267_v13 }
 0x436   : > { %3719 = vrsqrt.f32 %v2230_v40  ;;  %v2155_v42 = vpop.xlane.xlu0 %2154  ;;  %v2081_v45 = vpop.xlane.xlu1 %2080  ;;  %v2308_v60 = vmul.f32 %v4548_v17, %v2286_v50  ;;  %v4560_v40 = vld [vmem:[%s4787_s13] ss:$0 sm:$0xff]  ;;  %v2269_v50 = vsub.f32 %v4436_v39, %v4519_v37 }
 0x437   : > { %v2181_v29 = vmul.f32 0.03125, %v2155_v42  ;;  %v4537_v62 = vmul.f32 0.03125, %v2081_v45  ;;  %v3706_v3 = vpop.eup %3705  ;;  %3721 = vrsqrt.f32 %v2228_v55  ;;  %v2226_v7 = vadd.f32 1e-05, %v2210_v56 }
 0x438   : > { %v2284_v18 = vmul.f32 %v3706_v3, %v2268_v34  ;;  %v2330_v61 = vadd.f32 %v4560_v40, %v2308_v60  ;;  %v2305_v8 = vmul.f32 %v4548_v17, %v2283_v24  ;;  %v2262_v45 = vsub.f32 %v4378_v19, %v4509_v41  ;;  %v3733_v24 = vld [vmem:[%s3980_s16 + $0x58] sm:$0xff] }
 0x439   : > { %v2213_v12 = vsub.f32 %v2181_v29, %v2197_v57  ;;  %v2192_v0 = vmul.f32 %v4537_v62, %v4537_v62 }
 0x43a   : > { %v3708_v30 = vpop.eup %3707  ;;  %v2087_v38 = vpop.xlane.xlu0 %2086  ;;  %v2306_v5 = vmul.f32 %v4548_v17, %v2284_v18  ;;  %v2346_v47 = vadd.f32 %v2330_v61, %v4219_v10 }
 0x43b   : > { %v2145_v36 = vpop.xlane.xlu1 %2144  ;;  %v3710_v14 = vpop.eup %3709  ;;  %v2229_v4 = vadd.f32 1e-05, %v2213_v12  ;;  %v4553_v21 = vmul.f32 0.03125, %v2087_v38  ;;  %v2287_v20 = vmul.f32 %v3708_v30, %v2271_v9  ;;  %v2263_v12 = vsub.f32 %v4382_v58, %v4505_v35 }
 0x43c   : > { %v2176_v16 = vmul.f32 0.03125, %v2145_v36  ;;  %v3712_v25 = vpop.eup %3711  ;;  %v2282_v52 = vmul.f32 %v3710_v14, %v2266_v22  ;;  %v2327_v30 = vadd.f32 %v4560_v40, %v2305_v8  ;;  %v2261_v22 = vsub.f32 %v4448_v26, %v4529_v54 }
 0x43d   : > { %3723 = vrsqrt.f32 %v2229_v4  ;;  %v2309_v2 = vmul.f32 %v4548_v17, %v2287_v20  ;;  %v3714_v63 = vpop.eup %3713  ;;  %v2195_v15 = vmul.f32 %v4553_v21, %v4553_v21  ;;  %v2281_v59 = vmul.f32 %v3712_v25, %v2265_v46  ;;  %v3734_v46 = vld [vmem:[%s3980_s16 + $0x60] sm:$0xff] }
 0x43e   : > { %v2208_v44 = vsub.f32 %v2176_v16, %v2192_v0  ;;  %v2151_v48 = vpop.xlane.xlu0 %2150  ;;  %3725 = vrsqrt.f32 %v2226_v7  ;;  %v3716_v42 = vpop.eup %3715  ;;  %v2304_v13 = vmul.f32 %v4548_v17, %v2282_v52  ;;  %v2280_v34 = vmul.f32 %v3714_v63, %v2264_v6  ;;  %v3736_v6 = vld [vmem:[%s3980_s16 + $0x50] sm:$0xff] }
 0x43f   : > { %v2179_v33 = vmul.f32 0.03125, %v2151_v48  ;;  %v2331_v56 = vadd.f32 %v4560_v40, %v2309_v2  ;;  %v2303_v7 = vmul.f32 %v4548_v17, %v2281_v59  ;;  %v2279_v0 = vmul.f32 %v3716_v42, %v2263_v12  ;;  %v3735_v2 = vld [vmem:[%s3980_s16 + $0x68] sm:$0xff] }
 0x440   : > { %v2224_v55 = vadd.f32 1e-05, %v2208_v44  ;;  %v2326_v35 = vadd.f32 %v4560_v40, %v2304_v13  ;;  %v2302_v38 = vmul.f32 %v4548_v17, %v2280_v34  ;;  %v2260_v20 = vsub.f32 %v4430_v53, %v4521_v1  ;;  %v3737_v42 = vld [vmem:[%s3980_s16 + $0x48] sm:$0xff]  ;;  %v3739_v34 = vld [vmem:[%s3980_s16 + $0x38] sm:$0xff] }
 0x441   : > { %v2211_v57 = vsub.f32 %v2179_v33, %v2195_v15  ;;  %v2347_v3 = vadd.f32 %v2331_v56, %v4222_v11  ;;  %v2328_v11 = vadd.f32 %v4560_v40, %v2306_v5  ;;  %v2343_v25 = vadd.f32 %v3733_v24, %v2327_v30  ;;  %v3738_v5 = vld [vmem:[%s3980_s16 + $0x40] sm:$0xff]  ;;  %v3744_v24 = vld [vmem:[%s3980_s16 + $0x10] sm:$0xff] }
 0x442   : > { %v3718_v27 = vpop.eup %3717  ;;  %v2083_v29 = vpop.xlane.xlu0 %2082  ;;  %3727 = vrsqrt.f32 %v2224_v55  ;;  %v2325_v44 = vadd.f32 %v4560_v40, %v2303_v7  ;;  %v2301_v52 = vmul.f32 %v4548_v17, %v2279_v0  ;;  %v2342_v15 = vadd.f32 %v3736_v6, %v2326_v35  ;;  %v2374_v6 = vld [vmem:[#allocation2 + $0x18] sm:$0xff] }
 0x443   : > { %v3720_v9 = vpop.eup %3719  ;;  %v2227_v19 = vadd.f32 1e-05, %v2211_v57  ;;  %v4582_v41 = vmul.f32 0.03125, %v2083_v29  ;;  %v2285_v39 = vmul.f32 %v3718_v27, %v2269_v50  ;;  %v2383_v37 = vpack.c.bf16 %v2347_v3, %v2346_v47 }
 0x444   : > { %v2278_v36 = vmul.f32 %v3720_v9, %v2262_v45  ;;  %v3722_v60 = vpop.eup %3721  ;;  %v2344_v48 = vadd.f32 %v3734_v46, %v2328_v11  ;;  %v2324_v53 = vadd.f32 %v4560_v40, %v2302_v38  ;;  %v2258_v8 = vsub.f32 %v4442_v23, %v4527_v32  ;;  %v3741_v11 = vld [vmem:[%s3980_s16 + $0x28] sm:$0xff] }
 0x445   : > { %3729 = vrsqrt.f32 %v2227_v19  ;;  %v2307_v10 = vmul.f32 %v4548_v17, %v2285_v39  ;;  %3496 = vmatprep.subr.bf16.mxu1 %v2383_v37  ;;  %v2193_v14 = vmul.f32 %v4582_v41, %v4582_v41  ;;  %v2276_v33 = vmul.f32 %v3722_v60, %v2260_v20 }
 0x446   : > { %v2147_v58 = vpop.xlane.xlu0 %2146  ;;  %3497 = vmatpush3.bf16.msra.mxu1 %v2383_v37  ;;  %v2300_v1 = vmul.f32 %v4548_v17, %v2278_v36  ;;  %v2381_v59 = vpack.c.bf16 %v2343_v25, %v2342_v15  ;;  %v2341_v45 = vadd.f32 %v3737_v42, %v2325_v44  ;;  %v2323_v50 = vadd.f32 %v4560_v40, %v2301_v52  ;;  %v3740_v37 = vld [vmem:[%s3980_s16 + $0x30] sm:$0xff] }
 0x447   : > { %v2177_v4 = vmul.f32 0.03125, %v2147_v58  ;;  %v2329_v16 = vadd.f32 %v4560_v40, %v2307_v10  ;;  %v2340_v27 = vadd.f32 %v3738_v5, %v2324_v53  ;;  %v2298_v47 = vmul.f32 %v4548_v17, %v2276_v33  ;;  %v2372_v15 = vld [vmem:[#allocation2 + $0x10] sm:$0xff]  ;;  %v2373_v33 = vld [vmem:[#allocation2] sm:$0xff] }
 0x448   : > { %v2322_v29 = vadd.f32 %v4560_v40, %v2300_v1  ;;  %v2259_v3 = vsub.f32 %v4462_v31, %v4553_v21  ;;  %v2339_v9 = vadd.f32 %v3739_v34, %v2323_v50  ;;  %v2256_v39 = vsub.f32 %v4455_v28, %v4537_v62  ;;  %v3742_v28 = vld [vmem:[%s3980_s16 + $0x20] sm:$0xff] }
 0x449   : > { %v2209_v18 = vsub.f32 %v2177_v4, %v2193_v14  ;;  %v2345_v61 = vadd.f32 %v3735_v2, %v2329_v16  ;;  %v2380_v13 = vpack.c.bf16 %v2341_v45, %v2340_v27  ;;  %v2320_v7 = vadd.f32 %v4560_v40, %v2298_v47  ;;  %v3743_v4 = vld [vmem:[%s3980_s16 + $0x18] sm:$0xff] }
 0x44a   : > { %v3724_v63 = vpop.eup %3723  ;;  %v2338_v30 = vadd.f32 %v3740_v37, %v2322_v29  ;;  %v2257_v60 = vsub.f32 %v4375_v43, %v4582_v41  ;;  %v3745_v41 = vld [vmem:[%s3980_s16] sm:$0xff] }
 0x44b   : > { %v2225_v26 = vadd.f32 1e-05, %v2209_v18  ;;  %v2382_v54 = vpack.c.bf16 %v2345_v61, %v2344_v48  ;;  %v2277_v55 = vmul.f32 %v3724_v63, %v2261_v22  ;;  %v3726_v56 = vpop.eup %3725  ;;  %v2336_v62 = vadd.f32 %v3742_v28, %v2320_v7  ;;  %v3746_v61 = vld [vmem:[%s3980_s16 + $0x8] sm:$0xff] }
 0x44c   : > { %v2274_v23 = vmul.f32 %v3726_v56, %v2258_v8  ;;  %v2379_v21 = vpack.c.bf16 %v2339_v9, %v2338_v30 }
 0x44d   : > { %3731 = vrsqrt.f32 %v2225_v26  ;;  %3498 = vmatprep.subr.bf16.mxu1 %v2382_v54  ;;  %v2299_v57 = vmul.f32 %v4548_v17, %v2277_v55  ;;  %v2375_v26 = vld [vmem:[#allocation2 + $0x8] sm:$0xff] }
 0x44e   : > { %3499 = vmatpush3.bf16.msra.mxu1 %v2382_v54  ;;  %v2296_v31 = vmul.f32 %v4548_v17, %v2274_v23 }
 0x44f   : > { %3500 = vmatprep.subr.bf16.mxu1 %v2381_v59  ;;  %v3728_v32 = vpop.eup %3727  ;;  %v2321_v12 = vadd.f32 %v4560_v40, %v2299_v57 }
 0x450   : > { %v2272_v35 = vmul.f32 %v3728_v32, %v2256_v39  ;;  %v2318_v38 = vadd.f32 %v4560_v40, %v2296_v31 }
 0x451   : > { %v2337_v0 = vadd.f32 %v3741_v11, %v2321_v12 }
 0x452   : > { %v3730_v19 = vpop.eup %3729  ;;  %3501 = vmatpush3.bf16.msra.mxu1 %v2381_v59  ;;  %v2294_v20 = vmul.f32 %v4548_v17, %v2272_v35  ;;  %v2334_v25 = vadd.f32 %v3744_v24, %v2318_v38 }
 0x453   : > { %3502 = vmatprep.subr.bf16.mxu1 %v2380_v13  ;;  %v2275_v10 = vmul.f32 %v3730_v19, %v2259_v3  ;;  %v2378_v14 = vpack.c.bf16 %v2337_v0, %v2336_v62 }
 0x454   : > { %v2316_v48 = vadd.f32 %v4560_v40, %v2294_v20 }
 0x455   : > { %v2297_v58 = vmul.f32 %v4548_v17, %v2275_v10 }
 0x456   : > { %3503 = vmatpush3.bf16.msra.mxu1 %v2380_v13  ;;  %v2332_v2 = vadd.f32 %v3745_v41, %v2316_v48 }
 0x457   : > { %3504 = vmatprep.subr.bf16.mxu1 %v2379_v21  ;;  %v2319_v36 = vadd.f32 %v4560_v40, %v2297_v58 }
 0x459   : > { %v2335_v16 = vadd.f32 %v3743_v4, %v2319_v36 }
 0x45a   : > { %v3732_v22 = vpop.eup %3731  ;;  %3505 = vmatpush3.bf16.msra.mxu1 %v2379_v21 }
 0x45b   : > { %3506 = vmatprep.subr.bf16.mxu1 %v2378_v14  ;;  %v2273_v44 = vmul.f32 %v3732_v22, %v2257_v60  ;;  %v2377_v18 = vpack.c.bf16 %v2335_v16, %v2334_v25 }
 0x45d   : > { %v2295_v46 = vmul.f32 %v4548_v17, %v2273_v44 }
 0x45e   : > { %3507 = vmatpush3.bf16.msra.mxu1 %v2378_v14 }
 0x45f   : > { %3508 = vmatprep.subr.bf16.mxu1 %v2377_v18  ;;  %v2317_v43 = vadd.f32 %v4560_v40, %v2295_v46 }
 0x461   : > { %v2333_v52 = vadd.f32 %v3746_v61, %v2317_v43 }
 0x462   : > { %3509 = vmatpush3.bf16.msra.mxu1 %v2377_v18 }
 0x463   : > { %v2376_v63 = vpack.c.bf16 %v2333_v52, %v2332_v2 }
 0x465   : > { %3510 = vmatprep.subr.bf16.mxu1 %v2376_v63 }
 0x466   : > { %3511 = vmatpush3.bf16.msra.mxu1 %v2376_v63 }
 0x469   : > { %3513 = vmatmul.mubr.msk.bf16.vlgmr.msra.gmra.mxu1 %vm4479_vm7, %v3834_v49 }
 0x529   : > { %v3514_v17 = vpop.f32.mrf.mxu1 }
 0x52a   : > { %v2435_v53 = vadd.f32 %v3514_v17, %v2374_v6 }
 0x52b   : > { %v2418_v1 = vpop.f32.mrf.mxu1 }
 0x52c   : > { %2439 = vst [vmem:[#allocation2 + $0x18] sm:$0xff] %v2435_v53  ;;  %v2433_v40 = vadd.f32 %v2418_v1, %v2372_v15 }
 0x52d   : > { %v3515_v54 = vpop.f32.mrf.mxu1 }
 0x52e   : > { %2437 = vst [vmem:[#allocation2 + $0x10] sm:$0xff] %v2433_v40  ;;  %v2436_v55 = vadd.f32 %v3515_v54, %v2375_v26  ;;  %2444 = sbr.rel (%p3145_p6) target bundleno = 1981 (0x7bd), region = 112 }
 0x52f   : > { %v2421_v56 = vpop.f32.mrf.mxu1 }
 0x530   : > { %2440 = vst [vmem:[#allocation2 + $0x8] sm:$0xff] %v2436_v55  ;;  %v2434_v8 = vadd.f32 %v2421_v56, %v2373_v33 }
 0x532   : > { %2438 = vst [vmem:[#allocation2] sm:$0xff] %v2434_v8 }
 0x533   : > { %v3747_v49 = vld [vmem:[%s4789_s15 + $0x38] sm:$0xff]   ;;  %v3749_v59 = vld [vmem:[%s4789_s15 + $0x30] sm:$0xff]   ;;  %v3751_v45 = vld [vmem:[%s4789_s15 + $0x28] sm:$0xff]  }
 0x534   : > { %v3748_v51 = vld [vmem:[%s4788_s14 + $0x38] sm:$0xff]   ;;  %3516 = vmatprep.subr.bf16.mxu0 %v3747_v49  ;;  %v3750_v42 = vld [vmem:[%s4788_s14 + $0x30] sm:$0xff]   ;;  %v3752_v50 = vld [vmem:[%s4788_s14 + $0x28] sm:$0xff]  }
 0x535   : > { %3536 = vmatprep.subr.bf16.mxu1 %v3748_v51  ;;  %3517 = vmatpush3.bf16.msra.mxu0 %v3747_v49  ;;  %v3753_v57 = vld [vmem:[%s4789_s15 + $0x20] sm:$0xff]   ;;  %v3755_v27 = vld [vmem:[%s4789_s15 + $0x18] sm:$0xff]   ;;  %v3757_v47 = vld [vmem:[%s4789_s15 + $0x10] sm:$0xff]  }
 0x536   : > { %3537 = vmatpush3.bf16.msra.mxu1 %v3748_v51  ;;  %3518 = vmatprep.subr.bf16.mxu0 %v3749_v59  ;;  %v3754_v5 = vld [vmem:[%s4788_s14 + $0x20] sm:$0xff]   ;;  %v3756_v29 = vld [vmem:[%s4788_s14 + $0x18] sm:$0xff]   ;;  %v2467_v23 = vld [vmem:[#allocation2 + $0x10] sm:$0xff] }
 0x537   : > { %3538 = vmatprep.subr.bf16.mxu1 %v3750_v42  ;;  %v4677_v3 = vld [vmem:[%s4821_s20] sm:$0xff]  ;;  %v3758_v13 = vld [vmem:[%s4788_s14 + $0x10] sm:$0xff]   ;;  %v4685_v9 = vld [vmem:[%s4821_s20 + $0x8] sm:$0xff] }
 0x538   : > { %v3759_v12 = vld [vmem:[%s4789_s15 + $0x8] sm:$0xff]   ;;  %v2465_v19 = vpack.c.bf16 %v4685_v9, %v4677_v3  ;;  %v3761_v37 = vld [vmem:[%s4789_s15] sm:$0xff]   ;;  %v2469_v7 = vld [vmem:[#allocation2 + $0x18] sm:$0xff] }
 0x539   : > { %3519 = vmatpush3.bf16.msra.mxu0 %v3749_v59  ;;  %v2468_v32 = vld [vmem:[#allocation2] sm:$0xff]  ;;  %v3760_v39 = vld [vmem:[%s4788_s14 + $0x8] sm:$0xff]   ;;  %v4704_v31 = vld [vmem:[%s4821_s20 + $0x10] sm:$0xff] }
 0x53a   : > { %3539 = vmatpush3.bf16.msra.mxu1 %v3750_v42  ;;  %3520 = vmatprep.subr.bf16.mxu0 %v3751_v45  ;;  %v2487_v34 = vpack.c.bf16 %v2468_v32, %v2467_v23  ;;  %v3762_v30 = vld [vmem:[%s4788_s14] sm:$0xff]   ;;  %v2470_v10 = vld [vmem:[#allocation2 + $0x8] sm:$0xff]  ;;  %v4709_v21 = vld [vmem:[%s4821_s20 + $0x18] sm:$0xff] }
 0x53b   : > { %3540 = vmatprep.subr.bf16.mxu1 %v3752_v50  ;;  %3552 = vmatprep.mubr.bf16.mxu1 %v2465_v19  ;;  %v2488_v11 = vpack.c.bf16 %v2470_v10, %v2469_v7  ;;  %v2466_v0 = vpack.c.bf16 %v4709_v21, %v4704_v31  ;;  %v3763_v58 = vld [vmem:[%s4791_s17 + $0x38] sm:$0xff]   ;;  %v3764_v35 = vld [vmem:[%s4791_s17 + $0x30] sm:$0xff]   ;;  %v3765_v28 = vld [vmem:[%s4791_s17 + $0x28] sm:$0xff]  }
 0x53c   : > { %3532 = vmatprep.mubr.bf16.mxu0 %v2487_v34  ;;  %v3766_v62 = vld [vmem:[%s4791_s17 + $0x20] sm:$0xff]   ;;  %v3767_v38 = vld [vmem:[%s4791_s17 + $0x18] sm:$0xff]   ;;  %v3768_v36 = vld [vmem:[%s4791_s17 + $0x10] sm:$0xff]  }
 0x53d   : > { %3521 = vmatpush3.bf16.msra.mxu0 %v3751_v45  ;;  %v3769_v60 = vld [vmem:[%s4791_s17 + $0x8] sm:$0xff]   ;;  %v3770_v14 = vld [vmem:[%s4791_s17] sm:$0xff]  }
 0x53e   : > { %3541 = vmatpush3.bf16.msra.mxu1 %v3752_v50  ;;  %3522 = vmatprep.subr.bf16.mxu0 %v3753_v57  ;;  %v3162_v20 = vld [vmem:[%s4822_s18] ss:$0 sm:$0xff] }
 0x53f   : > { %3542 = vmatprep.subr.bf16.mxu1 %v3754_v5  ;;  %v3167_v23 = vld [vmem:[%s4823_s29] ss:$0 sm:$0xff] }
 0x541   : > { %3523 = vmatpush3.bf16.msra.mxu0 %v3753_v57 }
 0x542   : > { %3543 = vmatpush3.bf16.msra.mxu1 %v3754_v5  ;;  %3524 = vmatprep.subr.bf16.mxu0 %v3755_v27 }
 0x543   : > { %3544 = vmatprep.subr.bf16.mxu1 %v3756_v29 }
 0x545   : > { %3525 = vmatpush3.bf16.msra.mxu0 %v3755_v27 }
 0x546   : > { %3545 = vmatpush3.bf16.msra.mxu1 %v3756_v29  ;;  %3526 = vmatprep.subr.bf16.mxu0 %v3757_v47 }
 0x547   : > { %3546 = vmatprep.subr.bf16.mxu1 %v3758_v13 }
 0x549   : > { %3527 = vmatpush3.bf16.msra.mxu0 %v3757_v47 }
 0x54a   : > { %3547 = vmatpush3.bf16.msra.mxu1 %v3758_v13  ;;  %3528 = vmatprep.subr.bf16.mxu0 %v3759_v12 }
 0x54b   : > { %3548 = vmatprep.subr.bf16.mxu1 %v3760_v39 }
 0x54d   : > { %3529 = vmatpush3.bf16.msra.mxu0 %v3759_v12 }
 0x54e   : > { %3549 = vmatpush3.bf16.msra.mxu1 %v3760_v39  ;;  %3530 = vmatprep.subr.bf16.mxu0 %v3761_v37 }
 0x54f   : > { %3550 = vmatprep.subr.bf16.mxu1 %v3762_v30 }
 0x551   : > { %3531 = vmatpush3.bf16.msra.mxu0 %v3761_v37 }
 0x552   : > { %3551 = vmatpush3.bf16.msra.mxu1 %v3762_v30  ;;  %3556 = vmatprep.subr.bf16.mxu0 %v3763_v58 }
 0x554   : > { %3533 = vmatmul.mubr.bf16.vlgmr.msra.gmra.mxu0 %v2488_v11 }
 0x555   : > { %3553 = vmatmul.mubr.bf16.vlgmr.msra.gmra.mxu1 %v2466_v0  ;;  %3557 = vmatpush3.bf16.msra.mxu0 %v3763_v58 }
 0x556   : > { %3558 = vmatprep.subr.bf16.mxu0 %v3764_v35 }
 0x559   : > { %3559 = vmatpush3.bf16.msra.mxu0 %v3764_v35 }
 0x55a   : > { %3560 = vmatprep.subr.bf16.mxu0 %v3765_v28 }
 0x55d   : > { %3561 = vmatpush3.bf16.msra.mxu0 %v3765_v28 }
 0x55e   : > { %3562 = vmatprep.subr.bf16.mxu0 %v3766_v62 }
 0x561   : > { %3563 = vmatpush3.bf16.msra.mxu0 %v3766_v62 }
 0x562   : > { %3564 = vmatprep.subr.bf16.mxu0 %v3767_v38 }
 0x565   : > { %3565 = vmatpush3.bf16.msra.mxu0 %v3767_v38 }
 0x566   : > { %3566 = vmatprep.subr.bf16.mxu0 %v3768_v36 }
 0x569   : > { %3567 = vmatpush3.bf16.msra.mxu0 %v3768_v36 }
 0x56a   : > { %3568 = vmatprep.subr.bf16.mxu0 %v3769_v60 }
 0x56d   : > { %3569 = vmatpush3.bf16.msra.mxu0 %v3769_v60 }
 0x56e   : > { %3570 = vmatprep.subr.bf16.mxu0 %v3770_v14 }
 0x571   : > { %3571 = vmatpush3.bf16.msra.mxu0 %v3770_v14 }
 0x614   : > { %v3534_v4 = vpop.f32.mrf.mxu0 }
 0x615   : > { %v3554_v16 = vpop.f32.mrf.mxu1 }
 0x616   : > { %v2677_v22 = vadd.f32 %v3554_v16, %v3534_v4  ;;  %v2571_v24 = vpop.f32.mrf.mxu0 }
 0x617   : > { %v2668_v25 = vpop.f32.mrf.mxu1 }
 0x618   : > { %v2692_v44 = vadd.f32 %v3162_v20, %v2677_v22  ;;  %v2669_v18 = vadd.f32 %v2668_v25, %v2571_v24  ;;  %v3535_v46 = vpop.f32.mrf.mxu0 }
 0x619   : > { %v3555_v48 = vpop.f32.mrf.mxu1 }
 0x61a   : > { %v3165_v43 = vmul.f32 -1.442695, %v2692_v44  ;;  %v2690_v41 = vadd.f32 %v3162_v20, %v2669_v18  ;;  %v2680_v2 = vadd.f32 %v3555_v48, %v3535_v46  ;;  %v2574_v61 = vpop.f32.mrf.mxu0 }
 0x61b   : > { %v2671_v52 = vpop.f32.mrf.mxu1 }
 0x61c   : > { %v3163_v63 = vmul.f32 -1.442695, %v2690_v41  ;;  %v2693_v6 = vadd.f32 %v3162_v20, %v2680_v2  ;;  %v2672_v17 = vadd.f32 %v2671_v52, %v2574_v61  ;;  %3771 = vpow2.f32 %v3165_v43 }
 0x61e   : > { %3773 = vpow2.f32 %v3163_v63  ;;  %v3166_v15 = vmul.f32 -1.442695, %v2693_v6  ;;  %v2691_v53 = vadd.f32 %v3162_v20, %v2672_v17 }
 0x620   : > { %3775 = vpow2.f32 %v3166_v15  ;;  %v3164_v1 = vmul.f32 -1.442695, %v2691_v53 }
 0x622   : > { %3777 = vpow2.f32 %v3164_v1 }
 0x629   : > { %v3772_v26 = vpop.eup %3771 }
 0x62a   : > { %v2708_v55 = vadd.f32 1.0, %v3772_v26 }
 0x62b   : > { %v3774_v40 = vpop.eup %3773 }
 0x62c   : > { %v2706_v54 = vadd.f32 1.0, %v3774_v40  ;;  %v3176_v40 = vld [vmem:[%s4824_s30] ss:$0 sm:$0xff] }
 0x62d   : > { %v3776_v33 = vpop.eup %3775 }
 0x62e   : > { %v2709_v56 = vadd.f32 1.0, %v3776_v33  ;;  %3779 = vrcp.f32 %v2706_v54  ;;  %v3177_v33 = vld [vmem:[%s4825_s27] ss:$0 sm:$0xff] }
 0x62f   : > { %v3778_v8 = vpop.eup %3777 }
 0x630   : > { %3781 = vrcp.f32 %v2709_v56  ;;  %v2707_v49 = vadd.f32 1.0, %v3778_v8 }
 0x631   : > { %3783 = vrcp.f32 %v2708_v55 }
 0x632   : > { %3785 = vrcp.f32 %v2707_v49 }
 0x63b   : > { %v3780_v51 = vpop.eup %3779 }
 0x63c   : > { %v2718_v57 = vmul.f32 %v3780_v51, %v2690_v41 }
 0x63d   : > { %v3782_v59 = vpop.eup %3781 }
 0x63e   : > { %v3784_v42 = vpop.eup %3783  ;;  %v2721_v50 = vmul.f32 %v3782_v59, %v2693_v6 }
 0x63f   : > { %v3786_v45 = vpop.eup %3785  ;;  %v2720_v27 = vmul.f32 %v3784_v42, %v2692_v44 }
 0x640   : > { %v2719_v5 = vmul.f32 %v3786_v45, %v2691_v53 }
 0x641   : > { %v2739_v47 = vpack.c.bf16 %v2721_v50, %v2720_v27 }
 0x642   : > { %v2738_v29 = vpack.c.bf16 %v2719_v5, %v2718_v57 }
 0x644   : > { %3572 = vmatprep.mubr.bf16.mxu0 %v2738_v29 }
 0x645   : > { %3573 = vmatmul.mubr.bf16.vlgmr.msra.gmra.mxu0 %v2739_v47 }
 0x705   : > { %v3574_v32 = vpop.f32.mrf.mxu0 }
 0x706   : > { %v4743_v13 = vadd.f32 %v3574_v32, %v3167_v23 }
 0x707   : > { %v2829_v34 = vpop.f32.mrf.mxu0 }
 0x708   : > { %v2830_v12 = vadd.f32 %v3167_v23, %v2829_v34  ;;  %2850 = vadd.xlane.f32.xlu1 %v4743_v13  ;;  %v2860_v0 = vmul.f32 %v4743_v13, %v4743_v13 }
 0x709   : > { %v3575_v19 = vpop.f32.mrf.mxu0 }
 0x70a   : > { %v2841_v39 = vadd.f32 %v3575_v19, %v3167_v23  ;;  %2846 = vadd.xlane.f32.xlu0 %v2830_v12  ;;  %v2858_v7 = vmul.f32 %v2830_v12, %v2830_v12 }
 0x70b   : > { %v2832_v37 = vpop.f32.mrf.mxu0 }
 0x70c   : > { %v2833_v30 = vadd.f32 %v3167_v23, %v2832_v37  ;;  %2852 = vadd.xlane.f32.xlu1 %v2841_v39  ;;  %v2861_v11 = vmul.f32 %v2841_v39, %v2841_v39 }
 0x70e   : > { %2862 = vadd.xlane.f32.xlu0 %v2858_v7  ;;  %v2859_v10 = vmul.f32 %v2833_v30, %v2833_v30 }
 0x710   : > { %2864 = vadd.xlane.f32.xlu1 %v2859_v10 }
 0x712   : > { %2848 = vadd.xlane.f32.xlu0 %v2833_v30 }
 0x714   : > { %2868 = vadd.xlane.f32.xlu1 %v2861_v11 }
 0x716   : > { %2866 = vadd.xlane.f32.xlu0 %v2860_v0 }
 0x791   : > { %v2851_v58 = vpop.xlane.xlu1 %2850 }
 0x792   : > { %v2856_v22 = vmul.f32 0.03125, %v2851_v58 }
 0x793   : > { %v2847_v35 = vpop.xlane.xlu0 %2846 }
 0x794   : > { %v2854_v28 = vmul.f32 0.03125, %v2847_v35  ;;  %v2876_v2 = vmul.f32 %v2856_v22, %v2856_v22  ;;  %v2892_v42 = vsub.f32 %v4743_v13, %v2856_v22 }
 0x795   : > { %v2853_v62 = vpop.xlane.xlu1 %2852 }
 0x796   : > { %v2874_v36 = vmul.f32 %v2854_v28, %v2854_v28  ;;  %v2857_v14 = vmul.f32 0.03125, %v2853_v62  ;;  %v2890_v1 = vsub.f32 %v2830_v12, %v2854_v28 }
 0x797   : > { %v2863_v38 = vpop.xlane.xlu0 %2862 }
 0x798   : > { %v2870_v60 = vmul.f32 0.03125, %v2863_v38  ;;  %v2877_v44 = vmul.f32 %v2857_v14, %v2857_v14  ;;  %v2893_v51 = vsub.f32 %v2841_v39, %v2857_v14 }
 0x799   : > { %v2865_v4 = vpop.xlane.xlu1 %2864 }
 0x79a   : > { %v2878_v16 = vsub.f32 %v2870_v60, %v2874_v36  ;;  %v2871_v46 = vmul.f32 0.03125, %v2865_v4 }
 0x79b   : > { %v2849_v20 = vpop.xlane.xlu0 %2848 }
 0x79c   : > { %v2882_v24 = vadd.f32 1e-05, %v2878_v16  ;;  %v2855_v25 = vmul.f32 0.03125, %v2849_v20 }
 0x79d   : > { %v2869_v18 = vpop.xlane.xlu1 %2868 }
 0x79e   : > { %3787 = vrsqrt.f32 %v2882_v24  ;;  %v2875_v48 = vmul.f32 %v2855_v25, %v2855_v25  ;;  %v2873_v43 = vmul.f32 0.03125, %v2869_v18  ;;  %v2891_v8 = vsub.f32 %v2833_v30, %v2855_v25 }
 0x79f   : > { %v2867_v41 = vpop.xlane.xlu0 %2866 }
 0x7a0   : > { %v2879_v61 = vsub.f32 %v2871_v46, %v2875_v48  ;;  %v2881_v52 = vsub.f32 %v2873_v43, %v2877_v44  ;;  %v2872_v63 = vmul.f32 0.03125, %v2867_v41 }
 0x7a2   : > { %v2883_v6 = vadd.f32 1e-05, %v2879_v61  ;;  %v2885_v17 = vadd.f32 1e-05, %v2881_v52  ;;  %v2880_v15 = vsub.f32 %v2872_v63, %v2876_v2 }
 0x7a4   : > { %3789 = vrsqrt.f32 %v2883_v6  ;;  %v2884_v53 = vadd.f32 1e-05, %v2880_v15 }
 0x7a5   : > { %3791 = vrsqrt.f32 %v2885_v17 }
 0x7a6   : > { %3793 = vrsqrt.f32 %v2884_v53 }
 0x7ab   : > { %v3788_v26 = vpop.eup %3787 }
 0x7ac   : > { %v2894_v54 = vmul.f32 %v3788_v26, %v2890_v1 }
 0x7ae   : > { %v2904_v55 = vmul.f32 %v3176_v40, %v2894_v54 }
 0x7b0   : > { %v2914_v56 = vadd.f32 %v3177_v33, %v2904_v55 }
 0x7b1   : > { %v3790_v49 = vpop.eup %3789 }
 0x7b2   : > { %v3792_v59 = vpop.eup %3791  ;;  %v2918_v45 = vadd.f32 %v2914_v56, %v4677_v3  ;;  %v2895_v50 = vmul.f32 %v3790_v49, %v2891_v8 }
 0x7b3   : > { %v3794_v57 = vpop.eup %3793  ;;  %v2897_v5 = vmul.f32 %v3792_v59, %v2893_v51 }
 0x7b4   : > { %2922 = vst [vmem:[#allocation5] sm:$0xff] %v2918_v45  ;;  %v2905_v27 = vmul.f32 %v3176_v40, %v2895_v50  ;;  %v2896_v29 = vmul.f32 %v3794_v57, %v2892_v42 }
 0x7b5   : > { %v2907_v47 = vmul.f32 %v3176_v40, %v2897_v5 }
 0x7b6   : > { %v2915_v23 = vadd.f32 %v3177_v33, %v2905_v27  ;;  %v2906_v32 = vmul.f32 %v3176_v40, %v2896_v29 }
 0x7b7   : > { %v2917_v34 = vadd.f32 %v3177_v33, %v2907_v47 }
 0x7b8   : > { %v2919_v12 = vadd.f32 %v2915_v23, %v4685_v9  ;;  %v2916_v19 = vadd.f32 %v3177_v33, %v2906_v32 }
 0x7b9   : > { %v2921_v39 = vadd.f32 %v2917_v34, %v4709_v21 }
 0x7ba   : > { %2923 = vst [vmem:[#allocation5 + $0x8] sm:$0xff] %v2919_v12  ;;  %v2920_v13 = vadd.f32 %v2916_v19, %v4704_v31 }
 0x7bb   : > { %2925 = vst [vmem:[#allocation5 + $0x18] sm:$0xff] %v2921_v39 }
 0x7bc   : > { %2924 = vst [vmem:[#allocation5 + $0x10] sm:$0xff] %v2920_v13 }
 0x7bd PF: > { %p3580_p7 = scmp.eq.s32.totalorder %s3954_s25, 3  ;;  %s3835_s0 = smov [#allocation5]  }
 0x7be   : > { %s2932_s24 = sshll.u32 %s3835_s0, 4  ;;  %s2933_s24 = int_to_ptr.vmem [resolvable:$true] %s2932_s24 }
 0x7bf   : > { %s3795_s3 = scalar_lea.vmem %s2933_s24, 512  ;;  %p3802_p11 = scmp.lt.s32.totalorder %s2933_s24, %s2933_s24 }
 0x7c0   : > { %p3796_p8 = scmp.ne.s32.totalorder %s2933_s24, %s3795_s3  ;;  %p3803_p12 = scmp.lt.s32.totalorder %s3795_s3, %s3795_s3 }
 0x7c2   : > { %p3797_p9 = pnand %p3796_p8, %p3580_p7  ;;  %p3804_p13 = por %p3803_p12, %p3802_p11 }
 0x7c4   : > { %p3798_p10 = pneg %p3797_p9 }
 0x7c6   : > { %p3805_p0 = pnand %p3804_p13, %p3798_p10 }
 0x7c8   : > { %3808 = shalt.err (!%p3805_p0)
}
 0x7c9   : > { %s3836_s16 = smov 128   ;;  %s3837_s26 = smov 8  }
 0x7ca   : > { %s4826_s19 = sld [smem:[#allocation19_spill]] }
 0x7d0   : > { %3577 = dma.vmem_to_hbm [thread:$0]  (%p3580_p7), %s2933_s24, 512, %s4826_s19, [#allocation6], %s3836_s16, %s3836_s16, %s3837_s26  }
 0x7d1   : > { %3824 = dma.done.wait (%p3580_p7), [#allocation6], 512  }
 0x7d2   : > { %3826 = vsyncadd (%p3580_p7), [#allocation6], 4294966784 }
 0x7d3 PF: > { %s4827_s18 = sld [smem:[#allocation8_spill]] }
 0x7d9   : > { %s32_s2 = sadd.s32 1, %s4827_s18  }
 0x7da   : > { %p29_p1 = scmp.ge.s32.totalorder %s32_s2, 6  }
 0x7dc   :  { %31 = sbr.rel (!%p29_p1) target bundleno = 13 (0xd), region = 148 }
 0x7e1   :  { %2948 = vsyncpa [#allocation6], 1 }
 0x7e2   :  { %2950 = vsyncpa [#allocation6 + $0x1], 1 }

</bundles_post_ra>
